<compile_context>
chip_gen: v7x
topology: tpu7x:2x2x1
jax: 0.10.0
libtpu: 0.0.40
codegen_flags: <defaults>
</compile_context>

<pallas_src>
import jax
import jax.numpy as jnp
import numpy as np
from jax import lax
from jax.experimental import pallas as pl
from jax.experimental.pallas import tpu as pltpu


def _round_up(a, m):
    return ((a + m - 1) // m) * m


# ----------------------------------------------------------------------------
# Kernel
# ----------------------------------------------------------------------------
def _make_kernel(T, TB, Hp, Tc, mxu_dtype, unroll):
    """Kernel for one batch block of TB (padded) rows."""
    G = 3 * Hp

    def sigm(v):  # sigmoid(x) == 0.5*(1 + tanh(x/2)): single EUP push
        return 0.5 * jnp.tanh(0.5 * v) + 0.5

    def kernel(
        x_ref,        # (T, TB, Hp)   x dtype, time-major, zero-padded input block
        wih_f_ref,    # (Hp, 3Hp)     fwd W_ih (transposed, Hp-wide gate blocks)
        whh_f_ref,    # (Hp, 3Hp)     fwd W_hh
        bi_f_ref,     # (1, 3Hp)      f32: [b_ir+b_hr | b_iz+b_hz | b_in]
        bhn_f_ref,    # (1, Hp)       f32: b_hn (n-gate recurrent bias)
        wih_b_ref,    # (Hp, 3Hp)     bwd W_ih
        whh_b_ref,    # (Hp, 3Hp)     bwd W_hh
        bi_b_ref,     # (1, 3Hp)
        bhn_b_ref,    # (1, Hp)
        wlin_ref,     # (2Hp, 2Hp)    Linear weight: rows [fwd|bwd], cols [a|gate]
        blin_ref,     # (1, 2Hp)      f32
        out_ref,      # (T, TB, Hp)   f32 output
        gru_ref,      # scratch (T, TB, 2Hp) f32: fwd in lanes [0:Hp], bwd in [Hp:2Hp]
    ):
        # ---- loop-invariant weight / bias loads (hoisted out of the recurrence)
        wih_f = wih_f_ref[...]
        whh_f = whh_f_ref[...]
        wih_b = wih_b_ref[...]
        whh_b = whh_b_ref[...]
        bi_f = bi_f_ref[...]
        bi_b = bi_b_ref[...]
        bhn_f = bhn_f_ref[...]
        bhn_b = bhn_b_ref[...]

        def gates(gi, gh, bhn, h):
            # PyTorch GRU gate order [r, z, n]; every slice is 128-lane aligned.
            r = sigm(gi[:, 0:Hp] + gh[:, 0:Hp])
            z = sigm(gi[:, Hp:2 * Hp] + gh[:, Hp:2 * Hp])
            n = jnp.tanh(gi[:, 2 * Hp:G] + r * (gh[:, 2 * Hp:G] + bhn))
            return (1.0 - z) * n + z * h

        h0 = jnp.zeros((TB, Hp), jnp.float32)

        # ---- fused fwd + bwd recurrence; input projections computed per step
        # (they hide under the latency-bound recurrent matmuls -> no O(T) scratch)
        def step(i, carry):
            h_f, h_b = carry
            t_b = T - 1 - i
            gi_f = jnp.dot(x_ref[i].astype(mxu_dtype), wih_f,
                           preferred_element_type=jnp.float32) + bi_f
            gi_b = jnp.dot(x_ref[t_b].astype(mxu_dtype), wih_b,
                           preferred_element_type=jnp.float32) + bi_b
            gh_f = jnp.dot(h_f.astype(mxu_dtype), whh_f,
                           preferred_element_type=jnp.float32)
            gh_b = jnp.dot(h_b.astype(mxu_dtype), whh_b,
                           preferred_element_type=jnp.float32)
            h_f = gates(gi_f, gh_f, bhn_f, h_f)
            h_b = gates(gi_b, gh_b, bhn_b, h_b)
            gru_ref[i, :, 0:Hp] = h_f
            gru_ref[t_b, :, Hp:2 * Hp] = h_b
            return h_f, h_b

        lax.fori_loop(0, T, step, (h0, h0), unroll=unroll)

        # ---- epilogue: Linear(2H->2H) + Tanh + GLU as ONE K=2Hp matmul (fills
        # the 256-wide v6e/v7x MXU), chunked over T to bound VMEM temporaries.
        wlin = wlin_ref[...]
        blin = blin_ref[...]

        def epilogue(t0, nst):
            g2 = gru_ref[pl.ds(t0, nst)].reshape(nst * TB, 2 * Hp).astype(mxu_dtype)
            y = jnp.tanh(jnp.dot(g2, wlin, preferred_element_type=jnp.float32) + blin)
            out_ref[pl.ds(t0, nst)] = (
                y[:, 0:Hp] * sigm(y[:, Hp:2 * Hp])).reshape(nst, TB, Hp)

        n_full = T // Tc
        if n_full > 0:
            def epi_body(c, carry):
                epilogue(pl.multiple_of(c * Tc, Tc), Tc)
                return carry
            lax.fori_loop(0, n_full, epi_body, 0)
        if T % Tc:
            epilogue(n_full * Tc, T % Tc)

    return kernel


# ----------------------------------------------------------------------------
# Parameter padding helpers (all padding is done once, in the wrapper)
# ----------------------------------------------------------------------------
def _pad_gate_w(w, H, Hp, dtype):
    """(3H, H) PyTorch GRU weight -> (Hp, 3Hp) transposed, Hp-wide gate blocks."""
    wt = jnp.asarray(w).T                                   # (H, 3H), cols [r|z|n]
    out = jnp.zeros((Hp, 3 * Hp), jnp.float32)
    for g in range(3):
        out = out.at[:H, g * Hp:g * Hp + H].set(wt[:, g * H:(g + 1) * H])
    return out.astype(dtype)


def _pad_gru_bias(bih, bhh, H, Hp):
    """Fold b_hh into b_ih for the r/z gates; keep the n-gate b_hh separate."""
    comb = jnp.zeros((1, 3 * Hp), jnp.float32)
    comb = comb.at[0, 0:H].set(bih[0:H] + bhh[0:H])                   # r
    comb = comb.at[0, Hp:Hp + H].set(bih[H:2 * H] + bhh[H:2 * H])     # z
    comb = comb.at[0, 2 * Hp:2 * Hp + H].set(bih[2 * H:3 * H])        # n (input side)
    bhn = jnp.zeros((1, Hp), jnp.float32).at[0, :H].set(bhh[2 * H:3 * H])
    return comb, bhn


def _pad_lin_w(wlin, H, Hp, dtype):
    """(2H, 2H) Linear weight -> (2Hp, 2Hp): rows [fwd|bwd]@Hp, cols [a|gate]@Hp."""
    wt = jnp.asarray(wlin).T                                 # (in=2H, out=2H)
    out = jnp.zeros((2 * Hp, 2 * Hp), jnp.float32)
    out = out.at[0:H, 0:H].set(wt[0:H, 0:H])
    out = out.at[0:H, Hp:Hp + H].set(wt[0:H, H:2 * H])
    out = out.at[Hp:Hp + H, 0:H].set(wt[H:2 * H, 0:H])
    out = out.at[Hp:Hp + H, Hp:Hp + H].set(wt[H:2 * H, H:2 * H])
    return out.astype(dtype)


def _pad_lin_b(b, H, Hp):
    out = jnp.zeros((1, 2 * Hp), jnp.float32)
    out = out.at[0, :H].set(b[:H])
    out = out.at[0, Hp:Hp + H].set(b[H:])
    return out


def _vmem_capacity_bytes():
    """Physical VMEM per TensorCore (64 MiB on v7x, 128 MiB on v5e/v6e)."""
    try:
        cap = int(pltpu.get_tpu_info().vmem_capacity_bytes)
        if cap > 0:
            return cap
    except Exception:
        pass
    return 64 * 1024 * 1024            # conservative fallback (safe on every gen)


# ----------------------------------------------------------------------------
# Public wrapper
# ----------------------------------------------------------------------------
def event_interaction_forward(x, p, *, mxu_dtype=jnp.float32, epilogue_chunk=None):
    """x: (B, T, H) batch-first (like nn.GRU(batch_first=True)). Returns (B, T, H).

    mxu_dtype: dtype fed to the MXU (weights, x block, matmul LHS).  Use
    jnp.bfloat16 on v6e/v7x for ~2x MXU throughput and half the x DMA; the
    default stays float32 (v5e has no bf16 VPU/EUP, so casts can eat the gain).
    Accumulation and the recurrent hidden state always stay float32.
    """
    B, T, H = x.shape
    Hp = _round_up(H, 128)                 # lane-aligned hidden size
    B8 = _round_up(B, 8)                   # sublane-aligned batch
    x_dtype = mxu_dtype
    xb = jnp.dtype(x_dtype).itemsize
    wb = jnp.dtype(mxu_dtype).itemsize

    # ---- pick the batch tile TB from the real per-core VMEM capacity ----------
    cap = _vmem_capacity_bytes()
    # per batch-row bytes that scale with TB: x (2 pipeline bufs) + out (2 bufs,
    # f32) + the (T, TB, 2Hp) f32 GRU-output scratch.
    per_row = T * Hp * (2 * xb + 2 * 4 + 2 * 4)
    weight_bytes = 2 * (16 * Hp * Hp * wb + 10 * Hp * 4)     # double-buffered weights
    margin = 8 * 1024 * 1024            # loop/epilogue temporaries + compiler scratch
    budget = int(0.85 * cap) - weight_bytes - margin
    tb_vmem = (budget // per_row) // 8 * 8 if budget > 0 else 0
    TB = max(8, min(B8, 128, tb_vmem))
    if B8 >= 16:                        # keep >=2 grid programs so both v7x TCs work
        TB = min(TB, max(8, (B8 // 2) // 8 * 8))
    Bp = _round_up(B8, TB)
    grid = (Bp // TB,)

    vmem_needed = TB * per_row + weight_bytes + margin
    vmem_limit = int(min(cap, max(vmem_needed * 1.15, 32 * 1024 * 1024)))
    # TODO(synk): if even TB=8 exceeds VMEM (very long T), a time-blocked grid
    # axis carrying the hidden state in persistent scratch would be required.

    if epilogue_chunk is None:
        Tc = max(1, min(T, max(1, 512 // TB)))   # ~512 MXU rows per epilogue matmul
    else:
        Tc = max(1, min(T, int(epilogue_chunk)))
    unroll = True if T <= 8 else 2

    # ---- host-side packing / padding ------------------------------------------
    x_tm = jnp.transpose(x, (1, 0, 2)).astype(jnp.float32)             # (T, B, H)
    x_pad = (jnp.zeros((T, Bp, Hp), jnp.float32)
             .at[:, :B, :H].set(x_tm).astype(x_dtype))

    wih_f = _pad_gate_w(p["wih_f"], H, Hp, mxu_dtype)
    whh_f = _pad_gate_w(p["whh_f"], H, Hp, mxu_dtype)
    bi_f, bhn_f = _pad_gru_bias(p["bih_f"], p["bhh_f"], H, Hp)
    wih_b = _pad_gate_w(p["wih_b"], H, Hp, mxu_dtype)
    whh_b = _pad_gate_w(p["whh_b"], H, Hp, mxu_dtype)
    bi_b, bhn_b = _pad_gru_bias(p["bih_b"], p["bhh_b"], H, Hp)
    wlin = _pad_lin_w(p["wlin"], H, Hp, mxu_dtype)
    blin = _pad_lin_b(p["blin"], H, Hp)

    kernel = _make_kernel(T, TB, Hp, Tc, mxu_dtype, unroll)

    def w_spec(shape):
        return pl.BlockSpec(shape, lambda i: (0, 0))

    in_specs = [
        pl.BlockSpec((T, TB, Hp), lambda i: (0, i, 0)),                # x block
        w_spec((Hp, 3 * Hp)), w_spec((Hp, 3 * Hp)),
        w_spec((1, 3 * Hp)), w_spec((1, Hp)),
        w_spec((Hp, 3 * Hp)), w_spec((Hp, 3 * Hp)),
        w_spec((1, 3 * Hp)), w_spec((1, Hp)),
        w_spec((2 * Hp, 2 * Hp)), w_spec((1, 2 * Hp)),
    ]
    out_spec = pl.BlockSpec((T, TB, Hp), lambda i: (0, i, 0))

    out_pad = pl.pallas_call(
        kernel,
        out_shape=jax.ShapeDtypeStruct((T, Bp, Hp), jnp.float32),
        grid_spec=pltpu.PrefetchScalarGridSpec(
            num_scalar_prefetch=0,
            grid=grid,
            in_specs=in_specs,
            out_specs=out_spec,
            scratch_shapes=[pltpu.VMEM((T, TB, 2 * Hp), jnp.float32)],  # GRU outputs
        ),
        compiler_params=pltpu.CompilerParams(
            dimension_semantics=("parallel",),
            vmem_limit_bytes=vmem_limit,
        ),
    )(x_pad, wih_f, whh_f, bi_f, bhn_f,
      wih_b, whh_b, bi_b, bhn_b, wlin, blin)

    out = out_pad[:, :B, :H]                  # strip batch / lane padding
    return jnp.transpose(out, (1, 0, 2))      # back to batch-first (B, T, H)


# ----------------------------------------------------------------------------
# Parameters + pure-JAX reference (mirrors PyTorch semantics)
# ----------------------------------------------------------------------------
def init_params(key, H):
    """Deterministic synthetic init (PyTorch-style uniform(-1/sqrt(H), 1/sqrt(H)))."""
    k = 1.0 / np.sqrt(H)
    ks = jax.random.split(key, 10)
    u = lambda kk, shape: jax.random.uniform(kk, shape, jnp.float32, -k, k)
    return dict(
        wih_f=u(ks[0], (3 * H, H)), whh_f=u(ks[1], (3 * H, H)),
        bih_f=u(ks[2], (3 * H,)),   bhh_f=u(ks[3], (3 * H,)),
        wih_b=u(ks[4], (3 * H, H)), whh_b=u(ks[5], (3 * H, H)),
        bih_b=u(ks[6], (3 * H,)),   bhh_b=u(ks[7], (3 * H,)),
        wlin=u(ks[8], (2 * H, 2 * H)), blin=u(ks[9], (2 * H,)),
    )


def reference_forward(x, p):
    """Pure-JAX reference (bi-GRU -> Linear -> Tanh -> GLU), float32."""
    B, T, H = x.shape

    def cell(h, x_t, wih, whh, bih, bhh):
        gi = x_t @ wih.T + bih
        gh = h @ whh.T + bhh
        r = jax.nn.sigmoid(gi[:, :H] + gh[:, :H])
        z = jax.nn.sigmoid(gi[:, H:2 * H] + gh[:, H:2 * H])
        n = jnp.tanh(gi[:, 2 * H:] + r * gh[:, 2 * H:])
        return (1.0 - z) * n + z * h

    xs = jnp.transpose(x, (1, 0, 2)).astype(jnp.float32)    # (T, B, H)
    h0 = jnp.zeros((B, H), jnp.float32)

    def f_scan(h, x_t):
        h = cell(h, x_t, p["wih_f"], p["whh_f"], p["bih_f"], p["bhh_f"])
        return h, h

    def b_scan(h, x_t):
        h = cell(h, x_t, p["wih_b"], p["whh_b"], p["bih_b"], p["bhh_b"])
        return h, h

    _, hs_f = lax.scan(f_scan, h0, xs)
    _, hs_b = lax.scan(b_scan, h0, xs[::-1])
    hs_b = hs_b[::-1]
    gru = jnp.concatenate([hs_f, hs_b], axis=-1)             # (T, B, 2H)
    gru = jnp.transpose(gru, (1, 0, 2))                      # (B, T, 2H)
    y = jnp.tanh(gru @ p["wlin"].T + p["blin"])
    a, gate = y[..., :H], y[..., H:]
    return a * jax.nn.sigmoid(gate)


if __name__ == "__main__":
    key = jax.random.PRNGKey(0)
    k_x1, k_p1, k_x2, k_p2 = jax.random.split(key, 4)

    # --- Config 1: small shapes implied by the module -------------------------
    B, T, H = 2, 8, 32
    x = jax.random.normal(k_x1, (B, T, H), dtype=jnp.float32)
    params = init_params(k_p1, H)
    ref = jax.block_until_ready(reference_forward(x, params))

    out_f32 = jax.block_until_ready(
        event_interaction_forward(x, params, mxu_dtype=jnp.float32))
    np.testing.assert_allclose(np.asarray(out_f32), np.asarray(ref),
                               rtol=1e-5, atol=3e-5)

    # bf16 MXU inputs (f32 accumulate / f32 hidden state), as used on v6e/v7x.
    out_bf16 = jax.block_until_ready(
        event_interaction_forward(x, params, mxu_dtype=jnp.bfloat16))
    np.testing.assert_allclose(np.asarray(out_bf16), np.asarray(ref),
                               rtol=0.0, atol=1e-1)

    # --- Config 2: multi-program batch grid (v7x megacore path) + chunked
    # epilogue with a remainder chunk --------------------------------------------
    B2, T2, H2 = 20, 8, 32
    x2 = jax.random.normal(k_x2, (B2, T2, H2), dtype=jnp.float32)
    params2 = init_params(k_p2, H2)
    ref2 = jax.block_until_ready(reference_forward(x2, params2))
    out2 = jax.block_until_ready(
        event_interaction_forward(x2, params2, mxu_dtype=jnp.float32,
                                  epilogue_chunk=3))
    np.testing.assert_allclose(np.asarray(out2), np.asarray(ref2),
                               rtol=1e-5, atol=3e-5)

    print("KERNEL_OK")
</pallas_src>

<mosaic_0001>
module attributes {stable_mosaic.version = 11 : i64} {
  func.func @kernel(%arg0: i32, %arg1: memref<8x8x128xf32, #tpu.memory_space<vmem>>, %arg2: memref<128x384xf32, #tpu.memory_space<vmem>>, %arg3: memref<128x384xf32, #tpu.memory_space<vmem>>, %arg4: memref<1x384xf32, #tpu.memory_space<vmem>>, %arg5: memref<1x128xf32, #tpu.memory_space<vmem>>, %arg6: memref<128x384xf32, #tpu.memory_space<vmem>>, %arg7: memref<128x384xf32, #tpu.memory_space<vmem>>, %arg8: memref<1x384xf32, #tpu.memory_space<vmem>>, %arg9: memref<1x128xf32, #tpu.memory_space<vmem>>, %arg10: memref<256x256xf32, #tpu.memory_space<vmem>>, %arg11: memref<1x256xf32, #tpu.memory_space<vmem>>, %arg12: memref<8x8x128xf32, #tpu.memory_space<vmem>>, %arg13: memref<8x8x256xf32, #tpu.memory_space<vmem>>) attributes {dimension_semantics = [#tpu.dimension_semantics<parallel>], iteration_bounds = array<i64: 1>, scalar_prefetch = 0 : i64, scratch_operands = 1 : i64, tpu.core_type = #tpu.core_type<tc>, window_params = [{transform_indices = @transform_0, window_bounds = array<i64: 8, 8, 128>}, {pipeline_mode = #tpu.pipeline_mode<synchronous>, transform_indices = @transform_1, window_bounds = array<i64: 128, 384>}, {pipeline_mode = #tpu.pipeline_mode<synchronous>, transform_indices = @transform_2, window_bounds = array<i64: 128, 384>}, {pipeline_mode = #tpu.pipeline_mode<synchronous>, transform_indices = @transform_3, window_bounds = array<i64: 1, 384>}, {pipeline_mode = #tpu.pipeline_mode<synchronous>, transform_indices = @transform_4, window_bounds = array<i64: 1, 128>}, {pipeline_mode = #tpu.pipeline_mode<synchronous>, transform_indices = @transform_5, window_bounds = array<i64: 128, 384>}, {pipeline_mode = #tpu.pipeline_mode<synchronous>, transform_indices = @transform_6, window_bounds = array<i64: 128, 384>}, {pipeline_mode = #tpu.pipeline_mode<synchronous>, transform_indices = @transform_7, window_bounds = array<i64: 1, 384>}, {pipeline_mode = #tpu.pipeline_mode<synchronous>, transform_indices = @transform_8, window_bounds = array<i64: 1, 128>}, {pipeline_mode = #tpu.pipeline_mode<synchronous>, transform_indices = @transform_9, window_bounds = array<i64: 256, 256>}, {pipeline_mode = #tpu.pipeline_mode<synchronous>, transform_indices = @transform_10, window_bounds = array<i64: 1, 256>}, {transform_indices = @transform_11, window_bounds = array<i64: 8, 8, 128>}]} {
    %c0 = arith.constant 0 : index
    %c0_0 = arith.constant 0 : index
    %0 = vector.load %arg2[%c0, %c0_0] : memref<128x384xf32, #tpu.memory_space<vmem>>, vector<128x384xf32>
    %c0_1 = arith.constant 0 : index
    %c0_2 = arith.constant 0 : index
    %1 = vector.load %arg3[%c0_1, %c0_2] : memref<128x384xf32, #tpu.memory_space<vmem>>, vector<128x384xf32>
    %c0_3 = arith.constant 0 : index
    %c0_4 = arith.constant 0 : index
    %2 = vector.load %arg6[%c0_3, %c0_4] : memref<128x384xf32, #tpu.memory_space<vmem>>, vector<128x384xf32>
    %c0_5 = arith.constant 0 : index
    %c0_6 = arith.constant 0 : index
    %3 = vector.load %arg7[%c0_5, %c0_6] : memref<128x384xf32, #tpu.memory_space<vmem>>, vector<128x384xf32>
    %c0_7 = arith.constant 0 : index
    %c0_8 = arith.constant 0 : index
    %4 = vector.load %arg4[%c0_7, %c0_8] : memref<1x384xf32, #tpu.memory_space<vmem>>, vector<1x384xf32>
    %c0_9 = arith.constant 0 : index
    %c0_10 = arith.constant 0 : index
    %5 = vector.load %arg8[%c0_9, %c0_10] : memref<1x384xf32, #tpu.memory_space<vmem>>, vector<1x384xf32>
    %c0_11 = arith.constant 0 : index
    %c0_12 = arith.constant 0 : index
    %6 = vector.load %arg5[%c0_11, %c0_12] : memref<1x128xf32, #tpu.memory_space<vmem>>, vector<1x128xf32>
    %c0_13 = arith.constant 0 : index
    %c0_14 = arith.constant 0 : index
    %7 = vector.load %arg9[%c0_13, %c0_14] : memref<1x128xf32, #tpu.memory_space<vmem>>, vector<1x128xf32>
    %cst = arith.constant 0.000000e+00 : f32
    %8 = vector.broadcast %cst : f32 to vector<8x128xf32>
    %c0_i32 = arith.constant 0 : i32
    %c7_i32 = arith.constant 7 : i32
    %9 = arith.subi %c7_i32, %c0_i32 : i32
    %10 = arith.index_cast %c0_i32 : i32 to index
    %c0_15 = arith.constant 0 : index
    %c0_16 = arith.constant 0 : index
    %11 = vector.load %arg1[%10, %c0_15, %c0_16] : memref<8x8x128xf32, #tpu.memory_space<vmem>>, vector<1x8x128xf32>
    %12 = vector.shape_cast %11 : vector<1x8x128xf32> to vector<8x128xf32>
    %cst_17 = arith.constant dense<0.000000e+00> : vector<8x384xf32>
    %13 = tpu.matmul %12, %0, %cst_17 {dimension_numbers = #tpu.dot_dimension_numbers<[1], [0], [0], [1], [0, 0, 1, 1], [], []>} : vector<8x128xf32>, vector<128x384xf32>, vector<8x384xf32> -> vector<8x384xf32>
    %14 = vector.broadcast %4 : vector<1x384xf32> to vector<8x384xf32>
    %15 = arith.addf %13, %14 : vector<8x384xf32>
    %16 = arith.index_cast %9 : i32 to index
    %c0_18 = arith.constant 0 : index
    %c0_19 = arith.constant 0 : index
    %17 = vector.load %arg1[%16, %c0_18, %c0_19] : memref<8x8x128xf32, #tpu.memory_space<vmem>>, vector<1x8x128xf32>
    %18 = vector.shape_cast %17 : vector<1x8x128xf32> to vector<8x128xf32>
    %cst_20 = arith.constant dense<0.000000e+00> : vector<8x384xf32>
    %19 = tpu.matmul %18, %2, %cst_20 {dimension_numbers = #tpu.dot_dimension_numbers<[1], [0], [0], [1], [0, 0, 1, 1], [], []>} : vector<8x128xf32>, vector<128x384xf32>, vector<8x384xf32> -> vector<8x384xf32>
    %20 = vector.broadcast %5 : vector<1x384xf32> to vector<8x384xf32>
    %21 = arith.addf %19, %20 : vector<8x384xf32>
    %cst_21 = arith.constant dense<0.000000e+00> : vector<8x384xf32>
    %22 = tpu.matmul %8, %1, %cst_21 {dimension_numbers = #tpu.dot_dimension_numbers<[1], [0], [0], [1], [0, 0, 1, 1], [], []>} : vector<8x128xf32>, vector<128x384xf32>, vector<8x384xf32> -> vector<8x384xf32>
    %cst_22 = arith.constant dense<0.000000e+00> : vector<8x384xf32>
    %23 = tpu.matmul %8, %3, %cst_22 {dimension_numbers = #tpu.dot_dimension_numbers<[1], [0], [0], [1], [0, 0, 1, 1], [], []>} : vector<8x128xf32>, vector<128x384xf32>, vector<8x384xf32> -> vector<8x384xf32>
    %24 = vector.extract_strided_slice %15 {offsets = [0, 0], sizes = [8, 128], strides = [1, 1]} : vector<8x384xf32> to vector<8x128xf32>
    %25 = vector.extract_strided_slice %22 {offsets = [0, 0], sizes = [8, 128], strides = [1, 1]} : vector<8x384xf32> to vector<8x128xf32>
    %26 = arith.addf %24, %25 : vector<8x128xf32>
    %cst_23 = arith.constant 5.000000e-01 : f32
    %27 = vector.broadcast %cst_23 : f32 to vector<8x128xf32>
    %28 = arith.mulf %27, %26 : vector<8x128xf32>
    %29 = math.tanh %28 : vector<8x128xf32>
    %cst_24 = arith.constant 5.000000e-01 : f32
    %30 = vector.broadcast %cst_24 : f32 to vector<8x128xf32>
    %31 = arith.mulf %30, %29 : vector<8x128xf32>
    %cst_25 = arith.constant 5.000000e-01 : f32
    %32 = vector.broadcast %cst_25 : f32 to vector<8x128xf32>
    %33 = arith.addf %31, %32 : vector<8x128xf32>
    %34 = vector.extract_strided_slice %15 {offsets = [0, 128], sizes = [8, 128], strides = [1, 1]} : vector<8x384xf32> to vector<8x128xf32>
    %35 = vector.extract_strided_slice %22 {offsets = [0, 128], sizes = [8, 128], strides = [1, 1]} : vector<8x384xf32> to vector<8x128xf32>
    %36 = arith.addf %34, %35 : vector<8x128xf32>
    %cst_26 = arith.constant 5.000000e-01 : f32
    %37 = vector.broadcast %cst_26 : f32 to vector<8x128xf32>
    %38 = arith.mulf %37, %36 : vector<8x128xf32>
    %39 = math.tanh %38 : vector<8x128xf32>
    %cst_27 = arith.constant 5.000000e-01 : f32
    %40 = vector.broadcast %cst_27 : f32 to vector<8x128xf32>
    %41 = arith.mulf %40, %39 : vector<8x128xf32>
    %cst_28 = arith.constant 5.000000e-01 : f32
    %42 = vector.broadcast %cst_28 : f32 to vector<8x128xf32>
    %43 = arith.addf %41, %42 : vector<8x128xf32>
    %44 = vector.extract_strided_slice %15 {offsets = [0, 256], sizes = [8, 128], strides = [1, 1]} : vector<8x384xf32> to vector<8x128xf32>
    %45 = vector.extract_strided_slice %22 {offsets = [0, 256], sizes = [8, 128], strides = [1, 1]} : vector<8x384xf32> to vector<8x128xf32>
    %46 = vector.broadcast %6 : vector<1x128xf32> to vector<8x128xf32>
    %47 = arith.addf %45, %46 : vector<8x128xf32>
    %48 = arith.mulf %33, %47 : vector<8x128xf32>
    %49 = arith.addf %44, %48 : vector<8x128xf32>
    %50 = math.tanh %49 : vector<8x128xf32>
    %cst_29 = arith.constant 1.000000e+00 : f32
    %51 = vector.broadcast %cst_29 : f32 to vector<8x128xf32>
    %52 = arith.subf %51, %43 : vector<8x128xf32>
    %53 = arith.mulf %52, %50 : vector<8x128xf32>
    %54 = arith.mulf %43, %8 : vector<8x128xf32>
    %55 = arith.addf %53, %54 : vector<8x128xf32>
    %56 = vector.extract_strided_slice %21 {offsets = [0, 0], sizes = [8, 128], strides = [1, 1]} : vector<8x384xf32> to vector<8x128xf32>
    %57 = vector.extract_strided_slice %23 {offsets = [0, 0], sizes = [8, 128], strides = [1, 1]} : vector<8x384xf32> to vector<8x128xf32>
    %58 = arith.addf %56, %57 : vector<8x128xf32>
    %cst_30 = arith.constant 5.000000e-01 : f32
    %59 = vector.broadcast %cst_30 : f32 to vector<8x128xf32>
    %60 = arith.mulf %59, %58 : vector<8x128xf32>
    %61 = math.tanh %60 : vector<8x128xf32>
    %cst_31 = arith.constant 5.000000e-01 : f32
    %62 = vector.broadcast %cst_31 : f32 to vector<8x128xf32>
    %63 = arith.mulf %62, %61 : vector<8x128xf32>
    %cst_32 = arith.constant 5.000000e-01 : f32
    %64 = vector.broadcast %cst_32 : f32 to vector<8x128xf32>
    %65 = arith.addf %63, %64 : vector<8x128xf32>
    %66 = vector.extract_strided_slice %21 {offsets = [0, 128], sizes = [8, 128], strides = [1, 1]} : vector<8x384xf32> to vector<8x128xf32>
    %67 = vector.extract_strided_slice %23 {offsets = [0, 128], sizes = [8, 128], strides = [1, 1]} : vector<8x384xf32> to vector<8x128xf32>
    %68 = arith.addf %66, %67 : vector<8x128xf32>
    %cst_33 = arith.constant 5.000000e-01 : f32
    %69 = vector.broadcast %cst_33 : f32 to vector<8x128xf32>
    %70 = arith.mulf %69, %68 : vector<8x128xf32>
    %71 = math.tanh %70 : vector<8x128xf32>
    %cst_34 = arith.constant 5.000000e-01 : f32
    %72 = vector.broadcast %cst_34 : f32 to vector<8x128xf32>
    %73 = arith.mulf %72, %71 : vector<8x128xf32>
    %cst_35 = arith.constant 5.000000e-01 : f32
    %74 = vector.broadcast %cst_35 : f32 to vector<8x128xf32>
    %75 = arith.addf %73, %74 : vector<8x128xf32>
    %76 = vector.extract_strided_slice %21 {offsets = [0, 256], sizes = [8, 128], strides = [1, 1]} : vector<8x384xf32> to vector<8x128xf32>
    %77 = vector.extract_strided_slice %23 {offsets = [0, 256], sizes = [8, 128], strides = [1, 1]} : vector<8x384xf32> to vector<8x128xf32>
    %78 = vector.broadcast %7 : vector<1x128xf32> to vector<8x128xf32>
    %79 = arith.addf %77, %78 : vector<8x128xf32>
    %80 = arith.mulf %65, %79 : vector<8x128xf32>
    %81 = arith.addf %76, %80 : vector<8x128xf32>
    %82 = math.tanh %81 : vector<8x128xf32>
    %cst_36 = arith.constant 1.000000e+00 : f32
    %83 = vector.broadcast %cst_36 : f32 to vector<8x128xf32>
    %84 = arith.subf %83, %75 : vector<8x128xf32>
    %85 = arith.mulf %84, %82 : vector<8x128xf32>
    %86 = arith.mulf %75, %8 : vector<8x128xf32>
    %87 = arith.addf %85, %86 : vector<8x128xf32>
    %88 = arith.index_cast %c0_i32 : i32 to index
    %c0_37 = arith.constant 0 : index
    %c0_38 = arith.constant 0 : index
    %89 = vector.load %arg13[%88, %c0_37, %c0_38] : memref<8x8x256xf32, #tpu.memory_space<vmem>>, vector<1x8x128xf32>
    %90 = vector.shape_cast %89 : vector<1x8x128xf32> to vector<8x128xf32>
    %91 = vector.shape_cast %55 : vector<8x128xf32> to vector<1x8x128xf32>
    tpu.vector_store %arg13[%88, %c0_37, %c0_38], %91 {strides = array<i32>} : memref<8x8x256xf32, #tpu.memory_space<vmem>>, vector<1x8x128xf32>,
    %92 = arith.index_cast %9 : i32 to index
    %c0_39 = arith.constant 0 : index
    %c128 = arith.constant 128 : index
    %93 = vector.load %arg13[%92, %c0_39, %c128] : memref<8x8x256xf32, #tpu.memory_space<vmem>>, vector<1x8x128xf32>
    %94 = vector.shape_cast %93 : vector<1x8x128xf32> to vector<8x128xf32>
    %95 = vector.shape_cast %87 : vector<8x128xf32> to vector<1x8x128xf32>
    tpu.vector_store %arg13[%92, %c0_39, %c128], %95 {strides = array<i32>} : memref<8x8x256xf32, #tpu.memory_space<vmem>>, vector<1x8x128xf32>,
    %c1_i32 = arith.constant 1 : i32
    %c7_i32_40 = arith.constant 7 : i32
    %96 = arith.subi %c7_i32_40, %c1_i32 : i32
    %97 = arith.index_cast %c1_i32 : i32 to index
    %c0_41 = arith.constant 0 : index
    %c0_42 = arith.constant 0 : index
    %98 = vector.load %arg1[%97, %c0_41, %c0_42] : memref<8x8x128xf32, #tpu.memory_space<vmem>>, vector<1x8x128xf32>
    %99 = vector.shape_cast %98 : vector<1x8x128xf32> to vector<8x128xf32>
    %cst_43 = arith.constant dense<0.000000e+00> : vector<8x384xf32>
    %100 = tpu.matmul %99, %0, %cst_43 {dimension_numbers = #tpu.dot_dimension_numbers<[1], [0], [0], [1], [0, 0, 1, 1], [], []>} : vector<8x128xf32>, vector<128x384xf32>, vector<8x384xf32> -> vector<8x384xf32>
    %101 = vector.broadcast %4 : vector<1x384xf32> to vector<8x384xf32>
    %102 = arith.addf %100, %101 : vector<8x384xf32>
    %103 = arith.index_cast %96 : i32 to index
    %c0_44 = arith.constant 0 : index
    %c0_45 = arith.constant 0 : index
    %104 = vector.load %arg1[%103, %c0_44, %c0_45] : memref<8x8x128xf32, #tpu.memory_space<vmem>>, vector<1x8x128xf32>
    %105 = vector.shape_cast %104 : vector<1x8x128xf32> to vector<8x128xf32>
    %cst_46 = arith.constant dense<0.000000e+00> : vector<8x384xf32>
    %106 = tpu.matmul %105, %2, %cst_46 {dimension_numbers = #tpu.dot_dimension_numbers<[1], [0], [0], [1], [0, 0, 1, 1], [], []>} : vector<8x128xf32>, vector<128x384xf32>, vector<8x384xf32> -> vector<8x384xf32>
    %107 = vector.broadcast %5 : vector<1x384xf32> to vector<8x384xf32>
    %108 = arith.addf %106, %107 : vector<8x384xf32>
    %cst_47 = arith.constant dense<0.000000e+00> : vector<8x384xf32>
    %109 = tpu.matmul %55, %1, %cst_47 {dimension_numbers = #tpu.dot_dimension_numbers<[1], [0], [0], [1], [0, 0, 1, 1], [], []>} : vector<8x128xf32>, vector<128x384xf32>, vector<8x384xf32> -> vector<8x384xf32>
    %cst_48 = arith.constant dense<0.000000e+00> : vector<8x384xf32>
    %110 = tpu.matmul %87, %3, %cst_48 {dimension_numbers = #tpu.dot_dimension_numbers<[1], [0], [0], [1], [0, 0, 1, 1], [], []>} : vector<8x128xf32>, vector<128x384xf32>, vector<8x384xf32> -> vector<8x384xf32>
    %111 = vector.extract_strided_slice %102 {offsets = [0, 0], sizes = [8, 128], strides = [1, 1]} : vector<8x384xf32> to vector<8x128xf32>
    %112 = vector.extract_strided_slice %109 {offsets = [0, 0], sizes = [8, 128], strides = [1, 1]} : vector<8x384xf32> to vector<8x128xf32>
    %113 = arith.addf %111, %112 : vector<8x128xf32>
    %cst_49 = arith.constant 5.000000e-01 : f32
    %114 = vector.broadcast %cst_49 : f32 to vector<8x128xf32>
    %115 = arith.mulf %114, %113 : vector<8x128xf32>
    %116 = math.tanh %115 : vector<8x128xf32>
    %cst_50 = arith.constant 5.000000e-01 : f32
    %117 = vector.broadcast %cst_50 : f32 to vector<8x128xf32>
    %118 = arith.mulf %117, %116 : vector<8x128xf32>
    %cst_51 = arith.constant 5.000000e-01 : f32
    %119 = vector.broadcast %cst_51 : f32 to vector<8x128xf32>
    %120 = arith.addf %118, %119 : vector<8x128xf32>
    %121 = vector.extract_strided_slice %102 {offsets = [0, 128], sizes = [8, 128], strides = [1, 1]} : vector<8x384xf32> to vector<8x128xf32>
    %122 = vector.extract_strided_slice %109 {offsets = [0, 128], sizes = [8, 128], strides = [1, 1]} : vector<8x384xf32> to vector<8x128xf32>
    %123 = arith.addf %121, %122 : vector<8x128xf32>
    %cst_52 = arith.constant 5.000000e-01 : f32
    %124 = vector.broadcast %cst_52 : f32 to vector<8x128xf32>
    %125 = arith.mulf %124, %123 : vector<8x128xf32>
    %126 = math.tanh %125 : vector<8x128xf32>
    %cst_53 = arith.constant 5.000000e-01 : f32
    %127 = vector.broadcast %cst_53 : f32 to vector<8x128xf32>
    %128 = arith.mulf %127, %126 : vector<8x128xf32>
    %cst_54 = arith.constant 5.000000e-01 : f32
    %129 = vector.broadcast %cst_54 : f32 to vector<8x128xf32>
    %130 = arith.addf %128, %129 : vector<8x128xf32>
    %131 = vector.extract_strided_slice %102 {offsets = [0, 256], sizes = [8, 128], strides = [1, 1]} : vector<8x384xf32> to vector<8x128xf32>
    %132 = vector.extract_strided_slice %109 {offsets = [0, 256], sizes = [8, 128], strides = [1, 1]} : vector<8x384xf32> to vector<8x128xf32>
    %133 = vector.broadcast %6 : vector<1x128xf32> to vector<8x128xf32>
    %134 = arith.addf %132, %133 : vector<8x128xf32>
    %135 = arith.mulf %120, %134 : vector<8x128xf32>
    %136 = arith.addf %131, %135 : vector<8x128xf32>
    %137 = math.tanh %136 : vector<8x128xf32>
    %cst_55 = arith.constant 1.000000e+00 : f32
    %138 = vector.broadcast %cst_55 : f32 to vector<8x128xf32>
    %139 = arith.subf %138, %130 : vector<8x128xf32>
    %140 = arith.mulf %139, %137 : vector<8x128xf32>
    %141 = arith.mulf %130, %55 : vector<8x128xf32>
    %142 = arith.addf %140, %141 : vector<8x128xf32>
    %143 = vector.extract_strided_slice %108 {offsets = [0, 0], sizes = [8, 128], strides = [1, 1]} : vector<8x384xf32> to vector<8x128xf32>
    %144 = vector.extract_strided_slice %110 {offsets = [0, 0], sizes = [8, 128], strides = [1, 1]} : vector<8x384xf32> to vector<8x128xf32>
    %145 = arith.addf %143, %144 : vector<8x128xf32>
    %cst_56 = arith.constant 5.000000e-01 : f32
    %146 = vector.broadcast %cst_56 : f32 to vector<8x128xf32>
    %147 = arith.mulf %146, %145 : vector<8x128xf32>
    %148 = math.tanh %147 : vector<8x128xf32>
    %cst_57 = arith.constant 5.000000e-01 : f32
    %149 = vector.broadcast %cst_57 : f32 to vector<8x128xf32>
    %150 = arith.mulf %149, %148 : vector<8x128xf32>
    %cst_58 = arith.constant 5.000000e-01 : f32
    %151 = vector.broadcast %cst_58 : f32 to vector<8x128xf32>
    %152 = arith.addf %150, %151 : vector<8x128xf32>
    %153 = vector.extract_strided_slice %108 {offsets = [0, 128], sizes = [8, 128], strides = [1, 1]} : vector<8x384xf32> to vector<8x128xf32>
    %154 = vector.extract_strided_slice %110 {offsets = [0, 128], sizes = [8, 128], strides = [1, 1]} : vector<8x384xf32> to vector<8x128xf32>
    %155 = arith.addf %153, %154 : vector<8x128xf32>
    %cst_59 = arith.constant 5.000000e-01 : f32
    %156 = vector.broadcast %cst_59 : f32 to vector<8x128xf32>
    %157 = arith.mulf %156, %155 : vector<8x128xf32>
    %158 = math.tanh %157 : vector<8x128xf32>
    %cst_60 = arith.constant 5.000000e-01 : f32
    %159 = vector.broadcast %cst_60 : f32 to vector<8x128xf32>
    %160 = arith.mulf %159, %158 : vector<8x128xf32>
    %cst_61 = arith.constant 5.000000e-01 : f32
    %161 = vector.broadcast %cst_61 : f32 to vector<8x128xf32>
    %162 = arith.addf %160, %161 : vector<8x128xf32>
    %163 = vector.extract_strided_slice %108 {offsets = [0, 256], sizes = [8, 128], strides = [1, 1]} : vector<8x384xf32> to vector<8x128xf32>
    %164 = vector.extract_strided_slice %110 {offsets = [0, 256], sizes = [8, 128], strides = [1, 1]} : vector<8x384xf32> to vector<8x128xf32>
    %165 = vector.broadcast %7 : vector<1x128xf32> to vector<8x128xf32>
    %166 = arith.addf %164, %165 : vector<8x128xf32>
    %167 = arith.mulf %152, %166 : vector<8x128xf32>
    %168 = arith.addf %163, %167 : vector<8x128xf32>
    %169 = math.tanh %168 : vector<8x128xf32>
    %cst_62 = arith.constant 1.000000e+00 : f32
    %170 = vector.broadcast %cst_62 : f32 to vector<8x128xf32>
    %171 = arith.subf %170, %162 : vector<8x128xf32>
    %172 = arith.mulf %171, %169 : vector<8x128xf32>
    %173 = arith.mulf %162, %87 : vector<8x128xf32>
    %174 = arith.addf %172, %173 : vector<8x128xf32>
    %175 = arith.index_cast %c1_i32 : i32 to index
    %c0_63 = arith.constant 0 : index
    %c0_64 = arith.constant 0 : index
    %176 = vector.load %arg13[%175, %c0_63, %c0_64] : memref<8x8x256xf32, #tpu.memory_space<vmem>>, vector<1x8x128xf32>
    %177 = vector.shape_cast %176 : vector<1x8x128xf32> to vector<8x128xf32>
    %178 = vector.shape_cast %142 : vector<8x128xf32> to vector<1x8x128xf32>
    tpu.vector_store %arg13[%175, %c0_63, %c0_64], %178 {strides = array<i32>} : memref<8x8x256xf32, #tpu.memory_space<vmem>>, vector<1x8x128xf32>,
    %179 = arith.index_cast %96 : i32 to index
    %c0_65 = arith.constant 0 : index
    %c128_66 = arith.constant 128 : index
    %180 = vector.load %arg13[%179, %c0_65, %c128_66] : memref<8x8x256xf32, #tpu.memory_space<vmem>>, vector<1x8x128xf32>
    %181 = vector.shape_cast %180 : vector<1x8x128xf32> to vector<8x128xf32>
    %182 = vector.shape_cast %174 : vector<8x128xf32> to vector<1x8x128xf32>
    tpu.vector_store %arg13[%179, %c0_65, %c128_66], %182 {strides = array<i32>} : memref<8x8x256xf32, #tpu.memory_space<vmem>>, vector<1x8x128xf32>,
    %c2_i32 = arith.constant 2 : i32
    %c7_i32_67 = arith.constant 7 : i32
    %183 = arith.subi %c7_i32_67, %c2_i32 : i32
    %184 = arith.index_cast %c2_i32 : i32 to index
    %c0_68 = arith.constant 0 : index
    %c0_69 = arith.constant 0 : index
    %185 = vector.load %arg1[%184, %c0_68, %c0_69] : memref<8x8x128xf32, #tpu.memory_space<vmem>>, vector<1x8x128xf32>
    %186 = vector.shape_cast %185 : vector<1x8x128xf32> to vector<8x128xf32>
    %cst_70 = arith.constant dense<0.000000e+00> : vector<8x384xf32>
    %187 = tpu.matmul %186, %0, %cst_70 {dimension_numbers = #tpu.dot_dimension_numbers<[1], [0], [0], [1], [0, 0, 1, 1], [], []>} : vector<8x128xf32>, vector<128x384xf32>, vector<8x384xf32> -> vector<8x384xf32>
    %188 = vector.broadcast %4 : vector<1x384xf32> to vector<8x384xf32>
    %189 = arith.addf %187, %188 : vector<8x384xf32>
    %190 = arith.index_cast %183 : i32 to index
    %c0_71 = arith.constant 0 : index
    %c0_72 = arith.constant 0 : index
    %191 = vector.load %arg1[%190, %c0_71, %c0_72] : memref<8x8x128xf32, #tpu.memory_space<vmem>>, vector<1x8x128xf32>
    %192 = vector.shape_cast %191 : vector<1x8x128xf32> to vector<8x128xf32>
    %cst_73 = arith.constant dense<0.000000e+00> : vector<8x384xf32>
    %193 = tpu.matmul %192, %2, %cst_73 {dimension_numbers = #tpu.dot_dimension_numbers<[1], [0], [0], [1], [0, 0, 1, 1], [], []>} : vector<8x128xf32>, vector<128x384xf32>, vector<8x384xf32> -> vector<8x384xf32>
    %194 = vector.broadcast %5 : vector<1x384xf32> to vector<8x384xf32>
    %195 = arith.addf %193, %194 : vector<8x384xf32>
    %cst_74 = arith.constant dense<0.000000e+00> : vector<8x384xf32>
    %196 = tpu.matmul %142, %1, %cst_74 {dimension_numbers = #tpu.dot_dimension_numbers<[1], [0], [0], [1], [0, 0, 1, 1], [], []>} : vector<8x128xf32>, vector<128x384xf32>, vector<8x384xf32> -> vector<8x384xf32>
    %cst_75 = arith.constant dense<0.000000e+00> : vector<8x384xf32>
    %197 = tpu.matmul %174, %3, %cst_75 {dimension_numbers = #tpu.dot_dimension_numbers<[1], [0], [0], [1], [0, 0, 1, 1], [], []>} : vector<8x128xf32>, vector<128x384xf32>, vector<8x384xf32> -> vector<8x384xf32>
    %198 = vector.extract_strided_slice %189 {offsets = [0, 0], sizes = [8, 128], strides = [1, 1]} : vector<8x384xf32> to vector<8x128xf32>
    %199 = vector.extract_strided_slice %196 {offsets = [0, 0], sizes = [8, 128], strides = [1, 1]} : vector<8x384xf32> to vector<8x128xf32>
    %200 = arith.addf %198, %199 : vector<8x128xf32>
    %cst_76 = arith.constant 5.000000e-01 : f32
    %201 = vector.broadcast %cst_76 : f32 to vector<8x128xf32>
    %202 = arith.mulf %201, %200 : vector<8x128xf32>
    %203 = math.tanh %202 : vector<8x128xf32>
    %cst_77 = arith.constant 5.000000e-01 : f32
    %204 = vector.broadcast %cst_77 : f32 to vector<8x128xf32>
    %205 = arith.mulf %204, %203 : vector<8x128xf32>
    %cst_78 = arith.constant 5.000000e-01 : f32
    %206 = vector.broadcast %cst_78 : f32 to vector<8x128xf32>
    %207 = arith.addf %205, %206 : vector<8x128xf32>
    %208 = vector.extract_strided_slice %189 {offsets = [0, 128], sizes = [8, 128], strides = [1, 1]} : vector<8x384xf32> to vector<8x128xf32>
    %209 = vector.extract_strided_slice %196 {offsets = [0, 128], sizes = [8, 128], strides = [1, 1]} : vector<8x384xf32> to vector<8x128xf32>
    %210 = arith.addf %208, %209 : vector<8x128xf32>
    %cst_79 = arith.constant 5.000000e-01 : f32
    %211 = vector.broadcast %cst_79 : f32 to vector<8x128xf32>
    %212 = arith.mulf %211, %210 : vector<8x128xf32>
    %213 = math.tanh %212 : vector<8x128xf32>
    %cst_80 = arith.constant 5.000000e-01 : f32
    %214 = vector.broadcast %cst_80 : f32 to vector<8x128xf32>
    %215 = arith.mulf %214, %213 : vector<8x128xf32>
    %cst_81 = arith.constant 5.000000e-01 : f32
    %216 = vector.broadcast %cst_81 : f32 to vector<8x128xf32>
    %217 = arith.addf %215, %216 : vector<8x128xf32>
    %218 = vector.extract_strided_slice %189 {offsets = [0, 256], sizes = [8, 128], strides = [1, 1]} : vector<8x384xf32> to vector<8x128xf32>
    %219 = vector.extract_strided_slice %196 {offsets = [0, 256], sizes = [8, 128], strides = [1, 1]} : vector<8x384xf32> to vector<8x128xf32>
    %220 = vector.broadcast %6 : vector<1x128xf32> to vector<8x128xf32>
    %221 = arith.addf %219, %220 : vector<8x128xf32>
    %222 = arith.mulf %207, %221 : vector<8x128xf32>
    %223 = arith.addf %218, %222 : vector<8x128xf32>
    %224 = math.tanh %223 : vector<8x128xf32>
    %cst_82 = arith.constant 1.000000e+00 : f32
    %225 = vector.broadcast %cst_82 : f32 to vector<8x128xf32>
    %226 = arith.subf %225, %217 : vector<8x128xf32>
    %227 = arith.mulf %226, %224 : vector<8x128xf32>
    %228 = arith.mulf %217, %142 : vector<8x128xf32>
    %229 = arith.addf %227, %228 : vector<8x128xf32>
    %230 = vector.extract_strided_slice %195 {offsets = [0, 0], sizes = [8, 128], strides = [1, 1]} : vector<8x384xf32> to vector<8x128xf32>
    %231 = vector.extract_strided_slice %197 {offsets = [0, 0], sizes = [8, 128], strides = [1, 1]} : vector<8x384xf32> to vector<8x128xf32>
    %232 = arith.addf %230, %231 : vector<8x128xf32>
    %cst_83 = arith.constant 5.000000e-01 : f32
    %233 = vector.broadcast %cst_83 : f32 to vector<8x128xf32>
    %234 = arith.mulf %233, %232 : vector<8x128xf32>
    %235 = math.tanh %234 : vector<8x128xf32>
    %cst_84 = arith.constant 5.000000e-01 : f32
    %236 = vector.broadcast %cst_84 : f32 to vector<8x128xf32>
    %237 = arith.mulf %236, %235 : vector<8x128xf32>
    %cst_85 = arith.constant 5.000000e-01 : f32
    %238 = vector.broadcast %cst_85 : f32 to vector<8x128xf32>
    %239 = arith.addf %237, %238 : vector<8x128xf32>
    %240 = vector.extract_strided_slice %195 {offsets = [0, 128], sizes = [8, 128], strides = [1, 1]} : vector<8x384xf32> to vector<8x128xf32>
    %241 = vector.extract_strided_slice %197 {offsets = [0, 128], sizes = [8, 128], strides = [1, 1]} : vector<8x384xf32> to vector<8x128xf32>
    %242 = arith.addf %240, %241 : vector<8x128xf32>
    %cst_86 = arith.constant 5.000000e-01 : f32
    %243 = vector.broadcast %cst_86 : f32 to vector<8x128xf32>
    %244 = arith.mulf %243, %242 : vector<8x128xf32>
    %245 = math.tanh %244 : vector<8x128xf32>
    %cst_87 = arith.constant 5.000000e-01 : f32
    %246 = vector.broadcast %cst_87 : f32 to vector<8x128xf32>
    %247 = arith.mulf %246, %245 : vector<8x128xf32>
    %cst_88 = arith.constant 5.000000e-01 : f32
    %248 = vector.broadcast %cst_88 : f32 to vector<8x128xf32>
    %249 = arith.addf %247, %248 : vector<8x128xf32>
    %250 = vector.extract_strided_slice %195 {offsets = [0, 256], sizes = [8, 128], strides = [1, 1]} : vector<8x384xf32> to vector<8x128xf32>
    %251 = vector.extract_strided_slice %197 {offsets = [0, 256], sizes = [8, 128], strides = [1, 1]} : vector<8x384xf32> to vector<8x128xf32>
    %252 = vector.broadcast %7 : vector<1x128xf32> to vector<8x128xf32>
    %253 = arith.addf %251, %252 : vector<8x128xf32>
    %254 = arith.mulf %239, %253 : vector<8x128xf32>
    %255 = arith.addf %250, %254 : vector<8x128xf32>
    %256 = math.tanh %255 : vector<8x128xf32>
    %cst_89 = arith.constant 1.000000e+00 : f32
    %257 = vector.broadcast %cst_89 : f32 to vector<8x128xf32>
    %258 = arith.subf %257, %249 : vector<8x128xf32>
    %259 = arith.mulf %258, %256 : vector<8x128xf32>
    %260 = arith.mulf %249, %174 : vector<8x128xf32>
    %261 = arith.addf %259, %260 : vector<8x128xf32>
    %262 = arith.index_cast %c2_i32 : i32 to index
    %c0_90 = arith.constant 0 : index
    %c0_91 = arith.constant 0 : index
    %263 = vector.load %arg13[%262, %c0_90, %c0_91] : memref<8x8x256xf32, #tpu.memory_space<vmem>>, vector<1x8x128xf32>
    %264 = vector.shape_cast %263 : vector<1x8x128xf32> to vector<8x128xf32>
    %265 = vector.shape_cast %229 : vector<8x128xf32> to vector<1x8x128xf32>
    tpu.vector_store %arg13[%262, %c0_90, %c0_91], %265 {strides = array<i32>} : memref<8x8x256xf32, #tpu.memory_space<vmem>>, vector<1x8x128xf32>,
    %266 = arith.index_cast %183 : i32 to index
    %c0_92 = arith.constant 0 : index
    %c128_93 = arith.constant 128 : index
    %267 = vector.load %arg13[%266, %c0_92, %c128_93] : memref<8x8x256xf32, #tpu.memory_space<vmem>>, vector<1x8x128xf32>
    %268 = vector.shape_cast %267 : vector<1x8x128xf32> to vector<8x128xf32>
    %269 = vector.shape_cast %261 : vector<8x128xf32> to vector<1x8x128xf32>
    tpu.vector_store %arg13[%266, %c0_92, %c128_93], %269 {strides = array<i32>} : memref<8x8x256xf32, #tpu.memory_space<vmem>>, vector<1x8x128xf32>,
    %c3_i32 = arith.constant 3 : i32
    %c7_i32_94 = arith.constant 7 : i32
    %270 = arith.subi %c7_i32_94, %c3_i32 : i32
    %271 = arith.index_cast %c3_i32 : i32 to index
    %c0_95 = arith.constant 0 : index
    %c0_96 = arith.constant 0 : index
    %272 = vector.load %arg1[%271, %c0_95, %c0_96] : memref<8x8x128xf32, #tpu.memory_space<vmem>>, vector<1x8x128xf32>
    %273 = vector.shape_cast %272 : vector<1x8x128xf32> to vector<8x128xf32>
    %cst_97 = arith.constant dense<0.000000e+00> : vector<8x384xf32>
    %274 = tpu.matmul %273, %0, %cst_97 {dimension_numbers = #tpu.dot_dimension_numbers<[1], [0], [0], [1], [0, 0, 1, 1], [], []>} : vector<8x128xf32>, vector<128x384xf32>, vector<8x384xf32> -> vector<8x384xf32>
    %275 = vector.broadcast %4 : vector<1x384xf32> to vector<8x384xf32>
    %276 = arith.addf %274, %275 : vector<8x384xf32>
    %277 = arith.index_cast %270 : i32 to index
    %c0_98 = arith.constant 0 : index
    %c0_99 = arith.constant 0 : index
    %278 = vector.load %arg1[%277, %c0_98, %c0_99] : memref<8x8x128xf32, #tpu.memory_space<vmem>>, vector<1x8x128xf32>
    %279 = vector.shape_cast %278 : vector<1x8x128xf32> to vector<8x128xf32>
    %cst_100 = arith.constant dense<0.000000e+00> : vector<8x384xf32>
    %280 = tpu.matmul %279, %2, %cst_100 {dimension_numbers = #tpu.dot_dimension_numbers<[1], [0], [0], [1], [0, 0, 1, 1], [], []>} : vector<8x128xf32>, vector<128x384xf32>, vector<8x384xf32> -> vector<8x384xf32>
    %281 = vector.broadcast %5 : vector<1x384xf32> to vector<8x384xf32>
    %282 = arith.addf %280, %281 : vector<8x384xf32>
    %cst_101 = arith.constant dense<0.000000e+00> : vector<8x384xf32>
    %283 = tpu.matmul %229, %1, %cst_101 {dimension_numbers = #tpu.dot_dimension_numbers<[1], [0], [0], [1], [0, 0, 1, 1], [], []>} : vector<8x128xf32>, vector<128x384xf32>, vector<8x384xf32> -> vector<8x384xf32>
    %cst_102 = arith.constant dense<0.000000e+00> : vector<8x384xf32>
    %284 = tpu.matmul %261, %3, %cst_102 {dimension_numbers = #tpu.dot_dimension_numbers<[1], [0], [0], [1], [0, 0, 1, 1], [], []>} : vector<8x128xf32>, vector<128x384xf32>, vector<8x384xf32> -> vector<8x384xf32>
    %285 = vector.extract_strided_slice %276 {offsets = [0, 0], sizes = [8, 128], strides = [1, 1]} : vector<8x384xf32> to vector<8x128xf32>
    %286 = vector.extract_strided_slice %283 {offsets = [0, 0], sizes = [8, 128], strides = [1, 1]} : vector<8x384xf32> to vector<8x128xf32>
    %287 = arith.addf %285, %286 : vector<8x128xf32>
    %cst_103 = arith.constant 5.000000e-01 : f32
    %288 = vector.broadcast %cst_103 : f32 to vector<8x128xf32>
    %289 = arith.mulf %288, %287 : vector<8x128xf32>
    %290 = math.tanh %289 : vector<8x128xf32>
    %cst_104 = arith.constant 5.000000e-01 : f32
    %291 = vector.broadcast %cst_104 : f32 to vector<8x128xf32>
    %292 = arith.mulf %291, %290 : vector<8x128xf32>
    %cst_105 = arith.constant 5.000000e-01 : f32
    %293 = vector.broadcast %cst_105 : f32 to vector<8x128xf32>
    %294 = arith.addf %292, %293 : vector<8x128xf32>
    %295 = vector.extract_strided_slice %276 {offsets = [0, 128], sizes = [8, 128], strides = [1, 1]} : vector<8x384xf32> to vector<8x128xf32>
    %296 = vector.extract_strided_slice %283 {offsets = [0, 128], sizes = [8, 128], strides = [1, 1]} : vector<8x384xf32> to vector<8x128xf32>
    %297 = arith.addf %295, %296 : vector<8x128xf32>
    %cst_106 = arith.constant 5.000000e-01 : f32
    %298 = vector.broadcast %cst_106 : f32 to vector<8x128xf32>
    %299 = arith.mulf %298, %297 : vector<8x128xf32>
    %300 = math.tanh %299 : vector<8x128xf32>
    %cst_107 = arith.constant 5.000000e-01 : f32
    %301 = vector.broadcast %cst_107 : f32 to vector<8x128xf32>
    %302 = arith.mulf %301, %300 : vector<8x128xf32>
    %cst_108 = arith.constant 5.000000e-01 : f32
    %303 = vector.broadcast %cst_108 : f32 to vector<8x128xf32>
    %304 = arith.addf %302, %303 : vector<8x128xf32>
    %305 = vector.extract_strided_slice %276 {offsets = [0, 256], sizes = [8, 128], strides = [1, 1]} : vector<8x384xf32> to vector<8x128xf32>
    %306 = vector.extract_strided_slice %283 {offsets = [0, 256], sizes = [8, 128], strides = [1, 1]} : vector<8x384xf32> to vector<8x128xf32>
    %307 = vector.broadcast %6 : vector<1x128xf32> to vector<8x128xf32>
    %308 = arith.addf %306, %307 : vector<8x128xf32>
    %309 = arith.mulf %294, %308 : vector<8x128xf32>
    %310 = arith.addf %305, %309 : vector<8x128xf32>
    %311 = math.tanh %310 : vector<8x128xf32>
    %cst_109 = arith.constant 1.000000e+00 : f32
    %312 = vector.broadcast %cst_109 : f32 to vector<8x128xf32>
    %313 = arith.subf %312, %304 : vector<8x128xf32>
    %314 = arith.mulf %313, %311 : vector<8x128xf32>
    %315 = arith.mulf %304, %229 : vector<8x128xf32>
    %316 = arith.addf %314, %315 : vector<8x128xf32>
    %317 = vector.extract_strided_slice %282 {offsets = [0, 0], sizes = [8, 128], strides = [1, 1]} : vector<8x384xf32> to vector<8x128xf32>
    %318 = vector.extract_strided_slice %284 {offsets = [0, 0], sizes = [8, 128], strides = [1, 1]} : vector<8x384xf32> to vector<8x128xf32>
    %319 = arith.addf %317, %318 : vector<8x128xf32>
    %cst_110 = arith.constant 5.000000e-01 : f32
    %320 = vector.broadcast %cst_110 : f32 to vector<8x128xf32>
    %321 = arith.mulf %320, %319 : vector<8x128xf32>
    %322 = math.tanh %321 : vector<8x128xf32>
    %cst_111 = arith.constant 5.000000e-01 : f32
    %323 = vector.broadcast %cst_111 : f32 to vector<8x128xf32>
    %324 = arith.mulf %323, %322 : vector<8x128xf32>
    %cst_112 = arith.constant 5.000000e-01 : f32
    %325 = vector.broadcast %cst_112 : f32 to vector<8x128xf32>
    %326 = arith.addf %324, %325 : vector<8x128xf32>
    %327 = vector.extract_strided_slice %282 {offsets = [0, 128], sizes = [8, 128], strides = [1, 1]} : vector<8x384xf32> to vector<8x128xf32>
    %328 = vector.extract_strided_slice %284 {offsets = [0, 128], sizes = [8, 128], strides = [1, 1]} : vector<8x384xf32> to vector<8x128xf32>
    %329 = arith.addf %327, %328 : vector<8x128xf32>
    %cst_113 = arith.constant 5.000000e-01 : f32
    %330 = vector.broadcast %cst_113 : f32 to vector<8x128xf32>
    %331 = arith.mulf %330, %329 : vector<8x128xf32>
    %332 = math.tanh %331 : vector<8x128xf32>
    %cst_114 = arith.constant 5.000000e-01 : f32
    %333 = vector.broadcast %cst_114 : f32 to vector<8x128xf32>
    %334 = arith.mulf %333, %332 : vector<8x128xf32>
    %cst_115 = arith.constant 5.000000e-01 : f32
    %335 = vector.broadcast %cst_115 : f32 to vector<8x128xf32>
    %336 = arith.addf %334, %335 : vector<8x128xf32>
    %337 = vector.extract_strided_slice %282 {offsets = [0, 256], sizes = [8, 128], strides = [1, 1]} : vector<8x384xf32> to vector<8x128xf32>
    %338 = vector.extract_strided_slice %284 {offsets = [0, 256], sizes = [8, 128], strides = [1, 1]} : vector<8x384xf32> to vector<8x128xf32>
    %339 = vector.broadcast %7 : vector<1x128xf32> to vector<8x128xf32>
    %340 = arith.addf %338, %339 : vector<8x128xf32>
    %341 = arith.mulf %326, %340 : vector<8x128xf32>
    %342 = arith.addf %337, %341 : vector<8x128xf32>
    %343 = math.tanh %342 : vector<8x128xf32>
    %cst_116 = arith.constant 1.000000e+00 : f32
    %344 = vector.broadcast %cst_116 : f32 to vector<8x128xf32>
    %345 = arith.subf %344, %336 : vector<8x128xf32>
    %346 = arith.mulf %345, %343 : vector<8x128xf32>
    %347 = arith.mulf %336, %261 : vector<8x128xf32>
    %348 = arith.addf %346, %347 : vector<8x128xf32>
    %349 = arith.index_cast %c3_i32 : i32 to index
    %c0_117 = arith.constant 0 : index
    %c0_118 = arith.constant 0 : index
    %350 = vector.load %arg13[%349, %c0_117, %c0_118] : memref<8x8x256xf32, #tpu.memory_space<vmem>>, vector<1x8x128xf32>
    %351 = vector.shape_cast %350 : vector<1x8x128xf32> to vector<8x128xf32>
    %352 = vector.shape_cast %316 : vector<8x128xf32> to vector<1x8x128xf32>
    tpu.vector_store %arg13[%349, %c0_117, %c0_118], %352 {strides = array<i32>} : memref<8x8x256xf32, #tpu.memory_space<vmem>>, vector<1x8x128xf32>,
    %353 = arith.index_cast %270 : i32 to index
    %c0_119 = arith.constant 0 : index
    %c128_120 = arith.constant 128 : index
    %354 = vector.load %arg13[%353, %c0_119, %c128_120] : memref<8x8x256xf32, #tpu.memory_space<vmem>>, vector<1x8x128xf32>
    %355 = vector.shape_cast %354 : vector<1x8x128xf32> to vector<8x128xf32>
    %356 = vector.shape_cast %348 : vector<8x128xf32> to vector<1x8x128xf32>
    tpu.vector_store %arg13[%353, %c0_119, %c128_120], %356 {strides = array<i32>} : memref<8x8x256xf32, #tpu.memory_space<vmem>>, vector<1x8x128xf32>,
    %c4_i32 = arith.constant 4 : i32
    %c7_i32_121 = arith.constant 7 : i32
    %357 = arith.subi %c7_i32_121, %c4_i32 : i32
    %358 = arith.index_cast %c4_i32 : i32 to index
    %c0_122 = arith.constant 0 : index
    %c0_123 = arith.constant 0 : index
    %359 = vector.load %arg1[%358, %c0_122, %c0_123] : memref<8x8x128xf32, #tpu.memory_space<vmem>>, vector<1x8x128xf32>
    %360 = vector.shape_cast %359 : vector<1x8x128xf32> to vector<8x128xf32>
    %cst_124 = arith.constant dense<0.000000e+00> : vector<8x384xf32>
    %361 = tpu.matmul %360, %0, %cst_124 {dimension_numbers = #tpu.dot_dimension_numbers<[1], [0], [0], [1], [0, 0, 1, 1], [], []>} : vector<8x128xf32>, vector<128x384xf32>, vector<8x384xf32> -> vector<8x384xf32>
    %362 = vector.broadcast %4 : vector<1x384xf32> to vector<8x384xf32>
    %363 = arith.addf %361, %362 : vector<8x384xf32>
    %364 = arith.index_cast %357 : i32 to index
    %c0_125 = arith.constant 0 : index
    %c0_126 = arith.constant 0 : index
    %365 = vector.load %arg1[%364, %c0_125, %c0_126] : memref<8x8x128xf32, #tpu.memory_space<vmem>>, vector<1x8x128xf32>
    %366 = vector.shape_cast %365 : vector<1x8x128xf32> to vector<8x128xf32>
    %cst_127 = arith.constant dense<0.000000e+00> : vector<8x384xf32>
    %367 = tpu.matmul %366, %2, %cst_127 {dimension_numbers = #tpu.dot_dimension_numbers<[1], [0], [0], [1], [0, 0, 1, 1], [], []>} : vector<8x128xf32>, vector<128x384xf32>, vector<8x384xf32> -> vector<8x384xf32>
    %368 = vector.broadcast %5 : vector<1x384xf32> to vector<8x384xf32>
    %369 = arith.addf %367, %368 : vector<8x384xf32>
    %cst_128 = arith.constant dense<0.000000e+00> : vector<8x384xf32>
    %370 = tpu.matmul %316, %1, %cst_128 {dimension_numbers = #tpu.dot_dimension_numbers<[1], [0], [0], [1], [0, 0, 1, 1], [], []>} : vector<8x128xf32>, vector<128x384xf32>, vector<8x384xf32> -> vector<8x384xf32>
    %cst_129 = arith.constant dense<0.000000e+00> : vector<8x384xf32>
    %371 = tpu.matmul %348, %3, %cst_129 {dimension_numbers = #tpu.dot_dimension_numbers<[1], [0], [0], [1], [0, 0, 1, 1], [], []>} : vector<8x128xf32>, vector<128x384xf32>, vector<8x384xf32> -> vector<8x384xf32>
    %372 = vector.extract_strided_slice %363 {offsets = [0, 0], sizes = [8, 128], strides = [1, 1]} : vector<8x384xf32> to vector<8x128xf32>
    %373 = vector.extract_strided_slice %370 {offsets = [0, 0], sizes = [8, 128], strides = [1, 1]} : vector<8x384xf32> to vector<8x128xf32>
    %374 = arith.addf %372, %373 : vector<8x128xf32>
    %cst_130 = arith.constant 5.000000e-01 : f32
    %375 = vector.broadcast %cst_130 : f32 to vector<8x128xf32>
    %376 = arith.mulf %375, %374 : vector<8x128xf32>
    %377 = math.tanh %376 : vector<8x128xf32>
    %cst_131 = arith.constant 5.000000e-01 : f32
    %378 = vector.broadcast %cst_131 : f32 to vector<8x128xf32>
    %379 = arith.mulf %378, %377 : vector<8x128xf32>
    %cst_132 = arith.constant 5.000000e-01 : f32
    %380 = vector.broadcast %cst_132 : f32 to vector<8x128xf32>
    %381 = arith.addf %379, %380 : vector<8x128xf32>
    %382 = vector.extract_strided_slice %363 {offsets = [0, 128], sizes = [8, 128], strides = [1, 1]} : vector<8x384xf32> to vector<8x128xf32>
    %383 = vector.extract_strided_slice %370 {offsets = [0, 128], sizes = [8, 128], strides = [1, 1]} : vector<8x384xf32> to vector<8x128xf32>
    %384 = arith.addf %382, %383 : vector<8x128xf32>
    %cst_133 = arith.constant 5.000000e-01 : f32
    %385 = vector.broadcast %cst_133 : f32 to vector<8x128xf32>
    %386 = arith.mulf %385, %384 : vector<8x128xf32>
    %387 = math.tanh %386 : vector<8x128xf32>
    %cst_134 = arith.constant 5.000000e-01 : f32
    %388 = vector.broadcast %cst_134 : f32 to vector<8x128xf32>
    %389 = arith.mulf %388, %387 : vector<8x128xf32>
    %cst_135 = arith.constant 5.000000e-01 : f32
    %390 = vector.broadcast %cst_135 : f32 to vector<8x128xf32>
    %391 = arith.addf %389, %390 : vector<8x128xf32>
    %392 = vector.extract_strided_slice %363 {offsets = [0, 256], sizes = [8, 128], strides = [1, 1]} : vector<8x384xf32> to vector<8x128xf32>
    %393 = vector.extract_strided_slice %370 {offsets = [0, 256], sizes = [8, 128], strides = [1, 1]} : vector<8x384xf32> to vector<8x128xf32>
    %394 = vector.broadcast %6 : vector<1x128xf32> to vector<8x128xf32>
    %395 = arith.addf %393, %394 : vector<8x128xf32>
    %396 = arith.mulf %381, %395 : vector<8x128xf32>
    %397 = arith.addf %392, %396 : vector<8x128xf32>
    %398 = math.tanh %397 : vector<8x128xf32>
    %cst_136 = arith.constant 1.000000e+00 : f32
    %399 = vector.broadcast %cst_136 : f32 to vector<8x128xf32>
    %400 = arith.subf %399, %391 : vector<8x128xf32>
    %401 = arith.mulf %400, %398 : vector<8x128xf32>
    %402 = arith.mulf %391, %316 : vector<8x128xf32>
    %403 = arith.addf %401, %402 : vector<8x128xf32>
    %404 = vector.extract_strided_slice %369 {offsets = [0, 0], sizes = [8, 128], strides = [1, 1]} : vector<8x384xf32> to vector<8x128xf32>
    %405 = vector.extract_strided_slice %371 {offsets = [0, 0], sizes = [8, 128], strides = [1, 1]} : vector<8x384xf32> to vector<8x128xf32>
    %406 = arith.addf %404, %405 : vector<8x128xf32>
    %cst_137 = arith.constant 5.000000e-01 : f32
    %407 = vector.broadcast %cst_137 : f32 to vector<8x128xf32>
    %408 = arith.mulf %407, %406 : vector<8x128xf32>
    %409 = math.tanh %408 : vector<8x128xf32>
    %cst_138 = arith.constant 5.000000e-01 : f32
    %410 = vector.broadcast %cst_138 : f32 to vector<8x128xf32>
    %411 = arith.mulf %410, %409 : vector<8x128xf32>
    %cst_139 = arith.constant 5.000000e-01 : f32
    %412 = vector.broadcast %cst_139 : f32 to vector<8x128xf32>
    %413 = arith.addf %411, %412 : vector<8x128xf32>
    %414 = vector.extract_strided_slice %369 {offsets = [0, 128], sizes = [8, 128], strides = [1, 1]} : vector<8x384xf32> to vector<8x128xf32>
    %415 = vector.extract_strided_slice %371 {offsets = [0, 128], sizes = [8, 128], strides = [1, 1]} : vector<8x384xf32> to vector<8x128xf32>
    %416 = arith.addf %414, %415 : vector<8x128xf32>
    %cst_140 = arith.constant 5.000000e-01 : f32
    %417 = vector.broadcast %cst_140 : f32 to vector<8x128xf32>
    %418 = arith.mulf %417, %416 : vector<8x128xf32>
    %419 = math.tanh %418 : vector<8x128xf32>
    %cst_141 = arith.constant 5.000000e-01 : f32
    %420 = vector.broadcast %cst_141 : f32 to vector<8x128xf32>
    %421 = arith.mulf %420, %419 : vector<8x128xf32>
    %cst_142 = arith.constant 5.000000e-01 : f32
    %422 = vector.broadcast %cst_142 : f32 to vector<8x128xf32>
    %423 = arith.addf %421, %422 : vector<8x128xf32>
    %424 = vector.extract_strided_slice %369 {offsets = [0, 256], sizes = [8, 128], strides = [1, 1]} : vector<8x384xf32> to vector<8x128xf32>
    %425 = vector.extract_strided_slice %371 {offsets = [0, 256], sizes = [8, 128], strides = [1, 1]} : vector<8x384xf32> to vector<8x128xf32>
    %426 = vector.broadcast %7 : vector<1x128xf32> to vector<8x128xf32>
    %427 = arith.addf %425, %426 : vector<8x128xf32>
    %428 = arith.mulf %413, %427 : vector<8x128xf32>
    %429 = arith.addf %424, %428 : vector<8x128xf32>
    %430 = math.tanh %429 : vector<8x128xf32>
    %cst_143 = arith.constant 1.000000e+00 : f32
    %431 = vector.broadcast %cst_143 : f32 to vector<8x128xf32>
    %432 = arith.subf %431, %423 : vector<8x128xf32>
    %433 = arith.mulf %432, %430 : vector<8x128xf32>
    %434 = arith.mulf %423, %348 : vector<8x128xf32>
    %435 = arith.addf %433, %434 : vector<8x128xf32>
    %436 = arith.index_cast %c4_i32 : i32 to index
    %c0_144 = arith.constant 0 : index
    %c0_145 = arith.constant 0 : index
    %437 = vector.load %arg13[%436, %c0_144, %c0_145] : memref<8x8x256xf32, #tpu.memory_space<vmem>>, vector<1x8x128xf32>
    %438 = vector.shape_cast %437 : vector<1x8x128xf32> to vector<8x128xf32>
    %439 = vector.shape_cast %403 : vector<8x128xf32> to vector<1x8x128xf32>
    tpu.vector_store %arg13[%436, %c0_144, %c0_145], %439 {strides = array<i32>} : memref<8x8x256xf32, #tpu.memory_space<vmem>>, vector<1x8x128xf32>,
    %440 = arith.index_cast %357 : i32 to index
    %c0_146 = arith.constant 0 : index
    %c128_147 = arith.constant 128 : index
    %441 = vector.load %arg13[%440, %c0_146, %c128_147] : memref<8x8x256xf32, #tpu.memory_space<vmem>>, vector<1x8x128xf32>
    %442 = vector.shape_cast %441 : vector<1x8x128xf32> to vector<8x128xf32>
    %443 = vector.shape_cast %435 : vector<8x128xf32> to vector<1x8x128xf32>
    tpu.vector_store %arg13[%440, %c0_146, %c128_147], %443 {strides = array<i32>} : memref<8x8x256xf32, #tpu.memory_space<vmem>>, vector<1x8x128xf32>,
    %c5_i32 = arith.constant 5 : i32
    %c7_i32_148 = arith.constant 7 : i32
    %444 = arith.subi %c7_i32_148, %c5_i32 : i32
    %445 = arith.index_cast %c5_i32 : i32 to index
    %c0_149 = arith.constant 0 : index
    %c0_150 = arith.constant 0 : index
    %446 = vector.load %arg1[%445, %c0_149, %c0_150] : memref<8x8x128xf32, #tpu.memory_space<vmem>>, vector<1x8x128xf32>
    %447 = vector.shape_cast %446 : vector<1x8x128xf32> to vector<8x128xf32>
    %cst_151 = arith.constant dense<0.000000e+00> : vector<8x384xf32>
    %448 = tpu.matmul %447, %0, %cst_151 {dimension_numbers = #tpu.dot_dimension_numbers<[1], [0], [0], [1], [0, 0, 1, 1], [], []>} : vector<8x128xf32>, vector<128x384xf32>, vector<8x384xf32> -> vector<8x384xf32>
    %449 = vector.broadcast %4 : vector<1x384xf32> to vector<8x384xf32>
    %450 = arith.addf %448, %449 : vector<8x384xf32>
    %451 = arith.index_cast %444 : i32 to index
    %c0_152 = arith.constant 0 : index
    %c0_153 = arith.constant 0 : index
    %452 = vector.load %arg1[%451, %c0_152, %c0_153] : memref<8x8x128xf32, #tpu.memory_space<vmem>>, vector<1x8x128xf32>
    %453 = vector.shape_cast %452 : vector<1x8x128xf32> to vector<8x128xf32>
    %cst_154 = arith.constant dense<0.000000e+00> : vector<8x384xf32>
    %454 = tpu.matmul %453, %2, %cst_154 {dimension_numbers = #tpu.dot_dimension_numbers<[1], [0], [0], [1], [0, 0, 1, 1], [], []>} : vector<8x128xf32>, vector<128x384xf32>, vector<8x384xf32> -> vector<8x384xf32>
    %455 = vector.broadcast %5 : vector<1x384xf32> to vector<8x384xf32>
    %456 = arith.addf %454, %455 : vector<8x384xf32>
    %cst_155 = arith.constant dense<0.000000e+00> : vector<8x384xf32>
    %457 = tpu.matmul %403, %1, %cst_155 {dimension_numbers = #tpu.dot_dimension_numbers<[1], [0], [0], [1], [0, 0, 1, 1], [], []>} : vector<8x128xf32>, vector<128x384xf32>, vector<8x384xf32> -> vector<8x384xf32>
    %cst_156 = arith.constant dense<0.000000e+00> : vector<8x384xf32>
    %458 = tpu.matmul %435, %3, %cst_156 {dimension_numbers = #tpu.dot_dimension_numbers<[1], [0], [0], [1], [0, 0, 1, 1], [], []>} : vector<8x128xf32>, vector<128x384xf32>, vector<8x384xf32> -> vector<8x384xf32>
    %459 = vector.extract_strided_slice %450 {offsets = [0, 0], sizes = [8, 128], strides = [1, 1]} : vector<8x384xf32> to vector<8x128xf32>
    %460 = vector.extract_strided_slice %457 {offsets = [0, 0], sizes = [8, 128], strides = [1, 1]} : vector<8x384xf32> to vector<8x128xf32>
    %461 = arith.addf %459, %460 : vector<8x128xf32>
    %cst_157 = arith.constant 5.000000e-01 : f32
    %462 = vector.broadcast %cst_157 : f32 to vector<8x128xf32>
    %463 = arith.mulf %462, %461 : vector<8x128xf32>
    %464 = math.tanh %463 : vector<8x128xf32>
    %cst_158 = arith.constant 5.000000e-01 : f32
    %465 = vector.broadcast %cst_158 : f32 to vector<8x128xf32>
    %466 = arith.mulf %465, %464 : vector<8x128xf32>
    %cst_159 = arith.constant 5.000000e-01 : f32
    %467 = vector.broadcast %cst_159 : f32 to vector<8x128xf32>
    %468 = arith.addf %466, %467 : vector<8x128xf32>
    %469 = vector.extract_strided_slice %450 {offsets = [0, 128], sizes = [8, 128], strides = [1, 1]} : vector<8x384xf32> to vector<8x128xf32>
    %470 = vector.extract_strided_slice %457 {offsets = [0, 128], sizes = [8, 128], strides = [1, 1]} : vector<8x384xf32> to vector<8x128xf32>
    %471 = arith.addf %469, %470 : vector<8x128xf32>
    %cst_160 = arith.constant 5.000000e-01 : f32
    %472 = vector.broadcast %cst_160 : f32 to vector<8x128xf32>
    %473 = arith.mulf %472, %471 : vector<8x128xf32>
    %474 = math.tanh %473 : vector<8x128xf32>
    %cst_161 = arith.constant 5.000000e-01 : f32
    %475 = vector.broadcast %cst_161 : f32 to vector<8x128xf32>
    %476 = arith.mulf %475, %474 : vector<8x128xf32>
    %cst_162 = arith.constant 5.000000e-01 : f32
    %477 = vector.broadcast %cst_162 : f32 to vector<8x128xf32>
    %478 = arith.addf %476, %477 : vector<8x128xf32>
    %479 = vector.extract_strided_slice %450 {offsets = [0, 256], sizes = [8, 128], strides = [1, 1]} : vector<8x384xf32> to vector<8x128xf32>
    %480 = vector.extract_strided_slice %457 {offsets = [0, 256], sizes = [8, 128], strides = [1, 1]} : vector<8x384xf32> to vector<8x128xf32>
    %481 = vector.broadcast %6 : vector<1x128xf32> to vector<8x128xf32>
    %482 = arith.addf %480, %481 : vector<8x128xf32>
    %483 = arith.mulf %468, %482 : vector<8x128xf32>
    %484 = arith.addf %479, %483 : vector<8x128xf32>
    %485 = math.tanh %484 : vector<8x128xf32>
    %cst_163 = arith.constant 1.000000e+00 : f32
    %486 = vector.broadcast %cst_163 : f32 to vector<8x128xf32>
    %487 = arith.subf %486, %478 : vector<8x128xf32>
    %488 = arith.mulf %487, %485 : vector<8x128xf32>
    %489 = arith.mulf %478, %403 : vector<8x128xf32>
    %490 = arith.addf %488, %489 : vector<8x128xf32>
    %491 = vector.extract_strided_slice %456 {offsets = [0, 0], sizes = [8, 128], strides = [1, 1]} : vector<8x384xf32> to vector<8x128xf32>
    %492 = vector.extract_strided_slice %458 {offsets = [0, 0], sizes = [8, 128], strides = [1, 1]} : vector<8x384xf32> to vector<8x128xf32>
    %493 = arith.addf %491, %492 : vector<8x128xf32>
    %cst_164 = arith.constant 5.000000e-01 : f32
    %494 = vector.broadcast %cst_164 : f32 to vector<8x128xf32>
    %495 = arith.mulf %494, %493 : vector<8x128xf32>
    %496 = math.tanh %495 : vector<8x128xf32>
    %cst_165 = arith.constant 5.000000e-01 : f32
    %497 = vector.broadcast %cst_165 : f32 to vector<8x128xf32>
    %498 = arith.mulf %497, %496 : vector<8x128xf32>
    %cst_166 = arith.constant 5.000000e-01 : f32
    %499 = vector.broadcast %cst_166 : f32 to vector<8x128xf32>
    %500 = arith.addf %498, %499 : vector<8x128xf32>
    %501 = vector.extract_strided_slice %456 {offsets = [0, 128], sizes = [8, 128], strides = [1, 1]} : vector<8x384xf32> to vector<8x128xf32>
    %502 = vector.extract_strided_slice %458 {offsets = [0, 128], sizes = [8, 128], strides = [1, 1]} : vector<8x384xf32> to vector<8x128xf32>
    %503 = arith.addf %501, %502 : vector<8x128xf32>
    %cst_167 = arith.constant 5.000000e-01 : f32
    %504 = vector.broadcast %cst_167 : f32 to vector<8x128xf32>
    %505 = arith.mulf %504, %503 : vector<8x128xf32>
    %506 = math.tanh %505 : vector<8x128xf32>
    %cst_168 = arith.constant 5.000000e-01 : f32
    %507 = vector.broadcast %cst_168 : f32 to vector<8x128xf32>
    %508 = arith.mulf %507, %506 : vector<8x128xf32>
    %cst_169 = arith.constant 5.000000e-01 : f32
    %509 = vector.broadcast %cst_169 : f32 to vector<8x128xf32>
    %510 = arith.addf %508, %509 : vector<8x128xf32>
    %511 = vector.extract_strided_slice %456 {offsets = [0, 256], sizes = [8, 128], strides = [1, 1]} : vector<8x384xf32> to vector<8x128xf32>
    %512 = vector.extract_strided_slice %458 {offsets = [0, 256], sizes = [8, 128], strides = [1, 1]} : vector<8x384xf32> to vector<8x128xf32>
    %513 = vector.broadcast %7 : vector<1x128xf32> to vector<8x128xf32>
    %514 = arith.addf %512, %513 : vector<8x128xf32>
    %515 = arith.mulf %500, %514 : vector<8x128xf32>
    %516 = arith.addf %511, %515 : vector<8x128xf32>
    %517 = math.tanh %516 : vector<8x128xf32>
    %cst_170 = arith.constant 1.000000e+00 : f32
    %518 = vector.broadcast %cst_170 : f32 to vector<8x128xf32>
    %519 = arith.subf %518, %510 : vector<8x128xf32>
    %520 = arith.mulf %519, %517 : vector<8x128xf32>
    %521 = arith.mulf %510, %435 : vector<8x128xf32>
    %522 = arith.addf %520, %521 : vector<8x128xf32>
    %523 = arith.index_cast %c5_i32 : i32 to index
    %c0_171 = arith.constant 0 : index
    %c0_172 = arith.constant 0 : index
    %524 = vector.load %arg13[%523, %c0_171, %c0_172] : memref<8x8x256xf32, #tpu.memory_space<vmem>>, vector<1x8x128xf32>
    %525 = vector.shape_cast %524 : vector<1x8x128xf32> to vector<8x128xf32>
    %526 = vector.shape_cast %490 : vector<8x128xf32> to vector<1x8x128xf32>
    tpu.vector_store %arg13[%523, %c0_171, %c0_172], %526 {strides = array<i32>} : memref<8x8x256xf32, #tpu.memory_space<vmem>>, vector<1x8x128xf32>,
    %527 = arith.index_cast %444 : i32 to index
    %c0_173 = arith.constant 0 : index
    %c128_174 = arith.constant 128 : index
    %528 = vector.load %arg13[%527, %c0_173, %c128_174] : memref<8x8x256xf32, #tpu.memory_space<vmem>>, vector<1x8x128xf32>
    %529 = vector.shape_cast %528 : vector<1x8x128xf32> to vector<8x128xf32>
    %530 = vector.shape_cast %522 : vector<8x128xf32> to vector<1x8x128xf32>
    tpu.vector_store %arg13[%527, %c0_173, %c128_174], %530 {strides = array<i32>} : memref<8x8x256xf32, #tpu.memory_space<vmem>>, vector<1x8x128xf32>,
    %c6_i32 = arith.constant 6 : i32
    %c7_i32_175 = arith.constant 7 : i32
    %531 = arith.subi %c7_i32_175, %c6_i32 : i32
    %532 = arith.index_cast %c6_i32 : i32 to index
    %c0_176 = arith.constant 0 : index
    %c0_177 = arith.constant 0 : index
    %533 = vector.load %arg1[%532, %c0_176, %c0_177] : memref<8x8x128xf32, #tpu.memory_space<vmem>>, vector<1x8x128xf32>
    %534 = vector.shape_cast %533 : vector<1x8x128xf32> to vector<8x128xf32>
    %cst_178 = arith.constant dense<0.000000e+00> : vector<8x384xf32>
    %535 = tpu.matmul %534, %0, %cst_178 {dimension_numbers = #tpu.dot_dimension_numbers<[1], [0], [0], [1], [0, 0, 1, 1], [], []>} : vector<8x128xf32>, vector<128x384xf32>, vector<8x384xf32> -> vector<8x384xf32>
    %536 = vector.broadcast %4 : vector<1x384xf32> to vector<8x384xf32>
    %537 = arith.addf %535, %536 : vector<8x384xf32>
    %538 = arith.index_cast %531 : i32 to index
    %c0_179 = arith.constant 0 : index
    %c0_180 = arith.constant 0 : index
    %539 = vector.load %arg1[%538, %c0_179, %c0_180] : memref<8x8x128xf32, #tpu.memory_space<vmem>>, vector<1x8x128xf32>
    %540 = vector.shape_cast %539 : vector<1x8x128xf32> to vector<8x128xf32>
    %cst_181 = arith.constant dense<0.000000e+00> : vector<8x384xf32>
    %541 = tpu.matmul %540, %2, %cst_181 {dimension_numbers = #tpu.dot_dimension_numbers<[1], [0], [0], [1], [0, 0, 1, 1], [], []>} : vector<8x128xf32>, vector<128x384xf32>, vector<8x384xf32> -> vector<8x384xf32>
    %542 = vector.broadcast %5 : vector<1x384xf32> to vector<8x384xf32>
    %543 = arith.addf %541, %542 : vector<8x384xf32>
    %cst_182 = arith.constant dense<0.000000e+00> : vector<8x384xf32>
    %544 = tpu.matmul %490, %1, %cst_182 {dimension_numbers = #tpu.dot_dimension_numbers<[1], [0], [0], [1], [0, 0, 1, 1], [], []>} : vector<8x128xf32>, vector<128x384xf32>, vector<8x384xf32> -> vector<8x384xf32>
    %cst_183 = arith.constant dense<0.000000e+00> : vector<8x384xf32>
    %545 = tpu.matmul %522, %3, %cst_183 {dimension_numbers = #tpu.dot_dimension_numbers<[1], [0], [0], [1], [0, 0, 1, 1], [], []>} : vector<8x128xf32>, vector<128x384xf32>, vector<8x384xf32> -> vector<8x384xf32>
    %546 = vector.extract_strided_slice %537 {offsets = [0, 0], sizes = [8, 128], strides = [1, 1]} : vector<8x384xf32> to vector<8x128xf32>
    %547 = vector.extract_strided_slice %544 {offsets = [0, 0], sizes = [8, 128], strides = [1, 1]} : vector<8x384xf32> to vector<8x128xf32>
    %548 = arith.addf %546, %547 : vector<8x128xf32>
    %cst_184 = arith.constant 5.000000e-01 : f32
    %549 = vector.broadcast %cst_184 : f32 to vector<8x128xf32>
    %550 = arith.mulf %549, %548 : vector<8x128xf32>
    %551 = math.tanh %550 : vector<8x128xf32>
    %cst_185 = arith.constant 5.000000e-01 : f32
    %552 = vector.broadcast %cst_185 : f32 to vector<8x128xf32>
    %553 = arith.mulf %552, %551 : vector<8x128xf32>
    %cst_186 = arith.constant 5.000000e-01 : f32
    %554 = vector.broadcast %cst_186 : f32 to vector<8x128xf32>
    %555 = arith.addf %553, %554 : vector<8x128xf32>
    %556 = vector.extract_strided_slice %537 {offsets = [0, 128], sizes = [8, 128], strides = [1, 1]} : vector<8x384xf32> to vector<8x128xf32>
    %557 = vector.extract_strided_slice %544 {offsets = [0, 128], sizes = [8, 128], strides = [1, 1]} : vector<8x384xf32> to vector<8x128xf32>
    %558 = arith.addf %556, %557 : vector<8x128xf32>
    %cst_187 = arith.constant 5.000000e-01 : f32
    %559 = vector.broadcast %cst_187 : f32 to vector<8x128xf32>
    %560 = arith.mulf %559, %558 : vector<8x128xf32>
    %561 = math.tanh %560 : vector<8x128xf32>
    %cst_188 = arith.constant 5.000000e-01 : f32
    %562 = vector.broadcast %cst_188 : f32 to vector<8x128xf32>
    %563 = arith.mulf %562, %561 : vector<8x128xf32>
    %cst_189 = arith.constant 5.000000e-01 : f32
    %564 = vector.broadcast %cst_189 : f32 to vector<8x128xf32>
    %565 = arith.addf %563, %564 : vector<8x128xf32>
    %566 = vector.extract_strided_slice %537 {offsets = [0, 256], sizes = [8, 128], strides = [1, 1]} : vector<8x384xf32> to vector<8x128xf32>
    %567 = vector.extract_strided_slice %544 {offsets = [0, 256], sizes = [8, 128], strides = [1, 1]} : vector<8x384xf32> to vector<8x128xf32>
    %568 = vector.broadcast %6 : vector<1x128xf32> to vector<8x128xf32>
    %569 = arith.addf %567, %568 : vector<8x128xf32>
    %570 = arith.mulf %555, %569 : vector<8x128xf32>
    %571 = arith.addf %566, %570 : vector<8x128xf32>
    %572 = math.tanh %571 : vector<8x128xf32>
    %cst_190 = arith.constant 1.000000e+00 : f32
    %573 = vector.broadcast %cst_190 : f32 to vector<8x128xf32>
    %574 = arith.subf %573, %565 : vector<8x128xf32>
    %575 = arith.mulf %574, %572 : vector<8x128xf32>
    %576 = arith.mulf %565, %490 : vector<8x128xf32>
    %577 = arith.addf %575, %576 : vector<8x128xf32>
    %578 = vector.extract_strided_slice %543 {offsets = [0, 0], sizes = [8, 128], strides = [1, 1]} : vector<8x384xf32> to vector<8x128xf32>
    %579 = vector.extract_strided_slice %545 {offsets = [0, 0], sizes = [8, 128], strides = [1, 1]} : vector<8x384xf32> to vector<8x128xf32>
    %580 = arith.addf %578, %579 : vector<8x128xf32>
    %cst_191 = arith.constant 5.000000e-01 : f32
    %581 = vector.broadcast %cst_191 : f32 to vector<8x128xf32>
    %582 = arith.mulf %581, %580 : vector<8x128xf32>
    %583 = math.tanh %582 : vector<8x128xf32>
    %cst_192 = arith.constant 5.000000e-01 : f32
    %584 = vector.broadcast %cst_192 : f32 to vector<8x128xf32>
    %585 = arith.mulf %584, %583 : vector<8x128xf32>
    %cst_193 = arith.constant 5.000000e-01 : f32
    %586 = vector.broadcast %cst_193 : f32 to vector<8x128xf32>
    %587 = arith.addf %585, %586 : vector<8x128xf32>
    %588 = vector.extract_strided_slice %543 {offsets = [0, 128], sizes = [8, 128], strides = [1, 1]} : vector<8x384xf32> to vector<8x128xf32>
    %589 = vector.extract_strided_slice %545 {offsets = [0, 128], sizes = [8, 128], strides = [1, 1]} : vector<8x384xf32> to vector<8x128xf32>
    %590 = arith.addf %588, %589 : vector<8x128xf32>
    %cst_194 = arith.constant 5.000000e-01 : f32
    %591 = vector.broadcast %cst_194 : f32 to vector<8x128xf32>
    %592 = arith.mulf %591, %590 : vector<8x128xf32>
    %593 = math.tanh %592 : vector<8x128xf32>
    %cst_195 = arith.constant 5.000000e-01 : f32
    %594 = vector.broadcast %cst_195 : f32 to vector<8x128xf32>
    %595 = arith.mulf %594, %593 : vector<8x128xf32>
    %cst_196 = arith.constant 5.000000e-01 : f32
    %596 = vector.broadcast %cst_196 : f32 to vector<8x128xf32>
    %597 = arith.addf %595, %596 : vector<8x128xf32>
    %598 = vector.extract_strided_slice %543 {offsets = [0, 256], sizes = [8, 128], strides = [1, 1]} : vector<8x384xf32> to vector<8x128xf32>
    %599 = vector.extract_strided_slice %545 {offsets = [0, 256], sizes = [8, 128], strides = [1, 1]} : vector<8x384xf32> to vector<8x128xf32>
    %600 = vector.broadcast %7 : vector<1x128xf32> to vector<8x128xf32>
    %601 = arith.addf %599, %600 : vector<8x128xf32>
    %602 = arith.mulf %587, %601 : vector<8x128xf32>
    %603 = arith.addf %598, %602 : vector<8x128xf32>
    %604 = math.tanh %603 : vector<8x128xf32>
    %cst_197 = arith.constant 1.000000e+00 : f32
    %605 = vector.broadcast %cst_197 : f32 to vector<8x128xf32>
    %606 = arith.subf %605, %597 : vector<8x128xf32>
    %607 = arith.mulf %606, %604 : vector<8x128xf32>
    %608 = arith.mulf %597, %522 : vector<8x128xf32>
    %609 = arith.addf %607, %608 : vector<8x128xf32>
    %610 = arith.index_cast %c6_i32 : i32 to index
    %c0_198 = arith.constant 0 : index
    %c0_199 = arith.constant 0 : index
    %611 = vector.load %arg13[%610, %c0_198, %c0_199] : memref<8x8x256xf32, #tpu.memory_space<vmem>>, vector<1x8x128xf32>
    %612 = vector.shape_cast %611 : vector<1x8x128xf32> to vector<8x128xf32>
    %613 = vector.shape_cast %577 : vector<8x128xf32> to vector<1x8x128xf32>
    tpu.vector_store %arg13[%610, %c0_198, %c0_199], %613 {strides = array<i32>} : memref<8x8x256xf32, #tpu.memory_space<vmem>>, vector<1x8x128xf32>,
    %614 = arith.index_cast %531 : i32 to index
    %c0_200 = arith.constant 0 : index
    %c128_201 = arith.constant 128 : index
    %615 = vector.load %arg13[%614, %c0_200, %c128_201] : memref<8x8x256xf32, #tpu.memory_space<vmem>>, vector<1x8x128xf32>
    %616 = vector.shape_cast %615 : vector<1x8x128xf32> to vector<8x128xf32>
    %617 = vector.shape_cast %609 : vector<8x128xf32> to vector<1x8x128xf32>
    tpu.vector_store %arg13[%614, %c0_200, %c128_201], %617 {strides = array<i32>} : memref<8x8x256xf32, #tpu.memory_space<vmem>>, vector<1x8x128xf32>,
    %c7_i32_202 = arith.constant 7 : i32
    %c7_i32_203 = arith.constant 7 : i32
    %618 = arith.subi %c7_i32_203, %c7_i32_202 : i32
    %619 = arith.index_cast %c7_i32_202 : i32 to index
    %c0_204 = arith.constant 0 : index
    %c0_205 = arith.constant 0 : index
    %620 = vector.load %arg1[%619, %c0_204, %c0_205] : memref<8x8x128xf32, #tpu.memory_space<vmem>>, vector<1x8x128xf32>
    %621 = vector.shape_cast %620 : vector<1x8x128xf32> to vector<8x128xf32>
    %cst_206 = arith.constant dense<0.000000e+00> : vector<8x384xf32>
    %622 = tpu.matmul %621, %0, %cst_206 {dimension_numbers = #tpu.dot_dimension_numbers<[1], [0], [0], [1], [0, 0, 1, 1], [], []>} : vector<8x128xf32>, vector<128x384xf32>, vector<8x384xf32> -> vector<8x384xf32>
    %623 = vector.broadcast %4 : vector<1x384xf32> to vector<8x384xf32>
    %624 = arith.addf %622, %623 : vector<8x384xf32>
    %625 = arith.index_cast %618 : i32 to index
    %c0_207 = arith.constant 0 : index
    %c0_208 = arith.constant 0 : index
    %626 = vector.load %arg1[%625, %c0_207, %c0_208] : memref<8x8x128xf32, #tpu.memory_space<vmem>>, vector<1x8x128xf32>
    %627 = vector.shape_cast %626 : vector<1x8x128xf32> to vector<8x128xf32>
    %cst_209 = arith.constant dense<0.000000e+00> : vector<8x384xf32>
    %628 = tpu.matmul %627, %2, %cst_209 {dimension_numbers = #tpu.dot_dimension_numbers<[1], [0], [0], [1], [0, 0, 1, 1], [], []>} : vector<8x128xf32>, vector<128x384xf32>, vector<8x384xf32> -> vector<8x384xf32>
    %629 = vector.broadcast %5 : vector<1x384xf32> to vector<8x384xf32>
    %630 = arith.addf %628, %629 : vector<8x384xf32>
    %cst_210 = arith.constant dense<0.000000e+00> : vector<8x384xf32>
    %631 = tpu.matmul %577, %1, %cst_210 {dimension_numbers = #tpu.dot_dimension_numbers<[1], [0], [0], [1], [0, 0, 1, 1], [], []>} : vector<8x128xf32>, vector<128x384xf32>, vector<8x384xf32> -> vector<8x384xf32>
    %cst_211 = arith.constant dense<0.000000e+00> : vector<8x384xf32>
    %632 = tpu.matmul %609, %3, %cst_211 {dimension_numbers = #tpu.dot_dimension_numbers<[1], [0], [0], [1], [0, 0, 1, 1], [], []>} : vector<8x128xf32>, vector<128x384xf32>, vector<8x384xf32> -> vector<8x384xf32>
    %633 = vector.extract_strided_slice %624 {offsets = [0, 0], sizes = [8, 128], strides = [1, 1]} : vector<8x384xf32> to vector<8x128xf32>
    %634 = vector.extract_strided_slice %631 {offsets = [0, 0], sizes = [8, 128], strides = [1, 1]} : vector<8x384xf32> to vector<8x128xf32>
    %635 = arith.addf %633, %634 : vector<8x128xf32>
    %cst_212 = arith.constant 5.000000e-01 : f32
    %636 = vector.broadcast %cst_212 : f32 to vector<8x128xf32>
    %637 = arith.mulf %636, %635 : vector<8x128xf32>
    %638 = math.tanh %637 : vector<8x128xf32>
    %cst_213 = arith.constant 5.000000e-01 : f32
    %639 = vector.broadcast %cst_213 : f32 to vector<8x128xf32>
    %640 = arith.mulf %639, %638 : vector<8x128xf32>
    %cst_214 = arith.constant 5.000000e-01 : f32
    %641 = vector.broadcast %cst_214 : f32 to vector<8x128xf32>
    %642 = arith.addf %640, %641 : vector<8x128xf32>
    %643 = vector.extract_strided_slice %624 {offsets = [0, 128], sizes = [8, 128], strides = [1, 1]} : vector<8x384xf32> to vector<8x128xf32>
    %644 = vector.extract_strided_slice %631 {offsets = [0, 128], sizes = [8, 128], strides = [1, 1]} : vector<8x384xf32> to vector<8x128xf32>
    %645 = arith.addf %643, %644 : vector<8x128xf32>
    %cst_215 = arith.constant 5.000000e-01 : f32
    %646 = vector.broadcast %cst_215 : f32 to vector<8x128xf32>
    %647 = arith.mulf %646, %645 : vector<8x128xf32>
    %648 = math.tanh %647 : vector<8x128xf32>
    %cst_216 = arith.constant 5.000000e-01 : f32
    %649 = vector.broadcast %cst_216 : f32 to vector<8x128xf32>
    %650 = arith.mulf %649, %648 : vector<8x128xf32>
    %cst_217 = arith.constant 5.000000e-01 : f32
    %651 = vector.broadcast %cst_217 : f32 to vector<8x128xf32>
    %652 = arith.addf %650, %651 : vector<8x128xf32>
    %653 = vector.extract_strided_slice %624 {offsets = [0, 256], sizes = [8, 128], strides = [1, 1]} : vector<8x384xf32> to vector<8x128xf32>
    %654 = vector.extract_strided_slice %631 {offsets = [0, 256], sizes = [8, 128], strides = [1, 1]} : vector<8x384xf32> to vector<8x128xf32>
    %655 = vector.broadcast %6 : vector<1x128xf32> to vector<8x128xf32>
    %656 = arith.addf %654, %655 : vector<8x128xf32>
    %657 = arith.mulf %642, %656 : vector<8x128xf32>
    %658 = arith.addf %653, %657 : vector<8x128xf32>
    %659 = math.tanh %658 : vector<8x128xf32>
    %cst_218 = arith.constant 1.000000e+00 : f32
    %660 = vector.broadcast %cst_218 : f32 to vector<8x128xf32>
    %661 = arith.subf %660, %652 : vector<8x128xf32>
    %662 = arith.mulf %661, %659 : vector<8x128xf32>
    %663 = arith.mulf %652, %577 : vector<8x128xf32>
    %664 = arith.addf %662, %663 : vector<8x128xf32>
    %665 = vector.extract_strided_slice %630 {offsets = [0, 0], sizes = [8, 128], strides = [1, 1]} : vector<8x384xf32> to vector<8x128xf32>
    %666 = vector.extract_strided_slice %632 {offsets = [0, 0], sizes = [8, 128], strides = [1, 1]} : vector<8x384xf32> to vector<8x128xf32>
    %667 = arith.addf %665, %666 : vector<8x128xf32>
    %cst_219 = arith.constant 5.000000e-01 : f32
    %668 = vector.broadcast %cst_219 : f32 to vector<8x128xf32>
    %669 = arith.mulf %668, %667 : vector<8x128xf32>
    %670 = math.tanh %669 : vector<8x128xf32>
    %cst_220 = arith.constant 5.000000e-01 : f32
    %671 = vector.broadcast %cst_220 : f32 to vector<8x128xf32>
    %672 = arith.mulf %671, %670 : vector<8x128xf32>
    %cst_221 = arith.constant 5.000000e-01 : f32
    %673 = vector.broadcast %cst_221 : f32 to vector<8x128xf32>
    %674 = arith.addf %672, %673 : vector<8x128xf32>
    %675 = vector.extract_strided_slice %630 {offsets = [0, 128], sizes = [8, 128], strides = [1, 1]} : vector<8x384xf32> to vector<8x128xf32>
    %676 = vector.extract_strided_slice %632 {offsets = [0, 128], sizes = [8, 128], strides = [1, 1]} : vector<8x384xf32> to vector<8x128xf32>
    %677 = arith.addf %675, %676 : vector<8x128xf32>
    %cst_222 = arith.constant 5.000000e-01 : f32
    %678 = vector.broadcast %cst_222 : f32 to vector<8x128xf32>
    %679 = arith.mulf %678, %677 : vector<8x128xf32>
    %680 = math.tanh %679 : vector<8x128xf32>
    %cst_223 = arith.constant 5.000000e-01 : f32
    %681 = vector.broadcast %cst_223 : f32 to vector<8x128xf32>
    %682 = arith.mulf %681, %680 : vector<8x128xf32>
    %cst_224 = arith.constant 5.000000e-01 : f32
    %683 = vector.broadcast %cst_224 : f32 to vector<8x128xf32>
    %684 = arith.addf %682, %683 : vector<8x128xf32>
    %685 = vector.extract_strided_slice %630 {offsets = [0, 256], sizes = [8, 128], strides = [1, 1]} : vector<8x384xf32> to vector<8x128xf32>
    %686 = vector.extract_strided_slice %632 {offsets = [0, 256], sizes = [8, 128], strides = [1, 1]} : vector<8x384xf32> to vector<8x128xf32>
    %687 = vector.broadcast %7 : vector<1x128xf32> to vector<8x128xf32>
    %688 = arith.addf %686, %687 : vector<8x128xf32>
    %689 = arith.mulf %674, %688 : vector<8x128xf32>
    %690 = arith.addf %685, %689 : vector<8x128xf32>
    %691 = math.tanh %690 : vector<8x128xf32>
    %cst_225 = arith.constant 1.000000e+00 : f32
    %692 = vector.broadcast %cst_225 : f32 to vector<8x128xf32>
    %693 = arith.subf %692, %684 : vector<8x128xf32>
    %694 = arith.mulf %693, %691 : vector<8x128xf32>
    %695 = arith.mulf %684, %609 : vector<8x128xf32>
    %696 = arith.addf %694, %695 : vector<8x128xf32>
    %697 = arith.index_cast %c7_i32_202 : i32 to index
    %c0_226 = arith.constant 0 : index
    %c0_227 = arith.constant 0 : index
    %698 = vector.load %arg13[%697, %c0_226, %c0_227] : memref<8x8x256xf32, #tpu.memory_space<vmem>>, vector<1x8x128xf32>
    %699 = vector.shape_cast %698 : vector<1x8x128xf32> to vector<8x128xf32>
    %700 = vector.shape_cast %664 : vector<8x128xf32> to vector<1x8x128xf32>
    tpu.vector_store %arg13[%697, %c0_226, %c0_227], %700 {strides = array<i32>} : memref<8x8x256xf32, #tpu.memory_space<vmem>>, vector<1x8x128xf32>,
    %701 = arith.index_cast %618 : i32 to index
    %c0_228 = arith.constant 0 : index
    %c128_229 = arith.constant 128 : index
    %702 = vector.load %arg13[%701, %c0_228, %c128_229] : memref<8x8x256xf32, #tpu.memory_space<vmem>>, vector<1x8x128xf32>
    %703 = vector.shape_cast %702 : vector<1x8x128xf32> to vector<8x128xf32>
    %704 = vector.shape_cast %696 : vector<8x128xf32> to vector<1x8x128xf32>
    tpu.vector_store %arg13[%701, %c0_228, %c128_229], %704 {strides = array<i32>} : memref<8x8x256xf32, #tpu.memory_space<vmem>>, vector<1x8x128xf32>,
    %c8_i32 = arith.constant 8 : i32
    %c0_230 = arith.constant 0 : index
    %c0_231 = arith.constant 0 : index
    %705 = vector.load %arg10[%c0_230, %c0_231] : memref<256x256xf32, #tpu.memory_space<vmem>>, vector<256x256xf32>
    %c0_232 = arith.constant 0 : index
    %c0_233 = arith.constant 0 : index
    %706 = vector.load %arg11[%c0_232, %c0_233] : memref<1x256xf32, #tpu.memory_space<vmem>>, vector<1x256xf32>
    %c0_i32_234 = arith.constant 0 : i32
    %c8_i32_235 = arith.constant 8 : i32
    %707 = arith.muli %c0_i32_234, %c8_i32_235 : i32
    %708 = tpu.assume_multiple %707, 8 : i32
    %709 = arith.index_cast %708 : i32 to index
    %c0_236 = arith.constant 0 : index
    %c0_237 = arith.constant 0 : index
    %710 = vector.load %arg13[%709, %c0_236, %c0_237] : memref<8x8x256xf32, #tpu.memory_space<vmem>>, vector<8x8x256xf32>
    %711 = vector.shape_cast %710 : vector<8x8x256xf32> to vector<64x256xf32>
    %cst_238 = arith.constant dense<0.000000e+00> : vector<64x256xf32>
    %712 = tpu.matmul %711, %705, %cst_238 {dimension_numbers = #tpu.dot_dimension_numbers<[1], [0], [0], [1], [0, 0, 1, 1], [], []>} : vector<64x256xf32>, vector<256x256xf32>, vector<64x256xf32> -> vector<64x256xf32>
    %713 = vector.broadcast %706 : vector<1x256xf32> to vector<64x256xf32>
    %714 = arith.addf %712, %713 : vector<64x256xf32>
    %715 = math.tanh %714 : vector<64x256xf32>
    %716 = vector.extract_strided_slice %715 {offsets = [0, 0], sizes = [64, 128], strides = [1, 1]} : vector<64x256xf32> to vector<64x128xf32>
    %717 = vector.extract_strided_slice %715 {offsets = [0, 128], sizes = [64, 128], strides = [1, 1]} : vector<64x256xf32> to vector<64x128xf32>
    %cst_239 = arith.constant 5.000000e-01 : f32
    %718 = vector.broadcast %cst_239 : f32 to vector<64x128xf32>
    %719 = arith.mulf %718, %717 : vector<64x128xf32>
    %720 = math.tanh %719 : vector<64x128xf32>
    %cst_240 = arith.constant 5.000000e-01 : f32
    %721 = vector.broadcast %cst_240 : f32 to vector<64x128xf32>
    %722 = arith.mulf %721, %720 : vector<64x128xf32>
    %cst_241 = arith.constant 5.000000e-01 : f32
    %723 = vector.broadcast %cst_241 : f32 to vector<64x128xf32>
    %724 = arith.addf %722, %723 : vector<64x128xf32>
    %725 = arith.mulf %716, %724 : vector<64x128xf32>
    %726 = vector.shape_cast %725 : vector<64x128xf32> to vector<8x8x128xf32>
    %727 = arith.index_cast %708 : i32 to index
    %c0_242 = arith.constant 0 : index
    %c0_243 = arith.constant 0 : index
    %728 = vector.load %arg12[%727, %c0_242, %c0_243] : memref<8x8x128xf32, #tpu.memory_space<vmem>>, vector<8x8x128xf32>
    tpu.vector_store %arg12[%727, %c0_242, %c0_243], %726 {strides = array<i32>} : memref<8x8x128xf32, #tpu.memory_space<vmem>>, vector<8x8x128xf32>,
    %c1_i32_244 = arith.constant 1 : i32
    return
  }
  func.func @transform_0(%arg0: i32) -> (i32, i32, i32) {
    %c0_i32 = arith.constant 0 : i32
    %c0_i32_0 = arith.constant 0 : i32
    %c0_i32_1 = arith.constant 0 : i32
    return %c0_i32, %arg0, %c0_i32_0 : i32, i32, i32
  }
  func.func @transform_1(%arg0: i32) -> (i32, i32) {
    %c0_i32 = arith.constant 0 : i32
    %c0_i32_0 = arith.constant 0 : i32
    %c0_i32_1 = arith.constant 0 : i32
    return %c0_i32, %c0_i32_0 : i32, i32
  }
  func.func @transform_2(%arg0: i32) -> (i32, i32) {
    %c0_i32 = arith.constant 0 : i32
    %c0_i32_0 = arith.constant 0 : i32
    %c0_i32_1 = arith.constant 0 : i32
    return %c0_i32, %c0_i32_0 : i32, i32
  }
  func.func @transform_3(%arg0: i32) -> (i32, i32) {
    %c0_i32 = arith.constant 0 : i32
    %c0_i32_0 = arith.constant 0 : i32
    %c0_i32_1 = arith.constant 0 : i32
    return %c0_i32, %c0_i32_0 : i32, i32
  }
  func.func @transform_4(%arg0: i32) -> (i32, i32) {
    %c0_i32 = arith.constant 0 : i32
    %c0_i32_0 = arith.constant 0 : i32
    %c0_i32_1 = arith.constant 0 : i32
    return %c0_i32, %c0_i32_0 : i32, i32
  }
  func.func @transform_5(%arg0: i32) -> (i32, i32) {
    %c0_i32 = arith.constant 0 : i32
    %c0_i32_0 = arith.constant 0 : i32
    %c0_i32_1 = arith.constant 0 : i32
    return %c0_i32, %c0_i32_0 : i32, i32
  }
  func.func @transform_6(%arg0: i32) -> (i32, i32) {
    %c0_i32 = arith.constant 0 : i32
    %c0_i32_0 = arith.constant 0 : i32
    %c0_i32_1 = arith.constant 0 : i32
    return %c0_i32, %c0_i32_0 : i32, i32
  }
  func.func @transform_7(%arg0: i32) -> (i32, i32) {
    %c0_i32 = arith.constant 0 : i32
    %c0_i32_0 = arith.constant 0 : i32
    %c0_i32_1 = arith.constant 0 : i32
    return %c0_i32, %c0_i32_0 : i32, i32
  }
  func.func @transform_8(%arg0: i32) -> (i32, i32) {
    %c0_i32 = arith.constant 0 : i32
    %c0_i32_0 = arith.constant 0 : i32
    %c0_i32_1 = arith.constant 0 : i32
    return %c0_i32, %c0_i32_0 : i32, i32
  }
  func.func @transform_9(%arg0: i32) -> (i32, i32) {
    %c0_i32 = arith.constant 0 : i32
    %c0_i32_0 = arith.constant 0 : i32
    %c0_i32_1 = arith.constant 0 : i32
    return %c0_i32, %c0_i32_0 : i32, i32
  }
  func.func @transform_10(%arg0: i32) -> (i32, i32) {
    %c0_i32 = arith.constant 0 : i32
    %c0_i32_0 = arith.constant 0 : i32
    %c0_i32_1 = arith.constant 0 : i32
    return %c0_i32, %c0_i32_0 : i32, i32
  }
  func.func @transform_11(%arg0: i32) -> (i32, i32, i32) {
    %c0_i32 = arith.constant 0 : i32
    %c0_i32_0 = arith.constant 0 : i32
    %c0_i32_1 = arith.constant 0 : i32
    return %c0_i32, %arg0, %c0_i32_0 : i32, i32, i32
  }
}

</mosaic_0001>

<bundles_post_ra>
// kernel: tpu_custom_call.1
= control target key start
LH: loop header
LB: loop body
LE: loop exit
PB: predicated region body
PF: predicated region fallthrough
CT: control target
= control target key end

     0   :  { %16 = vsyncpa [#allocation4], 0  ;;  %s11195_s0 = inlined_call_operand.hbm [shape: f32[8,8,128], index: 0, kind: input, shape index: {}]   ;;  %s11196_s1 = inlined_call_operand.hbm [shape: f32[128,384], index: 1, kind: input, shape index: {}]   ;;  %s11197_s2 = inlined_call_operand.hbm [shape: f32[128,384], index: 2, kind: input, shape index: {}]   ;;  %s11198_s3 = inlined_call_operand.vmem [shape: f32[1,384], index: 3, kind: input, shape index: {}]   ;;  %s11199_s4 = inlined_call_operand.vmem [shape: f32[1,128], index: 4, kind: input, shape index: {}]   ;;  %s11200_s5 = inlined_call_operand.hbm [shape: f32[128,384], index: 5, kind: input, shape index: {}]   ;;  %s11201_s6 = inlined_call_operand.hbm [shape: f32[128,384], index: 6, kind: input, shape index: {}]   ;;  %s11202_s7 = inlined_call_operand.vmem [shape: f32[1,384], index: 7, kind: input, shape index: {}]   ;;  %s11203_s8 = inlined_call_operand.vmem [shape: f32[1,128], index: 8, kind: input, shape index: {}]   ;;  %s11204_s9 = inlined_call_operand.hbm [shape: f32[256,256], index: 9, kind: input, shape index: {}]   ;;  %s11205_s10 = inlined_call_operand.vmem [shape: f32[1,256], index: 10, kind: input, shape index: {}]   ;;  %s11206_s11 = inlined_call_operand.hbm [shape: f32[8,8,128], index: 11, kind: output, shape index: {}]  }
   0x1   :  { %17 = vsyncpa [#allocation7], 0 }
   0x2   :  { %18 = vsyncpa [#allocation10], 0 }
   0x3   :  { %19 = vsyncpa [#allocation13], 0 }
   0x4   :  { %20 = vsyncpa [#allocation5], 0  ;;  %s9415_s17 = smov [#allocation6]   ;;  %s9251_s21 = scalar_lea.hbm %s11196_s1, 6144 }
   0x5   :  { %s38_s18 = sshll.u32 %s9415_s17, 4  ;;  %p9252_p0 = scmp.ne.s32.totalorder %s11196_s1, %s9251_s21  ;;  %s39_s18 = int_to_ptr.vmem [resolvable:$true] %s38_s18 }
   0x6   :  { %p9255_p1 = scmp.lt.u32.totalorder %s9251_s21, %s11196_s1 }
   0x8   :  { %p9257_p2 = pnand %p9255_p1, %p9252_p0 }
   0xa   :  { %9260 = shalt.err (!%p9257_p2)
}
   0xb   :  { %s9261_s26 = scalar_lea.vmem %s39_s18, 6144  ;;  %p9266_p4 = scmp.lt.s32.totalorder %s39_s18, %s39_s18 }
   0xc   :  { %p9262_p3 = scmp.ne.s32.totalorder %s39_s18, %s9261_s26  ;;  %p9267_p5 = scmp.lt.s32.totalorder %s9261_s26, %s9261_s26 }
   0xe   :  { %p9268_p6 = por %p9267_p5, %p9266_p4 }
  0x10   :  { %p9269_p7 = pnand %p9268_p6, %p9262_p3 }
  0x12   :  { %9272 = shalt.err (!%p9269_p7)
}
  0x13   :  { %s9416_s27 = smov 384   ;;  %s9417_s28 = smov 24  }
  0x14   :  { %44 = dma.hbm_to_vmem [thread:$0]  %s11196_s1, 6144, %s39_s18, [#allocation7], %s9416_s27, %s9416_s27, %s9417_s28  }
  0x15   :  { %s9418_s12 = smov [#allocation9]   ;;  %s9419_s14 = smov [#allocation3]  }
  0x16   :  { %s66_s13 = sshll.u32 %s9418_s12, 4  ;;  %s26_s15 = sshll.u32 %s9419_s14, 4  ;;  %s67_s13 = int_to_ptr.vmem [resolvable:$true] %s66_s13  ;;  %s27_s15 = int_to_ptr.vmem [resolvable:$true] %s26_s15 }
  0x17   :  { %s9273_s19 = scalar_lea.hbm %s11200_s5, 6144 }
  0x18   :  { %p9274_p8 = scmp.ne.s32.totalorder %s11200_s5, %s9273_s19  ;;  %p9277_p9 = scmp.lt.u32.totalorder %s9273_s19, %s11200_s5 }
  0x1a   :  { %p9279_p10 = pnand %p9277_p9, %p9274_p8 }
  0x1c   :  { %9282 = shalt.err (!%p9279_p10)
}
  0x1d   :  { %s9283_s1 = scalar_lea.vmem %s67_s13, 6144  ;;  %p9288_p12 = scmp.lt.s32.totalorder %s67_s13, %s67_s13 }
  0x1e   :  { %p9284_p11 = scmp.ne.s32.totalorder %s67_s13, %s9283_s1  ;;  %p9289_p13 = scmp.lt.s32.totalorder %s9283_s1, %s9283_s1 }
  0x20   :  { %p9290_p0 = por %p9289_p13, %p9288_p12 }
  0x22   :  { %p9291_p1 = pnand %p9290_p0, %p9284_p11 }
  0x24   :  { %9294 = shalt.err (!%p9291_p1)
}
  0x25   :  { %72 = dma.hbm_to_vmem [thread:$0]  %s11200_s5, 6144, %s67_s13, [#allocation10], %s9416_s27, %s9416_s27, %s9417_s28  }
  0x26   :  { %s9295_s29 = scalar_lea.hbm %s11195_s0, 1024 }
  0x27   :  { %p9296_p2 = scmp.ne.s32.totalorder %s11195_s0, %s9295_s29  ;;  %p9299_p3 = scmp.lt.u32.totalorder %s9295_s29, %s11195_s0 }
  0x29   :  { %p9301_p4 = pnand %p9299_p3, %p9296_p2 }
  0x2b   :  { %9304 = shalt.err (!%p9301_p4)
}
  0x2c   :  { %s9305_s17 = scalar_lea.vmem %s27_s15, 1024  ;;  %p9310_p6 = scmp.lt.s32.totalorder %s27_s15, %s27_s15 }
  0x2d   :  { %p9306_p5 = scmp.ne.s32.totalorder %s27_s15, %s9305_s17  ;;  %p9311_p7 = scmp.lt.s32.totalorder %s9305_s17, %s9305_s17 }
  0x2f   :  { %p9312_p8 = por %p9311_p7, %p9310_p6 }
  0x31   :  { %p9313_p9 = pnand %p9312_p8, %p9306_p5 }
  0x33   :  { %9316 = shalt.err (!%p9313_p9)
}
  0x34   :  { %s9420_s5 = smov 128   ;;  %s9421_s13 = smov 8  }
  0x35   :  { %32 = dma.hbm_to_vmem [thread:$0]  %s11195_s0, 1024, %s27_s15, [#allocation4], %s9420_s5, %s9420_s5, %s9421_s13  }
  0x36   :  { %s9422_s21 = smov [#allocation8]   ;;  %s9423_s23 = smov [#allocation11]  }
  0x37   :  { %s50_s22 = sshll.u32 %s9422_s21, 4  ;;  %s78_s1 = sshll.u32 %s9423_s23, 4  ;;  %s51_s22 = int_to_ptr.vmem [resolvable:$true] %s50_s22  ;;  %s79_s1 = int_to_ptr.vmem [resolvable:$true] %s78_s1 }
  0x38   :  { %s9317_s25 = scalar_lea.hbm %s11197_s2, 6144 }
  0x39   :  { %p9318_p10 = scmp.ne.s32.totalorder %s11197_s2, %s9317_s25  ;;  %p9321_p11 = scmp.lt.u32.totalorder %s9317_s25, %s11197_s2 }
  0x3b   :  { %p9323_p12 = pnand %p9321_p11, %p9318_p10 }
  0x3d   :  { %9326 = shalt.err (!%p9323_p12)
}
  0x3e   :  { %s9327_s0 = scalar_lea.vmem %s51_s22, 6144  ;;  %p9332_p0 = scmp.lt.s32.totalorder %s51_s22, %s51_s22 }
  0x3f   :  { %p9328_p13 = scmp.ne.s32.totalorder %s51_s22, %s9327_s0  ;;  %p9333_p1 = scmp.lt.s32.totalorder %s9327_s0, %s9327_s0 }
  0x41   :  { %p9334_p2 = por %p9333_p1, %p9332_p0 }
  0x43   :  { %p9335_p3 = pnand %p9334_p2, %p9328_p13 }
  0x45   :  { %9338 = shalt.err (!%p9335_p3)
}
  0x46   :  { %56 = dma.hbm_to_vmem [thread:$0]  %s11197_s2, 6144, %s51_s22, [#allocation7], %s9416_s27, %s9416_s27, %s9417_s28  }
  0x47   :  { %s9339_s19 = scalar_lea.hbm %s11201_s6, 6144 }
  0x48   :  { %p9340_p4 = scmp.ne.s32.totalorder %s11201_s6, %s9339_s19  ;;  %p9343_p5 = scmp.lt.u32.totalorder %s9339_s19, %s11201_s6 }
  0x4a   :  { %p9345_p6 = pnand %p9343_p5, %p9340_p4 }
  0x4c   :  { %9348 = shalt.err (!%p9345_p6)
}
  0x4d   :  { %s9349_s24 = scalar_lea.vmem %s79_s1, 6144  ;;  %p9354_p8 = scmp.lt.s32.totalorder %s79_s1, %s79_s1 }
  0x4e   :  { %p9350_p7 = scmp.ne.s32.totalorder %s79_s1, %s9349_s24  ;;  %p9355_p9 = scmp.lt.s32.totalorder %s9349_s24, %s9349_s24 }
  0x50   :  { %p9356_p10 = por %p9355_p9, %p9354_p8 }
  0x52   :  { %p9357_p11 = pnand %p9356_p10, %p9350_p7 }
  0x54   :  { %9360 = shalt.err (!%p9357_p11)
}
  0x55   :  { %84 = dma.hbm_to_vmem [thread:$0]  %s11201_s6, 6144, %s79_s1, [#allocation10], %s9416_s27, %s9416_s27, %s9417_s28  }
  0x56   :  { %s9424_s25 = smov [#allocation12]   ;;  %s9361_s12 = scalar_lea.hbm %s11204_s9, 8192 }
  0x57   :  { %s94_s26 = sshll.u32 %s9424_s25, 4  ;;  %p9362_p12 = scmp.ne.s32.totalorder %s11204_s9, %s9361_s12  ;;  %s95_s26 = int_to_ptr.vmem [resolvable:$true] %s94_s26 }
  0x58   :  { %p9365_p13 = scmp.lt.u32.totalorder %s9361_s12, %s11204_s9 }
  0x5a   :  { %p9367_p0 = pnand %p9365_p13, %p9362_p12 }
  0x5c   :  { %9370 = shalt.err (!%p9367_p0)
}
  0x5d   :  { %s9371_s17 = scalar_lea.vmem %s95_s26, 8192  ;;  %p9376_p2 = scmp.lt.s32.totalorder %s95_s26, %s95_s26 }
  0x5e   :  { %p9372_p1 = scmp.ne.s32.totalorder %s95_s26, %s9371_s17  ;;  %p9377_p3 = scmp.lt.s32.totalorder %s9371_s17, %s9371_s17 }
  0x60   :  { %p9378_p4 = por %p9377_p3, %p9376_p2 }
  0x62   :  { %p9379_p5 = pnand %p9378_p4, %p9372_p1 }
  0x64   :  { %9382 = shalt.err (!%p9379_p5)
}
  0x65   :  { %s9425_s6 = smov 256   ;;  %s9426_s27 = smov 16  }
  0x66   :  { %100 = dma.hbm_to_vmem [thread:$0]  %s11204_s9, 8192, %s95_s26, [#allocation13], %s9425_s6, %s9425_s6, %s9426_s27  }
  0x67   :  { %9405 = dma.done.wait [#allocation4], 1024  }
  0x68   :  { %9406 = vsyncadd [#allocation4], 4294966272 }
  0x69   :  { %9407 = dma.done.wait [#allocation7], 12288  }
  0x6a   :  { %9408 = vsyncadd [#allocation7], 4294955008 }
  0x6b   :  { %9409 = dma.done.wait [#allocation10], 12288  }
  0x6c   :  { %9410 = vsyncadd [#allocation10], 4294955008 }
  0x6d   :  { %9411 = dma.done.wait [#allocation13], 8192  }
  0x6e   :  { %9412 = vsyncadd [#allocation13], 4294959104  ;;  %v11207_v0 = vmov 0.0   ;;  %v122_v1 = vld [vmem:[#allocation6 + $0x8] sm:$0xff]  ;;  %v125_v2 = vld [vmem:[#allocation6 + $0x20] sm:$0xff]  ;;  %vm9429_vm0 = vmmov 0  }
  0x6f   :  { %398 = vmatprep.mubr.f32.mxu1 %v11207_v0  ;;  %557 = vmatprep.mubr.f32.mxu0 %v11207_v0  ;;  %v218_v3 = vld [vmem:[#allocation9 + $0x8] sm:$0xff]  ;;  %v9580_v4 = vpack.c.bf16 %v125_v2, %v122_v1  ;;  %v221_v5 = vld [vmem:[#allocation9 + $0x20] sm:$0xff]  ;;  %v124_v7 = vld [vmem:[#allocation6 + $0x18] sm:$0xff] }
  0x70   :  { %v121_v6 = vld [vmem:[#allocation6] sm:$0xff]  ;;  %v9582_v8 = vpack.c.bf16 %v221_v5, %v218_v3  ;;  %v220_v11 = vld [vmem:[#allocation9 + $0x18] sm:$0xff]  ;;  %v131_v14 = vld [vmem:[#allocation6 + $0x50] sm:$0xff] }
  0x71   :  { %v9584_v9 = vpack.c.bf16 %v124_v7, %v121_v6  ;;  %v217_v10 = vld [vmem:[#allocation9] sm:$0xff]  ;;  %v128_v12 = vld [vmem:[#allocation6 + $0x38] sm:$0xff]  ;;  %7168 = vmatprep.subr.bf16.mxu1 %v9580_v4  ;;  %v227_v16 = vld [vmem:[#allocation9 + $0x50] sm:$0xff] }
  0x72   :  { %11391 = vst [vmem:[#allocation20_spill] sm:$0xff] %v9582_v8  ;;  %v9587_v13 = vpack.c.bf16 %v220_v11, %v217_v10  ;;  %v224_v15 = vld [vmem:[#allocation9 + $0x38] sm:$0xff]  ;;  %7224 = vmatprep.subr.bf16.mxu0 %v9582_v8  ;;  %v9591_v17 = vpack.c.bf16 %v131_v14, %v128_v12  ;;  %v127_v19 = vld [vmem:[#allocation6 + $0x30] sm:$0xff]  ;;  %v130_v20 = vld [vmem:[#allocation6 + $0x48] sm:$0xff] }
  0x73   :  { %7170 = vmatpush1.bf16.msra.mxu1 %v9584_v9  ;;  %v9593_v18 = vpack.c.bf16 %v227_v16, %v224_v15  ;;  %v223_v21 = vld [vmem:[#allocation9 + $0x30] sm:$0xff]  ;;  %v9596_v22 = vpack.c.bf16 %v130_v20, %v127_v19  ;;  %v226_v23 = vld [vmem:[#allocation9 + $0x48] sm:$0xff]  ;;  %v137_v25 = vld [vmem:[#allocation6 + $0x80] sm:$0xff] }
  0x74   :  { %11392 = vst [vmem:[#allocation21_spill] sm:$0xff] %v9587_v13  ;;  %7226 = vmatpush1.bf16.msra.mxu0 %v9587_v13  ;;  %v134_v24 = vld [vmem:[#allocation6 + $0x68] sm:$0xff]  ;;  %7172 = vmatprep.subr.bf16.mxu1 %v9591_v17  ;;  %v9600_v26 = vpack.c.bf16 %v226_v23, %v223_v21  ;;  %v233_v29 = vld [vmem:[#allocation9 + $0x80] sm:$0xff]  ;;  %v136_v32 = vld [vmem:[#allocation6 + $0x78] sm:$0xff] }
  0x75   :  { %11393 = vst [vmem:[#allocation22_spill] sm:$0xff] %v9593_v18  ;;  %7228 = vmatprep.subr.bf16.mxu0 %v9593_v18  ;;  %v9602_v27 = vpack.c.bf16 %v137_v25, %v134_v24  ;;  %v230_v28 = vld [vmem:[#allocation9 + $0x68] sm:$0xff]  ;;  %v133_v30 = vld [vmem:[#allocation6 + $0x60] sm:$0xff]  ;;  %v232_v34 = vld [vmem:[#allocation9 + $0x78] sm:$0xff] }
  0x76   :  { %11394 = vst [vmem:[#allocation23_spill] sm:$0xff] %v9600_v26  ;;  %v9604_v31 = vpack.c.bf16 %v233_v29, %v230_v28  ;;  %v229_v33 = vld [vmem:[#allocation9 + $0x60] sm:$0xff]  ;;  %v9607_v35 = vpack.c.bf16 %v136_v32, %v133_v30  ;;  %v140_v36 = vld [vmem:[#allocation6 + $0x98] sm:$0xff]  ;;  %v143_v37 = vld [vmem:[#allocation6 + $0xb0] sm:$0xff] }
  0x77   :  { %11395 = vst [vmem:[#allocation24_spill] sm:$0xff] %v9602_v27  ;;  %7174 = vmatpush1.bf16.msra.mxu1 %v9596_v22  ;;  %v236_v38 = vld [vmem:[#allocation9 + $0x98] sm:$0xff]  ;;  %v9611_v39 = vpack.c.bf16 %v232_v34, %v229_v33  ;;  %v9613_v40 = vpack.c.bf16 %v143_v37, %v140_v36  ;;  %v239_v41 = vld [vmem:[#allocation9 + $0xb0] sm:$0xff]  ;;  %v142_v43 = vld [vmem:[#allocation6 + $0xa8] sm:$0xff] }
  0x78   :  { %11396 = vst [vmem:[#allocation25_spill] sm:$0xff] %v9604_v31  ;;  %7230 = vmatpush1.bf16.msra.mxu0 %v9600_v26  ;;  %7176 = vmatprep.subr.bf16.mxu1 %v9602_v27  ;;  %v139_v42 = vld [vmem:[#allocation6 + $0x90] sm:$0xff]  ;;  %v9616_v44 = vpack.c.bf16 %v239_v41, %v236_v38  ;;  %v238_v46 = vld [vmem:[#allocation9 + $0xa8] sm:$0xff]  ;;  %v149_v48 = vld [vmem:[#allocation6 + $0xe0] sm:$0xff] }
  0x79   :  { %11397 = vst [vmem:[#allocation26_spill] sm:$0xff] %v9611_v39  ;;  %11398 = vst [vmem:[#allocation27_spill] sm:$0xff] %v9613_v40  ;;  %7232 = vmatprep.subr.bf16.mxu0 %v9604_v31  ;;  %v235_v45 = vld [vmem:[#allocation9 + $0x90] sm:$0xff]  ;;  %v146_v47 = vld [vmem:[#allocation6 + $0xc8] sm:$0xff]  ;;  %v9619_v51 = vpack.c.bf16 %v142_v43, %v139_v42 }
  0x7a   :  { %11399 = vst [vmem:[#allocation28_spill] sm:$0xff] %v9616_v44  ;;  %v242_v49 = vld [vmem:[#allocation9 + $0xc8] sm:$0xff]  ;;  %v245_v50 = vld [vmem:[#allocation9 + $0xe0] sm:$0xff]  ;;  %v9623_v52 = vpack.c.bf16 %v238_v46, %v235_v45  ;;  %v9625_v53 = vpack.c.bf16 %v149_v48, %v146_v47  ;;  %v148_v55 = vld [vmem:[#allocation6 + $0xd8] sm:$0xff] }
  0x7b   :  { %7178 = vmatpush1.bf16.msra.mxu1 %v9607_v35  ;;  %11400 = vst [vmem:[#allocation29_spill] sm:$0xff] %v9619_v51  ;;  %v145_v54 = vld [vmem:[#allocation6 + $0xc0] sm:$0xff]  ;;  %v9628_v57 = vpack.c.bf16 %v245_v50, %v242_v49  ;;  %v244_v58 = vld [vmem:[#allocation9 + $0xd8] sm:$0xff]  ;;  %v155_v60 = vld [vmem:[#allocation6 + $0x110] sm:$0xff] }
  0x7c   :  { %7234 = vmatpush1.bf16.msra.mxu0 %v9611_v39  ;;  %7180 = vmatprep.subr.bf16.mxu1 %v9613_v40  ;;  %11401 = vst [vmem:[#allocation30_spill] sm:$0xff] %v9623_v52  ;;  %11402 = vst [vmem:[#allocation31_spill] sm:$0xff] %v9625_v53  ;;  %v241_v56 = vld [vmem:[#allocation9 + $0xc0] sm:$0xff]  ;;  %v152_v59 = vld [vmem:[#allocation6 + $0xf8] sm:$0xff]  ;;  %v9631_v63 = vpack.c.bf16 %v148_v55, %v145_v54 }
  0x7d   :  { %7236 = vmatprep.subr.bf16.mxu0 %v9616_v44  ;;  %11403 = vst [vmem:[#allocation32_spill] sm:$0xff] %v9628_v57  ;;  %v248_v61 = vld [vmem:[#allocation9 + $0xf8] sm:$0xff]  ;;  %v251_v62 = vld [vmem:[#allocation9 + $0x110] sm:$0xff]  ;;  %v9635_v1 = vpack.c.bf16 %v244_v58, %v241_v56  ;;  %v9637_v2 = vpack.c.bf16 %v155_v60, %v152_v59  ;;  %v154_v5 = vld [vmem:[#allocation6 + $0x108] sm:$0xff] }
  0x7e   :  { %11404 = vst [vmem:[#allocation33_spill] sm:$0xff] %v9631_v63  ;;  %v151_v3 = vld [vmem:[#allocation6 + $0xf0] sm:$0xff]  ;;  %v9640_v7 = vpack.c.bf16 %v251_v62, %v248_v61  ;;  %v250_v10 = vld [vmem:[#allocation9 + $0x108] sm:$0xff]  ;;  %v161_v12 = vld [vmem:[#allocation6 + $0x140] sm:$0xff] }
  0x7f   :  { %7182 = vmatpush1.bf16.msra.mxu1 %v9619_v51  ;;  %11405 = vst [vmem:[#allocation34_spill] sm:$0xff] %v9635_v1  ;;  %11406 = vst [vmem:[#allocation35_spill] sm:$0xff] %v9637_v2  ;;  %v247_v6 = vld [vmem:[#allocation9 + $0xf0] sm:$0xff]  ;;  %v158_v11 = vld [vmem:[#allocation6 + $0x128] sm:$0xff]  ;;  %v9643_v16 = vpack.c.bf16 %v154_v5, %v151_v3  ;;  %v11301_v3 = vmov 0.0|0.0  }
  0x80   :  { %7238 = vmatpush1.bf16.msra.mxu0 %v9623_v52  ;;  %7184 = vmatprep.subr.bf16.mxu1 %v9625_v53  ;;  %11407 = vst [vmem:[#allocation36_spill] sm:$0xff] %v9640_v7  ;;  %v254_v14 = vld [vmem:[#allocation9 + $0x128] sm:$0xff]  ;;  %v257_v15 = vld [vmem:[#allocation9 + $0x140] sm:$0xff]  ;;  %v9647_v19 = vpack.c.bf16 %v250_v10, %v247_v6  ;;  %v9649_v20 = vpack.c.bf16 %v161_v12, %v158_v11  ;;  %v160_v23 = vld [vmem:[#allocation6 + $0x138] sm:$0xff] }
  0x81   :  { %7240 = vmatprep.subr.bf16.mxu0 %v9628_v57  ;;  %11408 = vst [vmem:[#allocation37_spill] sm:$0xff] %v9643_v16  ;;  %v157_v21 = vld [vmem:[#allocation6 + $0x120] sm:$0xff]  ;;  %v9652_v25 = vpack.c.bf16 %v257_v15, %v254_v14  ;;  %v256_v28 = vld [vmem:[#allocation9 + $0x138] sm:$0xff]  ;;  %v167_v30 = vld [vmem:[#allocation6 + $0x170] sm:$0xff] }
  0x82   :  { %11409 = vst [vmem:[#allocation38_spill] sm:$0xff] %v9647_v19  ;;  %11410 = vst [vmem:[#allocation39_spill] sm:$0xff] %v9649_v20  ;;  %v253_v24 = vld [vmem:[#allocation9 + $0x120] sm:$0xff]  ;;  %v164_v29 = vld [vmem:[#allocation6 + $0x158] sm:$0xff]  ;;  %v9655_v34 = vpack.c.bf16 %v160_v23, %v157_v21 }
  0x83   :  { %7186 = vmatpush1.bf16.msra.mxu1 %v9631_v63  ;;  %11411 = vst [vmem:[#allocation40_spill] sm:$0xff] %v9652_v25  ;;  %v260_v32 = vld [vmem:[#allocation9 + $0x158] sm:$0xff]  ;;  %v263_v33 = vld [vmem:[#allocation9 + $0x170] sm:$0xff]  ;;  %v9659_v36 = vpack.c.bf16 %v256_v28, %v253_v24  ;;  %v9661_v37 = vpack.c.bf16 %v167_v30, %v164_v29  ;;  %v166_v41 = vld [vmem:[#allocation6 + $0x168] sm:$0xff] }
  0x84   :  { %7242 = vmatpush1.bf16.msra.mxu0 %v9635_v1  ;;  %7188 = vmatprep.subr.bf16.mxu1 %v9637_v2  ;;  %11412 = vst [vmem:[#allocation41_spill] sm:$0xff] %v9655_v34  ;;  %v163_v38 = vld [vmem:[#allocation6 + $0x150] sm:$0xff]  ;;  %v9664_v42 = vpack.c.bf16 %v263_v33, %v260_v32  ;;  %v262_v45 = vld [vmem:[#allocation9 + $0x168] sm:$0xff]  ;;  %v173_v47 = vld [vmem:[#allocation8 + $0x20] sm:$0xff] }
  0x85   :  { %7244 = vmatprep.subr.bf16.mxu0 %v9640_v7  ;;  %11413 = vst [vmem:[#allocation42_spill] sm:$0xff] %v9659_v36  ;;  %11414 = vst [vmem:[#allocation43_spill] sm:$0xff] %v9661_v37  ;;  %v259_v43 = vld [vmem:[#allocation9 + $0x150] sm:$0xff]  ;;  %v170_v46 = vld [vmem:[#allocation8 + $0x8] sm:$0xff]  ;;  %v9667_v48 = vpack.c.bf16 %v166_v41, %v163_v38 }
  0x86   :  { %11415 = vst [vmem:[#allocation44_spill] sm:$0xff] %v9664_v42  ;;  %v9671_v49 = vpack.c.bf16 %v262_v45, %v259_v43  ;;  %v123_v50 = vld [vmem:[#allocation6 + $0x10] sm:$0xff]  ;;  %v126_v54 = vld [vmem:[#allocation6 + $0x28] sm:$0xff]  ;;  %v9674_v55 = vpack.c.bf16 %v173_v47, %v170_v46  ;;  %v169_v56 = vld [vmem:[#allocation8] sm:$0xff] }
  0x87   :  { %7190 = vmatpush1.bf16.msra.mxu1 %v9643_v16  ;;  %11416 = vst [vmem:[#allocation45_spill] sm:$0xff] %v9667_v48  ;;  %v172_v58 = vld [vmem:[#allocation8 + $0x18] sm:$0xff]  ;;  %v179_v60 = vld [vmem:[#allocation8 + $0x50] sm:$0xff]  ;;  %v9677_v61 = vld [vmem:[#allocation3] sm:$0xff]  ;;  %v9679_v62 = vpack.c.bf16 %v126_v54, %v123_v50 }
  0x88   :  { %7246 = vmatpush1.bf16.msra.mxu0 %v9647_v19  ;;  %7192 = vmatprep.subr.bf16.mxu1 %v9649_v20  ;;  %11417 = vst [vmem:[#allocation46_spill] sm:$0xff] %v9671_v49  ;;  %11418 = vst [vmem:[#allocation47_spill] sm:$0xff] %v9674_v55  ;;  %v176_v59 = vld [vmem:[#allocation8 + $0x38] sm:$0xff]  ;;  %v9685_v6 = vpack.c.bf16 %v172_v58, %v169_v56  ;;  %v129_v10 = vld [vmem:[#allocation6 + $0x40] sm:$0xff] }
  0x89   :  { %7248 = vmatprep.subr.bf16.mxu0 %v9652_v25  ;;  %v9683_v5 = vld [vmem:[#allocation3 + $0x38] sm:$0xff]  ;;  %v9688_v12 = vpack.c.bf16 %v179_v60, %v176_v59  ;;  %v175_v14 = vld [vmem:[#allocation8 + $0x30] sm:$0xff]  ;;  %v178_v15 = vld [vmem:[#allocation8 + $0x48] sm:$0xff] }
  0x8a   :  { %11419 = vst [vmem:[#allocation48_spill] sm:$0xff] %v9685_v6  ;;  %v132_v11 = vld [vmem:[#allocation6 + $0x58] sm:$0xff]  ;;  %v182_v21 = vld [vmem:[#allocation8 + $0x68] sm:$0xff]  ;;  %v185_v23 = vld [vmem:[#allocation8 + $0x80] sm:$0xff]  ;;  %v9697_v28 = vpack.c.bf16 %v178_v15, %v175_v14 }
  0x8b   :  { %7194 = vmatpush1.bf16.msra.mxu1 %v9655_v34  ;;  %11420 = vst [vmem:[#allocation49_spill] sm:$0xff] %v9688_v12  ;;  %v9693_v24 = vpack.c.bf16 %v132_v11, %v129_v10  ;;  %v135_v29 = vld [vmem:[#allocation6 + $0x70] sm:$0xff]  ;;  %v138_v30 = vld [vmem:[#allocation6 + $0x88] sm:$0xff]  ;;  %v9700_v32 = vpack.c.bf16 %v185_v23, %v182_v21  ;;  %v181_v33 = vld [vmem:[#allocation8 + $0x60] sm:$0xff] }
  0x8c   :  { %7250 = vmatpush1.bf16.msra.mxu0 %v9659_v36  ;;  %7196 = vmatprep.subr.bf16.mxu1 %v9661_v37  ;;  %11421 = vst [vmem:[#allocation50_spill] sm:$0xff] %v9697_v28  ;;  %v184_v38 = vld [vmem:[#allocation8 + $0x78] sm:$0xff]  ;;  %v191_v43 = vld [vmem:[#allocation8 + $0xb0] sm:$0xff]  ;;  %v9706_v45 = vpack.c.bf16 %v138_v30, %v135_v29  ;;  %v141_v47 = vld [vmem:[#allocation6 + $0xa0] sm:$0xff] }
  0x8d   :  { %7252 = vmatprep.subr.bf16.mxu0 %v9664_v42  ;;  %11422 = vst [vmem:[#allocation51_spill] sm:$0xff] %v9700_v32  ;;  %v188_v41 = vld [vmem:[#allocation8 + $0x98] sm:$0xff]  ;;  %v9710_v46 = vpack.c.bf16 %v184_v38, %v181_v33  ;;  %v187_v56 = vld [vmem:[#allocation8 + $0x90] sm:$0xff]  ;;  %v190_v58 = vld [vmem:[#allocation8 + $0xa8] sm:$0xff] }
  0x8e   :  { %v144_v50 = vld [vmem:[#allocation6 + $0xb8] sm:$0xff]  ;;  %v9713_v54 = vpack.c.bf16 %v191_v43, %v188_v41  ;;  %v194_v59 = vld [vmem:[#allocation8 + $0xc8] sm:$0xff]  ;;  %v197_v60 = vld [vmem:[#allocation8 + $0xe0] sm:$0xff]  ;;  %v9720_v11 = vpack.c.bf16 %v190_v58, %v187_v56 }
  0x8f   :  { %7198 = vmatpush1.bf16.msra.mxu1 %v9667_v48  ;;  %11423 = vst [vmem:[#allocation52_spill] sm:$0xff] %v9710_v46  ;;  %v9716_v10 = vpack.c.bf16 %v144_v50, %v141_v47  ;;  %v147_v14 = vld [vmem:[#allocation6 + $0xd0] sm:$0xff]  ;;  %v150_v15 = vld [vmem:[#allocation6 + $0xe8] sm:$0xff]  ;;  %v9723_v21 = vpack.c.bf16 %v197_v60, %v194_v59  ;;  %v193_v23 = vld [vmem:[#allocation8 + $0xc0] sm:$0xff] }
  0x90   :  { %7254 = vmatpush1.bf16.msra.mxu0 %v9671_v49  ;;  %7199 = vmatprep.subr.bf16.mxu1 %v11301_v3  ;;  %11424 = vst [vmem:[#allocation53_spill] sm:$0xff] %v9713_v54  ;;  %11426 = vst [vmem:[#allocation55_spill] sm:$0xff] %v9720_v11  ;;  %v196_v29 = vld [vmem:[#allocation8 + $0xd8] sm:$0xff]  ;;  %v203_v33 = vld [vmem:[#allocation8 + $0x110] sm:$0xff]  ;;  %v9726_v38 = vpack.c.bf16 %v150_v15, %v147_v14 }
  0x91   :  { %7280 = vmatprep.subr.bf16.mxu0 %v9674_v55  ;;  %11425 = vst [vmem:[#allocation54_spill] sm:$0xff] %v9716_v10  ;;  %11427 = vst [vmem:[#allocation56_spill] sm:$0xff] %v9723_v21  ;;  %v200_v30 = vld [vmem:[#allocation8 + $0xf8] sm:$0xff]  ;;  %v9730_v41 = vpack.c.bf16 %v196_v29, %v193_v23  ;;  %v153_v43 = vld [vmem:[#allocation6 + $0x100] sm:$0xff] }
  0x92   :  { %399 = vmatmul.mubr.f32.vlgmr.msra.gmra.mrb[0].mxu1 %v9677_v61  ;;  %11428 = vst [vmem:[#allocation57_spill] sm:$0xff] %v9726_v38  ;;  %v156_v47 = vld [vmem:[#allocation6 + $0x118] sm:$0xff]  ;;  %v9733_v50 = vpack.c.bf16 %v203_v33, %v200_v30  ;;  %v199_v56 = vld [vmem:[#allocation8 + $0xf0] sm:$0xff]  ;;  %v202_v58 = vld [vmem:[#allocation8 + $0x108] sm:$0xff] }
  0x93   :  { %7201 = vmatpush3.bf16.msra.mxu1 %v9679_v62  ;;  %558 = vmatmul.mubr.f32.vlgmr.msra.gmra.mrb[0].mxu0 %v9683_v5  ;;  %11429 = vst [vmem:[#allocation58_spill] sm:$0xff] %v9730_v41  ;;  %v206_v59 = vld [vmem:[#allocation8 + $0x128] sm:$0xff]  ;;  %v209_v60 = vld [vmem:[#allocation8 + $0x140] sm:$0xff]  ;;  %v9736_v14 = vpack.c.bf16 %v156_v47, %v153_v43  ;;  %v9740_v15 = vpack.c.bf16 %v202_v58, %v199_v56  ;;  %v159_v23 = vld [vmem:[#allocation6 + $0x130] sm:$0xff] }
  0x94   :  { %7282 = vmatpush1.bf16.msra.mxu0 %v9685_v6  ;;  %7202 = vmatprep.subr.bf16.mxu1 %v11301_v3  ;;  %11430 = vst [vmem:[#allocation59_spill] sm:$0xff] %v9733_v50  ;;  %v162_v29 = vld [vmem:[#allocation6 + $0x148] sm:$0xff]  ;;  %v9743_v30 = vpack.c.bf16 %v209_v60, %v206_v59  ;;  %v205_v33 = vld [vmem:[#allocation8 + $0x120] sm:$0xff]  ;;  %v168_v58 = vld [vmem:[#allocation6 + $0x178] sm:$0xff] }
  0x95   :  { %7284 = vmatprep.subr.bf16.mxu0 %v9688_v12  ;;  %6079 = vmatprep.mubr.msk.f32.mxu1 %vm9429_vm0, %v11207_v0  ;;  %11431 = vst [vmem:[#allocation60_spill] sm:$0xff] %v9736_v14  ;;  %11432 = vst [vmem:[#allocation61_spill] sm:$0xff] %v9740_v15  ;;  %v9746_v43 = vpack.c.bf16 %v162_v29, %v159_v23  ;;  %v165_v56 = vld [vmem:[#allocation6 + $0x160] sm:$0xff]  ;;  %v211_v60 = vld [vmem:[#allocation8 + $0x150] sm:$0xff] }
  0x96   :  { %698 = vmatprep.mubr.f32.mxu0 %v11207_v0  ;;  %11433 = vst [vmem:[#allocation62_spill] sm:$0xff] %v9743_v30  ;;  %v208_v0 = vld [vmem:[#allocation8 + $0x138] sm:$0xff]  ;;  %v9756_v23 = vpack.c.bf16 %v168_v58, %v165_v56  ;;  %v219_v29 = vld [vmem:[#allocation9 + $0x10] sm:$0xff]  ;;  %v225_v58 = vld [vmem:[#allocation9 + $0x40] sm:$0xff] }
  0x97   :  { %7204 = vmatpush3.bf16.msra.mxu1 %v9693_v24  ;;  %11434 = vst [vmem:[#allocation63_spill] sm:$0xff] %v9746_v43  ;;  %v9750_v47 = vpack.c.bf16 %v208_v0, %v205_v33  ;;  %v222_v33 = vld [vmem:[#allocation9 + $0x28] sm:$0xff]  ;;  %v293_v12 = vld [vmem:[#allocation11 + $0xe0] sm:$0xff]  ;;  %v299_v6 = vld [vmem:[#allocation11 + $0x110] sm:$0xff] }
  0x98   :  { %7286 = vmatpush1.bf16.msra.mxu0 %v9697_v28  ;;  %7205 = vmatprep.subr.bf16.mxu1 %v11301_v3  ;;  %11437 = vst [vmem:[#allocation66_spill] sm:$0xff] %v9756_v23  ;;  %v9766_v56 = vpack.c.bf16 %v222_v33, %v219_v29  ;;  %v11443_v29 = vmov 0.0   ;;  %v290_v28 = vld [vmem:[#allocation11 + $0xc8] sm:$0xff] }
  0x99   :  { %7288 = vmatprep.subr.bf16.mxu0 %v9700_v32  ;;  %11435 = vst [vmem:[#allocation64_spill] sm:$0xff] %v9750_v47  ;;  %v281_v32 = vld [vmem:[#allocation11 + $0x80] sm:$0xff] }
  0x9a   :  { %11440 = vst [vmem:[#allocation69_spill] sm:$0xff] %v9766_v56 }
  0x9b   :  { %7207 = vmatpush3.bf16.msra.mxu1 %v9706_v45 }
  0x9c   :  { %7290 = vmatpush1.bf16.msra.mxu0 %v9710_v46  ;;  %7208 = vmatprep.subr.bf16.mxu1 %v11301_v3  ;;  %v275_v46 = vld [vmem:[#allocation11 + $0x50] sm:$0xff] }
  0x9d   :  { %7292 = vmatprep.subr.bf16.mxu0 %v9713_v54  ;;  %v269_v54 = vld [vmem:[#allocation11 + $0x20] sm:$0xff] }
  0x9f   :  { %7210 = vmatpush3.bf16.msra.mxu1 %v9716_v10 }
  0xa0   :  { %7294 = vmatpush1.bf16.msra.mxu0 %v9720_v11  ;;  %7211 = vmatprep.subr.bf16.mxu1 %v11301_v3  ;;  %v215_v11 = vld [vmem:[#allocation8 + $0x170] sm:$0xff] }
  0xa1   :  { %7296 = vmatprep.subr.bf16.mxu0 %v9723_v21  ;;  %v212_v21 = vld [vmem:[#allocation8 + $0x158] sm:$0xff] }
  0xa2   :  { %v9753_v59 = vpack.c.bf16 %v215_v11, %v212_v21  ;;  %v265_v21 = vld [vmem:[#allocation11] sm:$0xff] }
  0xa3   :  { %7213 = vmatpush3.bf16.msra.mxu1 %v9726_v38 }
  0xa4   :  { %7298 = vmatpush1.bf16.msra.mxu0 %v9730_v41  ;;  %7214 = vmatprep.subr.bf16.mxu1 %v11301_v3  ;;  %11436 = vst [vmem:[#allocation65_spill] sm:$0xff] %v9753_v59  ;;  %v266_v41 = vld [vmem:[#allocation11 + $0x8] sm:$0xff] }
  0xa5   :  { %7300 = vmatprep.subr.bf16.mxu0 %v9733_v50  ;;  %v214_v50 = vld [vmem:[#allocation8 + $0x168] sm:$0xff]  ;;  %v9763_v11 = vpack.c.bf16 %v269_v54, %v266_v41  ;;  %v271_v41 = vld [vmem:[#allocation11 + $0x30] sm:$0xff] }
  0xa6   :  { %v9760_v0 = vpack.c.bf16 %v214_v50, %v211_v60  ;;  %v228_v60 = vld [vmem:[#allocation9 + $0x58] sm:$0xff] }
  0xa7   :  { %7216 = vmatpush3.bf16.msra.mxu1 %v9736_v14  ;;  %11439 = vst [vmem:[#allocation68_spill] sm:$0xff] %v9763_v11  ;;  %v9778_v33 = vpack.c.bf16 %v228_v60, %v225_v58  ;;  %v287_v58 = vld [vmem:[#allocation11 + $0xb0] sm:$0xff] }
  0xa8   :  { %7302 = vmatpush1.bf16.msra.mxu0 %v9740_v15  ;;  %7217 = vmatprep.subr.bf16.mxu1 %v11301_v3  ;;  %11438 = vst [vmem:[#allocation67_spill] sm:$0xff] %v9760_v0  ;;  %v272_v15 = vld [vmem:[#allocation11 + $0x38] sm:$0xff] }
  0xa9   :  { %7304 = vmatprep.subr.bf16.mxu0 %v9743_v30  ;;  %v268_v30 = vld [vmem:[#allocation11 + $0x18] sm:$0xff]  ;;  %v9773_v54 = vpack.c.bf16 %v275_v46, %v272_v15  ;;  %11444 = vst [vmem:[#allocation72_spill] sm:$0xff] %v9778_v33  ;;  %v231_v46 = vld [vmem:[#allocation9 + $0x70] sm:$0xff]  ;;  %v234_v15 = vld [vmem:[#allocation9 + $0x88] sm:$0xff] }
  0xaa   :  { %v9770_v50 = vpack.c.bf16 %v268_v30, %v265_v21  ;;  %v9791_v60 = vpack.c.bf16 %v234_v15, %v231_v46  ;;  %v243_v15 = vld [vmem:[#allocation9 + $0xd0] sm:$0xff] }
  0xab   :  { %7219 = vmatpush3.bf16.msra.mxu1 %v9746_v43  ;;  %11442 = vst [vmem:[#allocation71_spill] sm:$0xff] %v9773_v54 }
  0xac   :  { %7306 = vmatpush1.bf16.msra.mxu0 %v9750_v47  ;;  %7220 = vmatprep.subr.bf16.mxu1 %v11301_v3  ;;  %11441 = vst [vmem:[#allocation70_spill] sm:$0xff] %v9770_v50  ;;  %v278_v47 = vld [vmem:[#allocation11 + $0x68] sm:$0xff]  ;;  %11447 = vst [vmem:[#allocation75_spill] sm:$0xff] %v9791_v60 }
  0xad   :  { %7308 = vmatprep.subr.bf16.mxu0 %v9753_v59  ;;  %v274_v59 = vld [vmem:[#allocation11 + $0x48] sm:$0xff]  ;;  %v9785_v21 = vpack.c.bf16 %v281_v32, %v278_v47  ;;  %v237_v32 = vld [vmem:[#allocation9 + $0xa0] sm:$0xff]  ;;  %v240_v47 = vld [vmem:[#allocation9 + $0xb8] sm:$0xff] }
  0xae   :  { %v9782_v30 = vpack.c.bf16 %v274_v59, %v271_v41  ;;  %v9801_v46 = vpack.c.bf16 %v240_v47, %v237_v32  ;;  %v252_v47 = vld [vmem:[#allocation9 + $0x118] sm:$0xff] }
  0xaf   :  { %7222 = vmatpush3.bf16.msra.mxu1 %v9756_v23  ;;  %11446 = vst [vmem:[#allocation74_spill] sm:$0xff] %v9785_v21 }
  0xb0   :  { %7310 = vmatpush1.bf16.msra.mxu0 %v9760_v0  ;;  %7255 = vmatprep.subr.bf16.mxu1 %v11301_v3  ;;  %11445 = vst [vmem:[#allocation73_spill] sm:$0xff] %v9782_v30  ;;  %v284_v0 = vld [vmem:[#allocation11 + $0x98] sm:$0xff]  ;;  %11450 = vst [vmem:[#allocation78_spill] sm:$0xff] %v9801_v46 }
  0xb1   :  { %7336 = vmatprep.subr.bf16.mxu0 %v9763_v11  ;;  %v280_v11 = vld [vmem:[#allocation11 + $0x78] sm:$0xff]  ;;  %v9798_v41 = vpack.c.bf16 %v287_v58, %v284_v0  ;;  %v9808_v0 = vpack.c.bf16 %v293_v12, %v290_v28  ;;  %v289_v58 = vld [vmem:[#allocation11 + $0xc0] sm:$0xff]  ;;  %v295_v28 = vld [vmem:[#allocation11 + $0xf0] sm:$0xff] }
  0xb2   :  { %6080 = vmatmul.mubr.f32.vlgmr.msra.gmra.mrb[2].mxu1 %v9677_v61  ;;  %v277_v61 = vld [vmem:[#allocation11 + $0x60] sm:$0xff] }
  0xb3   :  { %699 = vmatmul.mubr.f32.vlgmr.msra.gmra.mrb[2].mxu0 %v11443_v29  ;;  %7257 = vmatpush3.bf16.msra.mxu1 %v9766_v56  ;;  %v9795_v59 = vpack.c.bf16 %v280_v11, %v277_v61  ;;  %11449 = vst [vmem:[#allocation77_spill] sm:$0xff] %v9798_v41  ;;  %v246_v61 = vld [vmem:[#allocation9 + $0xe8] sm:$0xff]  ;;  %11452 = vst [vmem:[#allocation80_spill] sm:$0xff] %v9808_v0 }
  0xb4   :  { %7338 = vmatpush1.bf16.msra.mxu0 %v9770_v50  ;;  %7258 = vmatprep.subr.bf16.mxu1 %v11301_v3  ;;  %v286_v50 = vld [vmem:[#allocation11 + $0xa8] sm:$0xff]  ;;  %v9811_v32 = vpack.c.bf16 %v246_v61, %v243_v15  ;;  %v255_v61 = vld [vmem:[#allocation9 + $0x130] sm:$0xff] }
  0xb5   :  { %7340 = vmatprep.subr.bf16.mxu0 %v9773_v54  ;;  %6114 = vmatprep.mubr.msk.f32.mxu1 %vm9429_vm0, %v11443_v29  ;;  %11448 = vst [vmem:[#allocation76_spill] sm:$0xff] %v9795_v59  ;;  %v283_v54 = vld [vmem:[#allocation11 + $0x90] sm:$0xff] }
  0xb6   :  { %839 = vmatprep.mubr.f32.mxu0 %v11443_v29  ;;  %v9805_v11 = vpack.c.bf16 %v286_v50, %v283_v54  ;;  %11453 = vst [vmem:[#allocation81_spill] sm:$0xff] %v9811_v32  ;;  %v249_v54 = vld [vmem:[#allocation9 + $0x100] sm:$0xff] }
  0xb7   :  { %7260 = vmatpush3.bf16.msra.mxu1 %v9778_v33  ;;  %v9821_v15 = vpack.c.bf16 %v252_v47, %v249_v54  ;;  %v261_v47 = vld [vmem:[#allocation9 + $0x160] sm:$0xff] }
  0xb8   :  { %7342 = vmatpush1.bf16.msra.mxu0 %v9782_v30  ;;  %7261 = vmatprep.subr.bf16.mxu1 %v11301_v3  ;;  %11451 = vst [vmem:[#allocation79_spill] sm:$0xff] %v9805_v11  ;;  %v296_v30 = vld [vmem:[#allocation11 + $0xf8] sm:$0xff] }
  0xb9   :  { %7344 = vmatprep.subr.bf16.mxu0 %v9785_v21  ;;  %v292_v21 = vld [vmem:[#allocation11 + $0xd8] sm:$0xff]  ;;  %v9818_v12 = vpack.c.bf16 %v299_v6, %v296_v30  ;;  %11456 = vst [vmem:[#allocation84_spill] sm:$0xff] %v9821_v15  ;;  %v301_v30 = vld [vmem:[#allocation11 + $0x120] sm:$0xff] }
  0xba   :  { %v9815_v50 = vpack.c.bf16 %v292_v21, %v289_v58  ;;  %v258_v58 = vld [vmem:[#allocation9 + $0x148] sm:$0xff] }
  0xbb   :  { %7263 = vmatpush3.bf16.msra.mxu1 %v9791_v60  ;;  %11455 = vst [vmem:[#allocation83_spill] sm:$0xff] %v9818_v12  ;;  %v305_v60 = vld [vmem:[#allocation11 + $0x140] sm:$0xff]  ;;  %v9831_v54 = vpack.c.bf16 %v258_v58, %v255_v61  ;;  %v174_v58 = vld [vmem:[#allocation8 + $0x28] sm:$0xff] }
  0xbc   :  { %7346 = vmatpush1.bf16.msra.mxu0 %v9795_v59  ;;  %7264 = vmatprep.subr.bf16.mxu1 %v11301_v3  ;;  %11454 = vst [vmem:[#allocation82_spill] sm:$0xff] %v9815_v50  ;;  %v302_v59 = vld [vmem:[#allocation11 + $0x128] sm:$0xff] }
  0xbd   :  { %7348 = vmatprep.subr.bf16.mxu0 %v9798_v41  ;;  %v298_v41 = vld [vmem:[#allocation11 + $0x108] sm:$0xff]  ;;  %v9828_v6 = vpack.c.bf16 %v305_v60, %v302_v59  ;;  %11457 = vst [vmem:[#allocation85_spill] sm:$0xff] %v9831_v54  ;;  %v307_v59 = vld [vmem:[#allocation11 + $0x150] sm:$0xff] }
  0xbe   :  { %v9825_v21 = vpack.c.bf16 %v298_v41, %v295_v28  ;;  %v264_v28 = vld [vmem:[#allocation9 + $0x178] sm:$0xff] }
  0xbf   :  { %7266 = vmatpush3.bf16.msra.mxu1 %v9801_v46  ;;  %v311_v46 = vld [vmem:[#allocation11 + $0x170] sm:$0xff] }
  0xc0   :  { %7350 = vmatpush1.bf16.msra.mxu0 %v9805_v11  ;;  %7267 = vmatprep.subr.bf16.mxu1 %v11301_v3  ;;  %v308_v11 = vld [vmem:[#allocation11 + $0x158] sm:$0xff] }
  0xc1   :  { %7352 = vmatprep.subr.bf16.mxu0 %v9808_v0  ;;  %v304_v0 = vld [vmem:[#allocation11 + $0x138] sm:$0xff]  ;;  %v9838_v60 = vpack.c.bf16 %v311_v46, %v308_v11  ;;  %v177_v11 = vld [vmem:[#allocation8 + $0x40] sm:$0xff] }
  0xc2   :  { %v9835_v41 = vpack.c.bf16 %v304_v0, %v301_v30  ;;  %v171_v0 = vld [vmem:[#allocation8 + $0x10] sm:$0xff]  ;;  %v180_v30 = vld [vmem:[#allocation8 + $0x58] sm:$0xff] }
  0xc3   :  { %7269 = vmatpush3.bf16.msra.mxu1 %v9811_v32  ;;  %v9849_v46 = vpack.c.bf16 %v174_v58, %v171_v0  ;;  %v192_v0 = vld [vmem:[#allocation8 + $0xb8] sm:$0xff] }
  0xc4   :  { %7354 = vmatpush1.bf16.msra.mxu0 %v9815_v50  ;;  %7270 = vmatprep.subr.bf16.mxu1 %v11301_v3  ;;  %v9841_v50 = vpack.c.bf16 %v264_v28, %v261_v47  ;;  %v183_v47 = vld [vmem:[#allocation8 + $0x70] sm:$0xff]  ;;  %v186_v28 = vld [vmem:[#allocation8 + $0x88] sm:$0xff] }
  0xc5   :  { %7356 = vmatprep.subr.bf16.mxu0 %v9818_v12  ;;  %v310_v12 = vld [vmem:[#allocation11 + $0x168] sm:$0xff]  ;;  %11459 = vst [vmem:[#allocation87_spill] sm:$0xff] %v9849_v46 }
  0xc6   :  { %11458 = vst [vmem:[#allocation86_spill] sm:$0xff] %v9841_v50  ;;  %v9845_v61 = vpack.c.bf16 %v310_v12, %v307_v59  ;;  %v9857_v12 = vpack.c.bf16 %v180_v30, %v177_v11  ;;  %v189_v59 = vld [vmem:[#allocation8 + $0xa0] sm:$0xff]  ;;  %v195_v11 = vld [vmem:[#allocation8 + $0xd0] sm:$0xff]  ;;  %v198_v30 = vld [vmem:[#allocation8 + $0xe8] sm:$0xff] }
  0xc7   :  { %7272 = vmatpush3.bf16.msra.mxu1 %v9821_v15  ;;  %v9872_v58 = vpack.c.bf16 %v192_v0, %v189_v59  ;;  %v207_v0 = vld [vmem:[#allocation8 + $0x130] sm:$0xff] }
  0xc8   :  { %7358 = vmatpush1.bf16.msra.mxu0 %v9825_v21  ;;  %7273 = vmatprep.subr.bf16.mxu1 %v11301_v3  ;;  %11460 = vst [vmem:[#allocation88_spill] sm:$0xff] %v9857_v12 }
  0xc9   :  { %7360 = vmatprep.subr.bf16.mxu0 %v9828_v6  ;;  %11462 = vst [vmem:[#allocation90_spill] sm:$0xff] %v9872_v58 }
  0xcb   :  { %7275 = vmatpush3.bf16.msra.mxu1 %v9831_v54 }
  0xcc   :  { %7362 = vmatpush1.bf16.msra.mxu0 %v9835_v41  ;;  %7276 = vmatprep.subr.bf16.mxu1 %v11301_v3 }
  0xcd   :  { %7364 = vmatprep.subr.bf16.mxu0 %v9838_v60 }
  0xcf   :  { %7278 = vmatpush3.bf16.msra.mxu1 %v9841_v50 }
  0xd0   :  { %7366 = vmatpush1.bf16.msra.mxu0 %v9845_v61  ;;  %7311 = vmatprep.subr.bf16.mxu1 %v11301_v3 }
  0xd1   :  { %7392 = vmatprep.subr.bf16.mxu0 %v9580_v4 }
  0xd2   :  { %6115 = vmatmul.mubr.f32.vlgmr.msra.gmra.mrb[4].mxu1 %v9683_v5  ;;  %v9866_v5 = vpack.c.bf16 %v186_v28, %v183_v47  ;;  %v9878_v47 = vpack.c.bf16 %v198_v30, %v195_v11  ;;  %v201_v28 = vld [vmem:[#allocation8 + $0x100] sm:$0xff] }
  0xd3   :  { %840 = vmatmul.mubr.f32.vlgmr.msra.gmra.mrb[0].mxu0 %v11443_v29  ;;  %7313 = vmatpush3.bf16.msra.mxu1 %v9849_v46  ;;  %v213_v30 = vld [vmem:[#allocation8 + $0x160] sm:$0xff] }
  0xd4   :  { %7314 = vmatprep.subr.bf16.mxu1 %v11301_v3  ;;  %6149 = vmatprep.mubr.msk.f32.mxu1 %vm9429_vm0, %v11443_v29  ;;  %11461 = vst [vmem:[#allocation89_spill] sm:$0xff] %v9866_v5  ;;  %11463 = vst [vmem:[#allocation91_spill] sm:$0xff] %v9878_v47 }
  0xd5   :  { %7394 = vmatpush1.bf16.msra.mxu0 %v9584_v9  ;;  %1033 = vmatprep.mubr.f32.mxu0 %v11443_v29 }
  0xd6   :  { %7396 = vmatprep.subr.bf16.mxu0 %v9591_v17 }
  0xd7   :  { %7316 = vmatpush3.bf16.msra.mxu1 %v9857_v12 }
  0xd8   :  { %7317 = vmatprep.subr.bf16.mxu1 %v11301_v3 }
  0xd9   :  { %7398 = vmatpush1.bf16.msra.mxu0 %v9596_v22 }
  0xda   :  { %7400 = vmatprep.subr.bf16.mxu0 %v9602_v27  ;;  %v204_v27 = vld [vmem:[#allocation8 + $0x118] sm:$0xff] }
  0xdb   :  { %7319 = vmatpush3.bf16.msra.mxu1 %v9866_v5  ;;  %v9884_v59 = vpack.c.bf16 %v204_v27, %v201_v28  ;;  %v267_v28 = vld [vmem:[#allocation11 + $0x10] sm:$0xff] }
  0xdc   :  { %7320 = vmatprep.subr.bf16.mxu1 %v11301_v3 }
  0xdd   :  { %7402 = vmatpush1.bf16.msra.mxu0 %v9607_v35  ;;  %11464 = vst [vmem:[#allocation92_spill] sm:$0xff] %v9884_v59 }
  0xde   :  { %7404 = vmatprep.subr.bf16.mxu0 %v9613_v40  ;;  %v210_v40 = vld [vmem:[#allocation8 + $0x148] sm:$0xff] }
  0xdf   :  { %7322 = vmatpush3.bf16.msra.mxu1 %v9872_v58  ;;  %v9890_v11 = vpack.c.bf16 %v210_v40, %v207_v0  ;;  %v273_v0 = vld [vmem:[#allocation11 + $0x40] sm:$0xff] }
  0xe0   :  { %7323 = vmatprep.subr.bf16.mxu1 %v11301_v3 }
  0xe1   :  { %7406 = vmatpush1.bf16.msra.mxu0 %v9619_v51  ;;  %11465 = vst [vmem:[#allocation93_spill] sm:$0xff] %v9890_v11 }
  0xe2   :  { %7408 = vmatprep.subr.bf16.mxu0 %v9625_v53  ;;  %v216_v53 = vld [vmem:[#allocation8 + $0x178] sm:$0xff] }
  0xe3   :  { %7325 = vmatpush3.bf16.msra.mxu1 %v9878_v47  ;;  %v9896_v27 = vpack.c.bf16 %v216_v53, %v213_v30  ;;  %v282_v30 = vld [vmem:[#allocation11 + $0x88] sm:$0xff] }
  0xe4   :  { %7326 = vmatprep.subr.bf16.mxu1 %v11301_v3 }
  0xe5   :  { %7410 = vmatpush1.bf16.msra.mxu0 %v9631_v63  ;;  %11466 = vst [vmem:[#allocation94_spill] sm:$0xff] %v9896_v27 }
  0xe6   :  { %7412 = vmatprep.subr.bf16.mxu0 %v9637_v2  ;;  %v270_v2 = vld [vmem:[#allocation11 + $0x28] sm:$0xff] }
  0xe7   :  { %7328 = vmatpush3.bf16.msra.mxu1 %v9884_v59  ;;  %v9902_v40 = vpack.c.bf16 %v270_v2, %v267_v28  ;;  %v279_v2 = vld [vmem:[#allocation11 + $0x70] sm:$0xff] }
  0xe8   :  { %7329 = vmatprep.subr.bf16.mxu1 %v11301_v3  ;;  %v9915_v28 = vpack.c.bf16 %v282_v30, %v279_v2  ;;  %v297_v2 = vld [vmem:[#allocation11 + $0x100] sm:$0xff]  ;;  %v300_v30 = vld [vmem:[#allocation11 + $0x118] sm:$0xff] }
  0xe9   :  { %7414 = vmatpush1.bf16.msra.mxu0 %v9643_v16  ;;  %v9927_v16 = vpack.c.bf16 %v300_v30, %v297_v2  ;;  %v968_v2 = vld [vmem:[#allocation3 + $0x8] sm:$0xff]  ;;  %v11468_v30 = vld [vmem:[#allocation75_spill] sm:$0xff] }
  0xea   :  { %7416 = vmatprep.subr.bf16.mxu0 %v9649_v20  ;;  %v276_v20 = vld [vmem:[#allocation11 + $0x58] sm:$0xff]  ;;  %11467 = vst [vmem:[#allocation95_spill] sm:$0xff] %v9915_v28 }
  0xeb   :  { %7331 = vmatpush3.bf16.msra.mxu1 %v9890_v11  ;;  %v9909_v53 = vpack.c.bf16 %v276_v20, %v273_v0  ;;  %v291_v20 = vld [vmem:[#allocation11 + $0xd0] sm:$0xff]  ;;  %v294_v0 = vld [vmem:[#allocation11 + $0xe8] sm:$0xff] }
  0xec   :  { %7332 = vmatprep.subr.bf16.mxu1 %v11301_v3 }
  0xed   :  { %7418 = vmatpush1.bf16.msra.mxu0 %v9655_v34  ;;  %v9923_v34 = vpack.c.bf16 %v294_v0, %v291_v20  ;;  %v309_v20 = vld [vmem:[#allocation11 + $0x160] sm:$0xff]  ;;  %v312_v0 = vld [vmem:[#allocation11 + $0x178] sm:$0xff] }
  0xee   :  { %7420 = vmatprep.subr.bf16.mxu0 %v9661_v37  ;;  %v288_v37 = vld [vmem:[#allocation11 + $0xb8] sm:$0xff]  ;;  %v9935_v51 = vpack.c.bf16 %v312_v0, %v309_v20  ;;  %v11470_v20 = vld [vmem:[#allocation49_spill] sm:$0xff]  ;;  %v11471_v0 = vld [vmem:[#allocation78_spill] sm:$0xff] }
  0xef   :  { %7334 = vmatpush3.bf16.msra.mxu1 %v9896_v27 }
  0xf0   :  { %7367 = vmatprep.subr.bf16.mxu1 %v11301_v3 }
  0xf1   :  { %7422 = vmatpush1.bf16.msra.mxu0 %v9667_v48  ;;  %v285_v48 = vld [vmem:[#allocation11 + $0xa0] sm:$0xff] }
  0xf2   :  { %6150 = vmatmul.mubr.f32.vlgmr.msra.gmra.mrb[6].mxu1 %v11443_v29  ;;  %7448 = vmatprep.subr.bf16.mxu0 %v9582_v8  ;;  %v9919_v8 = vpack.c.bf16 %v288_v37, %v285_v48  ;;  %v303_v37 = vld [vmem:[#allocation11 + $0x130] sm:$0xff]  ;;  %v306_v48 = vld [vmem:[#allocation11 + $0x148] sm:$0xff] }
  0xf3   :  { %7369 = vmatpush3.bf16.msra.mxu1 %v9902_v40  ;;  %6184 = vmatprep.mubr.msk.f32.mxu1 %vm9429_vm0, %v11443_v29  ;;  %v9931_v63 = vpack.c.bf16 %v306_v48, %v303_v37  ;;  %v1111_v37 = vld [vmem:[#allocation3 + $0x30] sm:$0xff]  ;;  %v11469_v48 = vld [vmem:[#allocation48_spill] sm:$0xff] }
  0xf4   :  { %7370 = vmatprep.subr.bf16.mxu1 %v11301_v3  ;;  %1034 = vmatmul.mubr.f32.vlgmr.msra.gmra.mrb[4].mxu0 %v968_v2 }
  0xf5   :  { %7450 = vmatpush1.bf16.msra.mxu0 %v9587_v13  ;;  %1176 = vmatprep.mubr.f32.mxu0 %v11443_v29 }
  0xf6   :  { %7452 = vmatprep.subr.bf16.mxu0 %v9593_v18 }
  0xf7   :  { %7372 = vmatpush3.bf16.msra.mxu1 %v9909_v53 }
  0xf8   :  { %7373 = vmatprep.subr.bf16.mxu1 %v11301_v3 }
  0xf9   :  { %7454 = vmatpush1.bf16.msra.mxu0 %v9600_v26 }
  0xfa   :  { %7456 = vmatprep.subr.bf16.mxu0 %v9604_v31 }
  0xfb   :  { %7375 = vmatpush3.bf16.msra.mxu1 %v9915_v28 }
  0xfc   :  { %7376 = vmatprep.subr.bf16.mxu1 %v11301_v3 }
  0xfd   :  { %7458 = vmatpush1.bf16.msra.mxu0 %v9611_v39 }
  0xfe   :  { %7460 = vmatprep.subr.bf16.mxu0 %v9616_v44 }
  0xff   :  { %7378 = vmatpush3.bf16.msra.mxu1 %v9919_v8 }
 0x100   :  { %7379 = vmatprep.subr.bf16.mxu1 %v11301_v3 }
 0x101   :  { %7462 = vmatpush1.bf16.msra.mxu0 %v9623_v52 }
 0x102   :  { %7464 = vmatprep.subr.bf16.mxu0 %v9628_v57 }
 0x103   :  { %7381 = vmatpush3.bf16.msra.mxu1 %v9923_v34 }
 0x104   :  { %7382 = vmatprep.subr.bf16.mxu1 %v11301_v3 }
 0x105   :  { %7466 = vmatpush1.bf16.msra.mxu0 %v9635_v1 }
 0x106   :  { %7468 = vmatprep.subr.bf16.mxu0 %v9640_v7 }
 0x107   :  { %7384 = vmatpush3.bf16.msra.mxu1 %v9927_v16 }
 0x108   :  { %7385 = vmatprep.subr.bf16.mxu1 %v11301_v3 }
 0x109   :  { %7470 = vmatpush1.bf16.msra.mxu0 %v9647_v19 }
 0x10a   :  { %7472 = vmatprep.subr.bf16.mxu0 %v9652_v25 }
 0x10b   :  { %7387 = vmatpush3.bf16.msra.mxu1 %v9931_v63 }
 0x10c   :  { %7388 = vmatprep.subr.bf16.mxu1 %v11301_v3 }
 0x10d   :  { %7474 = vmatpush1.bf16.msra.mxu0 %v9659_v36 }
 0x10e   :  { %7476 = vmatprep.subr.bf16.mxu0 %v9664_v42  ;;  %v11475_v42 = vld [vmem:[#allocation53_spill] sm:$0xff] }
 0x10f   :  { %7390 = vmatpush3.bf16.msra.mxu1 %v9935_v51 }
 0x110   :  { %7423 = vmatprep.subr.bf16.mxu1 %v11301_v3 }
 0x111   :  { %7478 = vmatpush1.bf16.msra.mxu0 %v9671_v49  ;;  %v11473_v49 = vld [vmem:[#allocation51_spill] sm:$0xff] }
 0x112   :  { %6185 = vmatmul.mubr.f32.vlgmr.msra.gmra.mrb[8].mxu1 %v11443_v29  ;;  %7504 = vmatprep.subr.bf16.mxu0 %v9674_v55  ;;  %v11474_v55 = vld [vmem:[#allocation52_spill] sm:$0xff] }
 0x113   :  { %7425 = vmatpush3.bf16.msra.mxu1 %v9679_v62  ;;  %6219 = vmatprep.mubr.msk.f32.mxu1 %vm9429_vm0, %v11443_v29 }
 0x114   :  { %7426 = vmatprep.subr.bf16.mxu1 %v11301_v3  ;;  %1177 = vmatmul.mubr.f32.vlgmr.msra.gmra.mrb[6].mxu0 %v1111_v37 }
 0x115   :  { %7506 = vmatpush1.bf16.msra.mxu0 %v11469_v48  ;;  %1317 = vmatprep.mubr.f32.mxu0 %v11443_v29  ;;  %v11477_v48 = vld [vmem:[#allocation56_spill] sm:$0xff] }
 0x116   :  { %7508 = vmatprep.subr.bf16.mxu0 %v11470_v20  ;;  %v11476_v20 = vld [vmem:[#allocation55_spill] sm:$0xff] }
 0x117   :  { %7428 = vmatpush3.bf16.msra.mxu1 %v9693_v24 }
 0x118   :  { %7429 = vmatprep.subr.bf16.mxu1 %v11301_v3 }
 0x11b   :  { %7431 = vmatpush3.bf16.msra.mxu1 %v9706_v45 }
 0x11c   :  { %7432 = vmatprep.subr.bf16.mxu1 %v11301_v3 }
 0x11f   :  { %7434 = vmatpush3.bf16.msra.mxu1 %v9716_v10 }
 0x120   :  { %7435 = vmatprep.subr.bf16.mxu1 %v11301_v3 }
 0x123   :  { %7437 = vmatpush3.bf16.msra.mxu1 %v9726_v38 }
 0x124   :  { %7438 = vmatprep.subr.bf16.mxu1 %v11301_v3 }
 0x127   :  { %7440 = vmatpush3.bf16.msra.mxu1 %v9736_v14 }
 0x128   :  { %7441 = vmatprep.subr.bf16.mxu1 %v11301_v3 }
 0x12b   :  { %7443 = vmatpush3.bf16.msra.mxu1 %v9746_v43 }
 0x12c   :  { %7444 = vmatprep.subr.bf16.mxu1 %v11301_v3 }
 0x12f   :  { %7446 = vmatpush3.bf16.msra.mxu1 %v9756_v23 }
 0x130   :  { %7479 = vmatprep.subr.bf16.mxu1 %v11301_v3 }
 0x132   :  { %6220 = vmatmul.mubr.f32.vlgmr.msra.gmra.mrb[10].mxu1 %v968_v2  ;;  %v11472_v2 = vld [vmem:[#allocation50_spill] sm:$0xff] }
 0x133   :  { %7481 = vmatpush3.bf16.msra.mxu1 %v9766_v56  ;;  %6254 = vmatprep.mubr.msk.f32.mxu1 %vm9429_vm0, %v11443_v29 }
 0x134   :  { %7482 = vmatprep.subr.bf16.mxu1 %v11301_v3  ;;  %7510 = vmatpush1.bf16.msra.mxu0 %v11472_v2  ;;  %v11479_v2 = vld [vmem:[#allocation59_spill] sm:$0xff] }
 0x135   :  { %7512 = vmatprep.subr.bf16.mxu0 %v11473_v49  ;;  %v11478_v49 = vld [vmem:[#allocation58_spill] sm:$0xff] }
 0x137   :  { %7484 = vmatpush3.bf16.msra.mxu1 %v9778_v33 }
 0x138   :  { %7485 = vmatprep.subr.bf16.mxu1 %v11301_v3  ;;  %7514 = vmatpush1.bf16.msra.mxu0 %v11474_v55  ;;  %v11481_v55 = vld [vmem:[#allocation62_spill] sm:$0xff] }
 0x139   :  { %7516 = vmatprep.subr.bf16.mxu0 %v11475_v42  ;;  %v11480_v42 = vld [vmem:[#allocation61_spill] sm:$0xff] }
 0x13b   :  { %7487 = vmatpush3.bf16.msra.mxu1 %v11468_v30 }
 0x13c   :  { %7488 = vmatprep.subr.bf16.mxu1 %v11301_v3  ;;  %7518 = vmatpush1.bf16.msra.mxu0 %v11476_v20 }
 0x13d   :  { %7520 = vmatprep.subr.bf16.mxu0 %v11477_v48  ;;  %v11482_v48 = vld [vmem:[#allocation64_spill] sm:$0xff] }
 0x13f   :  { %7490 = vmatpush3.bf16.msra.mxu1 %v11471_v0 }
 0x140   :  { %7491 = vmatprep.subr.bf16.mxu1 %v11301_v3  ;;  %7522 = vmatpush1.bf16.msra.mxu0 %v11478_v49  ;;  %v11483_v49 = vld [vmem:[#allocation65_spill] sm:$0xff] }
 0x141   :  { %7524 = vmatprep.subr.bf16.mxu0 %v11479_v2  ;;  %v11484_v2 = vld [vmem:[#allocation67_spill] sm:$0xff] }
 0x143   :  { %7493 = vmatpush3.bf16.msra.mxu1 %v9811_v32 }
 0x144   :  { %7494 = vmatprep.subr.bf16.mxu1 %v11301_v3  ;;  %7526 = vmatpush1.bf16.msra.mxu0 %v11480_v42 }
 0x145   :  { %7528 = vmatprep.subr.bf16.mxu0 %v11481_v55 }
 0x147   :  { %7496 = vmatpush3.bf16.msra.mxu1 %v9821_v15 }
 0x148   :  { %7497 = vmatprep.subr.bf16.mxu1 %v11301_v3  ;;  %7530 = vmatpush1.bf16.msra.mxu0 %v11482_v48 }
 0x149   :  { %7532 = vmatprep.subr.bf16.mxu0 %v11483_v49 }
 0x14b   :  { %7499 = vmatpush3.bf16.msra.mxu1 %v9831_v54 }
 0x14c   :  { %7500 = vmatprep.subr.bf16.mxu1 %v11301_v3  ;;  %7534 = vmatpush1.bf16.msra.mxu0 %v11484_v2 }
 0x14f   :  { %7502 = vmatpush3.bf16.msra.mxu1 %v9841_v50 }
 0x150   :  { %7535 = vmatprep.subr.bf16.mxu1 %v11301_v3 }
 0x152   :  { %6255 = vmatmul.mubr.f32.vlgmr.msra.gmra.mrb[12].mxu1 %v1111_v37  ;;  %v11485_v37 = vld [vmem:[#allocation68_spill] sm:$0xff] }
 0x153   :  { %7537 = vmatpush3.bf16.msra.mxu1 %v9849_v46  ;;  %6289 = vmatprep.mubr.msk.f32.mxu1 %vm9429_vm0, %v11443_v29 }
 0x154   :  { %7538 = vmatprep.subr.bf16.mxu1 %v11301_v3  ;;  %7560 = vmatprep.subr.bf16.mxu0 %v11485_v37  ;;  %v319_v37 = vlaneseq }
 0x156   :  { %v10029_v2 = vshrl.u32 %v319_v37, 7 }
 0x157   :  { %7540 = vmatpush3.bf16.msra.mxu1 %v9857_v12 }
 0x158   :  { %7541 = vmatprep.subr.bf16.mxu1 %v11301_v3  ;;  %v10032_v55 = vsub.s32 0, %v10029_v2  ;;  %v10038_v42 = vsub.s32 1, %v10029_v2  ;;  %v329_v32 = vsub.s32 2, %v10029_v2 }
 0x15a   :  { %11486 = vst [vmem:[#allocation96_spill] sm:$0xff] %v10032_v55  ;;  %11487 = vst [vmem:[#allocation97_spill] sm:$0xff] %v10038_v42 }
 0x15b   :  { %7543 = vmatpush3.bf16.msra.mxu1 %v9866_v5 }
 0x15c   :  { %7544 = vmatprep.subr.bf16.mxu1 %v11301_v3 }
 0x15f   :  { %7546 = vmatpush3.bf16.msra.mxu1 %v9872_v58 }
 0x160   :  { %7547 = vmatprep.subr.bf16.mxu1 %v11301_v3 }
 0x163   :  { %7549 = vmatpush3.bf16.msra.mxu1 %v9878_v47 }
 0x164   :  { %7550 = vmatprep.subr.bf16.mxu1 %v11301_v3 }
 0x165   :  { %v400_v49 = vpop.f32.mrb[0].mxu1 }
 0x166   :  { %v402_v48 = vpop.f32.mrb[1].mxu1 }
 0x167   :  { %7552 = vmatpush3.bf16.msra.mxu1 %v9884_v59  ;;  %v313_v59 = vld [vmem:[%s11198_s3] sm:$0x7] }
 0x168   :  { %7553 = vmatprep.subr.bf16.mxu1 %v11301_v3 }
 0x16b   :  { %7555 = vmatpush3.bf16.msra.mxu1 %v9890_v11  ;;  %v10041_v11 = vrot.slane %v313_v59, %v10032_v55 }
 0x16c   :  { %7556 = vmatprep.subr.bf16.mxu1 %v11301_v3 }
 0x16d   :  { %11488 = vst [vmem:[#allocation98_spill] sm:$0xff] %v10041_v11 }
 0x16f   :  { %7558 = vmatpush3.bf16.msra.mxu1 %v9896_v27  ;;  %v10044_v27 = vrot.slane %v313_v59, %v10038_v42 }
 0x170   :  { %7591 = vmatprep.subr.bf16.mxu1 %v11301_v3  ;;  %v401_v3 = vadd.f32 %v400_v49, %v10041_v11 }
 0x171   :  { %11489 = vst [vmem:[#allocation99_spill] sm:$0xff] %v10044_v27  ;;  %v403_v47 = vadd.f32 %v402_v48, %v10044_v27  ;;  %v10052_v48 = vld [vmem:[%s11199_s4] ss:$0 sm:$0xff] }
 0x172   :  { %11490 = vst [vmem:[#allocation100_spill] sm:$0xff] %v10052_v48 }
 0x185   :  { %v471_v37 = vpop.f32.mrb[2].mxu1 }
 0x186   :  { %v700_v58 = vpop.f32.mrb[2].mxu0  ;;  %v6081_v20 = vpop.f32.mrb[3].mxu1 }
 0x187   :  { %v916_v5 = vadd.f32 %v700_v58, %v401_v3  ;;  %v702_v12 = vpop.f32.mrb[3].mxu0  ;;  %v10054_v3 = vrot.slane %v313_v59, %v329_v32 }
 0x188   :  { %v921_v46 = vadd.f32 %v702_v12, %v403_v47 }
 0x189   :  { %v917_v15 = vmul.f32 0.5, %v916_v5  ;;  %v472_v58 = vadd.f32 %v471_v37, %v10054_v3 }
 0x18a   :  { %v922_v19 = vmul.f32 0.5, %v921_v46 }
 0x18b   :  { %9103 = vtanh.f32 %v917_v15 }
 0x18c   :  { %9105 = vtanh.f32 %v922_v19 }
 0x195   :  { %v9104_v7 = vpop.eup %9103 }
 0x196   :  { %v919_v49 = vmul.f32 0.5, %v9104_v7  ;;  %v9106_v47 = vpop.eup %9105 }
 0x197   :  { %v924_v59 = vmul.f32 0.5, %v9106_v47  ;;  %v11494_v47 = vmov 0.0|0.0  }
 0x198   :  { %v920_v5 = vadd.f32 0.5, %v919_v49 }
 0x199   :  { %v925_v27 = vadd.f32 0.5, %v924_v59  ;;  %v10087_v59 = vld [vmem:[%s11203_s8] ss:$0 sm:$0xff] }
 0x19b   :  { %v936_v49 = vsub.f32 1.0, %v925_v27 }
 0x1a5   :  { %v630_v50 = vpop.f32.mrb[4].mxu1 }
 0x1a6   :  { %v841_v54 = vpop.f32.mrb[0].mxu0  ;;  %v6116_v36 = vpop.f32.mrb[5].mxu1 }
 0x1a7   :  { %v843_v25 = vpop.f32.mrb[1].mxu0  ;;  %v314_v36 = vld [vmem:[%s11202_s7] sm:$0x7] }
 0x1a8   :  { %v10062_v7 = vrot.slane %v314_v36, %v10032_v55  ;;  %v10066_v1 = vrot.slane %v314_v36, %v10038_v42  ;;  %v11499_v42 = vld [vmem:[#allocation79_spill] sm:$0xff] }
 0x1aa   :  { %v9027_v2 = vadd.f32 %v841_v54, %v10062_v7  ;;  %v11492_v54 = vld [vmem:[#allocation70_spill] sm:$0xff] }
 0x1ac   :  { %v941_v11 = vmul.f32 0.5, %v9027_v2  ;;  %v10089_v2 = vrot.slane %v314_v36, %v329_v32  ;;  %v11500_v32 = vld [vmem:[#allocation80_spill] sm:$0xff] }
 0x1c5   :  { %v771_v12 = vpop.f32.mrb[6].mxu1 }
 0x1c6   :  { %v932_v15 = vadd.f32 %v10052_v48, %v771_v12  ;;  %v6151_v46 = vpop.f32.mrb[7].mxu1 }
 0x1c7   :  { %v938_v46 = vmul.f32 0.0, %v925_v27  ;;  %v11496_v27 = vld [vmem:[#allocation74_spill] sm:$0xff] }
 0x1c8   :  { %v933_v19 = vmul.f32 %v932_v15, %v920_v5  ;;  %v9028_v5 = vadd.f32 %v843_v25, %v10066_v1 }
 0x1ca   :  { %v934_v20 = vadd.f32 %v933_v19, %v472_v58  ;;  %v946_v58 = vmul.f32 0.5, %v9028_v5  ;;  %v11493_v19 = vld [vmem:[#allocation71_spill] sm:$0xff] }
 0x1cc   :  { %9107 = vtanh.f32 %v934_v20 }
 0x1cd   :  { %9109 = vtanh.f32 %v941_v11  ;;  %v11495_v11 = vld [vmem:[#allocation73_spill] sm:$0xff] }
 0x1ce   :  { %9111 = vtanh.f32 %v946_v58 }
 0x1d6   :  { %v9108_v12 = vpop.eup %9107 }
 0x1d7   :  { %v937_v37 = vmul.f32 %v9108_v12, %v936_v49  ;;  %v9110_v25 = vpop.eup %9109  ;;  %v11497_v49 = vld [vmem:[#allocation76_spill] sm:$0xff] }
 0x1d8   :  { %v943_v20 = vmul.f32 0.5, %v9110_v25  ;;  %v631_v25 = vadd.f32 %v630_v50, %v10089_v2  ;;  %v9112_v36 = vpop.eup %9111 }
 0x1d9   :  { %v10069_v15 = vadd.f32 %v938_v46, %v937_v37  ;;  %v11498_v46 = vld [vmem:[#allocation77_spill] sm:$0xff] }
 0x1da   :  { %v944_v37 = vadd.f32 0.5, %v943_v20  ;;  %v948_v20 = vmul.f32 0.5, %v9112_v36 }
 0x1db   :  { %11491 = vst [vmem:[#allocation101_spill] sm:$0xff] %v10069_v15  ;;  %1318 = vmatmul.mubr.f32.vlgmr.msra.gmra.mrb[4].mxu0 %v10069_v15  ;;  %6290 = vmatmul.mubr.f32.vlgmr.msra.gmra.mrb[14].mxu1 %v10069_v15 }
 0x1dc   :  { %7562 = vmatpush1.bf16.msra.mxu0 %v11492_v54  ;;  %7593 = vmatpush3.bf16.msra.mxu1 %v9902_v40  ;;  %v949_v50 = vadd.f32 0.5, %v948_v20  ;;  %v11505_v20 = vld [vmem:[#allocation27_spill] sm:$0xff] }
 0x1dd   :  { %7564 = vmatprep.subr.bf16.mxu0 %v11493_v19  ;;  %7594 = vmatprep.subr.bf16.mxu1 %v11494_v47 }
 0x1de   :  { %1458 = vmatprep.mubr.f32.mxu0 %v11443_v29  ;;  %6324 = vmatprep.mubr.msk.f32.mxu1 %vm9429_vm0, %v11443_v29 }
 0x1e0   :  { %7566 = vmatpush1.bf16.msra.mxu0 %v11495_v11  ;;  %7596 = vmatpush3.bf16.msra.mxu1 %v9909_v53 }
 0x1e1   :  { %7568 = vmatprep.subr.bf16.mxu0 %v11496_v27  ;;  %7597 = vmatprep.subr.bf16.mxu1 %v11494_v47 }
 0x1e4   :  { %7570 = vmatpush1.bf16.msra.mxu0 %v11497_v49  ;;  %7599 = vmatpush3.bf16.msra.mxu1 %v9915_v28 }
 0x1e5   :  { %v912_v12 = vpop.f32.mrb[8].mxu1  ;;  %7572 = vmatprep.subr.bf16.mxu0 %v11498_v46  ;;  %7600 = vmatprep.subr.bf16.mxu1 %v11494_v47  ;;  %v11501_v46 = vld [vmem:[#allocation82_spill] sm:$0xff] }
 0x1e6   :  { %v956_v5 = vadd.f32 %v10087_v59, %v912_v12  ;;  %v6186_v58 = vpop.f32.mrb[9].mxu1  ;;  %v11502_v12 = vld [vmem:[#allocation83_spill] sm:$0xff] }
 0x1e8   :  { %v957_v55 = vmul.f32 %v956_v5, %v944_v37  ;;  %7574 = vmatpush1.bf16.msra.mxu0 %v11499_v42  ;;  %7602 = vmatpush3.bf16.msra.mxu1 %v9919_v8  ;;  %v962_v37 = vmul.f32 0.0, %v949_v50 }
 0x1e9   :  { %7576 = vmatprep.subr.bf16.mxu0 %v11500_v32  ;;  %7603 = vmatprep.subr.bf16.mxu1 %v11494_v47 }
 0x1ea   :  { %v958_v28 = vadd.f32 %v957_v55, %v631_v25  ;;  %v960_v55 = vsub.f32 1.0, %v949_v50  ;;  %v11504_v25 = vld [vmem:[#allocation24_spill] sm:$0xff] }
 0x1ec   :  { %9113 = vtanh.f32 %v958_v28  ;;  %7578 = vmatpush1.bf16.msra.mxu0 %v11501_v46  ;;  %7605 = vmatpush3.bf16.msra.mxu1 %v9923_v34 }
 0x1ed   :  { %7580 = vmatprep.subr.bf16.mxu0 %v11502_v12  ;;  %7606 = vmatprep.subr.bf16.mxu1 %v11494_v47 }
 0x1f0   :  { %7582 = vmatpush1.bf16.msra.mxu0 %v9825_v21  ;;  %7608 = vmatpush3.bf16.msra.mxu1 %v9927_v16 }
 0x1f1   :  { %7584 = vmatprep.subr.bf16.mxu0 %v9828_v6  ;;  %7609 = vmatprep.subr.bf16.mxu1 %v11494_v47 }
 0x1f4   :  { %7586 = vmatpush1.bf16.msra.mxu0 %v9835_v41  ;;  %7611 = vmatpush3.bf16.msra.mxu1 %v9931_v63 }
 0x1f5   :  { %7588 = vmatprep.subr.bf16.mxu0 %v9838_v60  ;;  %7612 = vmatprep.subr.bf16.mxu1 %v11494_v47 }
 0x1f6   :  { %v9114_v28 = vpop.eup %9113 }
 0x1f7   :  { %v961_v5 = vmul.f32 %v9114_v28, %v960_v55  ;;  %v11506_v55 = vld [vmem:[#allocation29_spill] sm:$0xff]  ;;  %v11507_v28 = vld [vmem:[#allocation31_spill] sm:$0xff] }
 0x1f8   :  { %7590 = vmatpush1.bf16.msra.mxu0 %v9845_v61  ;;  %7614 = vmatpush3.bf16.msra.mxu1 %v9935_v51 }
 0x1f9   :  { %v10115_v58 = vadd.f32 %v962_v37, %v961_v5  ;;  %7616 = vmatprep.subr.bf16.mxu0 %v9580_v4  ;;  %7647 = vmatprep.subr.bf16.mxu1 %v11494_v47  ;;  %v11508_v37 = vld [vmem:[#allocation33_spill] sm:$0xff]  ;;  %v11509_v5 = vld [vmem:[#allocation35_spill] sm:$0xff] }
 0x1fb   :  { %11503 = vst [vmem:[#allocation70_spill] sm:$0xff] %v10115_v58  ;;  %1459 = vmatmul.mubr.f32.vlgmr.msra.gmra.mrb[6].mxu0 %v10115_v58  ;;  %6325 = vmatmul.mubr.f32.vlgmr.msra.gmra.mrb[16].mxu1 %v10115_v58 }
 0x1fc   :  { %7618 = vmatpush1.bf16.msra.mxu0 %v9584_v9  ;;  %7649 = vmatpush3.bf16.msra.mxu1 %v9679_v62 }
 0x1fd   :  { %7620 = vmatprep.subr.bf16.mxu0 %v9591_v17  ;;  %7650 = vmatprep.subr.bf16.mxu1 %v11494_v47 }
 0x1fe   :  { %1641 = vmatprep.mubr.f32.mxu0 %v11443_v29  ;;  %6359 = vmatprep.mubr.msk.f32.mxu1 %vm9429_vm0, %v11443_v29 }
 0x200   :  { %7622 = vmatpush1.bf16.msra.mxu0 %v9596_v22  ;;  %7652 = vmatpush3.bf16.msra.mxu1 %v9693_v24 }
 0x201   :  { %7624 = vmatprep.subr.bf16.mxu0 %v11504_v25  ;;  %7653 = vmatprep.subr.bf16.mxu1 %v11494_v47 }
 0x204   :  { %7626 = vmatpush1.bf16.msra.mxu0 %v9607_v35  ;;  %7655 = vmatpush3.bf16.msra.mxu1 %v9706_v45 }
 0x205   :  { %v10134_v36 = vpop.f32.mrb[10].mxu1  ;;  %7628 = vmatprep.subr.bf16.mxu0 %v11505_v20  ;;  %7656 = vmatprep.subr.bf16.mxu1 %v11494_v47  ;;  %v11510_v20 = vld [vmem:[#allocation37_spill] sm:$0xff] }
 0x206   :  { %v6221_v50 = vpop.f32.mrb[11].mxu1 }
 0x207   :  { %v11511_v50 = vld [vmem:[#allocation39_spill] sm:$0xff] }
 0x208   :  { %7630 = vmatpush1.bf16.msra.mxu0 %v11506_v55  ;;  %7658 = vmatpush3.bf16.msra.mxu1 %v9716_v10  ;;  %v11512_v10 = vld [vmem:[#allocation41_spill] sm:$0xff] }
 0x209   :  { %7632 = vmatprep.subr.bf16.mxu0 %v11507_v28  ;;  %7659 = vmatprep.subr.bf16.mxu1 %v11494_v47  ;;  %v11513_v28 = vld [vmem:[#allocation43_spill] sm:$0xff] }
 0x20c   :  { %7634 = vmatpush1.bf16.msra.mxu0 %v11508_v37  ;;  %7661 = vmatpush3.bf16.msra.mxu1 %v9726_v38  ;;  %v11514_v38 = vld [vmem:[#allocation45_spill] sm:$0xff] }
 0x20d   :  { %7636 = vmatprep.subr.bf16.mxu0 %v11509_v5  ;;  %7662 = vmatprep.subr.bf16.mxu1 %v11494_v47  ;;  %v1576_v5 = vld [vmem:[#allocation3 + $0x10] sm:$0xff] }
 0x210   :  { %7638 = vmatpush1.bf16.msra.mxu0 %v11510_v20  ;;  %7664 = vmatpush3.bf16.msra.mxu1 %v9736_v14  ;;  %v11515_v20 = vld [vmem:[#allocation20_spill] sm:$0xff] }
 0x211   :  { %7640 = vmatprep.subr.bf16.mxu0 %v11511_v50  ;;  %7665 = vmatprep.subr.bf16.mxu1 %v11494_v47 }
 0x214   :  { %7642 = vmatpush1.bf16.msra.mxu0 %v11512_v10  ;;  %7667 = vmatpush3.bf16.msra.mxu1 %v9746_v43 }
 0x215   :  { %7644 = vmatprep.subr.bf16.mxu0 %v11513_v28  ;;  %7668 = vmatprep.subr.bf16.mxu1 %v11494_v47 }
 0x218   :  { %7646 = vmatpush1.bf16.msra.mxu0 %v11514_v38  ;;  %7670 = vmatpush3.bf16.msra.mxu1 %v9756_v23 }
 0x219   :  { %7672 = vmatprep.subr.bf16.mxu0 %v11515_v20  ;;  %7703 = vmatprep.subr.bf16.mxu1 %v11494_v47 }
 0x21b   :  { %1642 = vmatmul.mubr.f32.vlgmr.msra.gmra.mrb[8].mxu0 %v1576_v5  ;;  %6360 = vmatmul.mubr.f32.vlgmr.msra.gmra.mrb[18].mxu1 %v1576_v5 }
 0x21c   :  { %7674 = vmatpush1.bf16.msra.mxu0 %v9587_v13  ;;  %7705 = vmatpush3.bf16.msra.mxu1 %v9766_v56 }
 0x21d   :  { %7676 = vmatprep.subr.bf16.mxu0 %v9593_v18  ;;  %7706 = vmatprep.subr.bf16.mxu1 %v11494_v47 }
 0x21e   :  { %1784 = vmatprep.mubr.f32.mxu0 %v11443_v29  ;;  %6394 = vmatprep.mubr.msk.f32.mxu1 %vm9429_vm0, %v11443_v29 }
 0x220   :  { %7678 = vmatpush1.bf16.msra.mxu0 %v9600_v26  ;;  %7708 = vmatpush3.bf16.msra.mxu1 %v9778_v33  ;;  %v11520_v33 = vld [vmem:[#allocation84_spill] sm:$0xff] }
 0x221   :  { %7680 = vmatprep.subr.bf16.mxu0 %v9604_v31  ;;  %7709 = vmatprep.subr.bf16.mxu1 %v11494_v47  ;;  %v11516_v31 = vld [vmem:[#allocation34_spill] sm:$0xff] }
 0x224   :  { %7682 = vmatpush1.bf16.msra.mxu0 %v9611_v39  ;;  %7711 = vmatpush3.bf16.msra.mxu1 %v11468_v30  ;;  %v11517_v39 = vld [vmem:[#allocation81_spill] sm:$0xff]  ;;  %v11518_v30 = vld [vmem:[#allocation36_spill] sm:$0xff] }
 0x225   :  { %v10171_v5 = vpop.f32.mrb[12].mxu1  ;;  %7684 = vmatprep.subr.bf16.mxu0 %v9616_v44  ;;  %7712 = vmatprep.subr.bf16.mxu1 %v11494_v47  ;;  %v11519_v44 = vld [vmem:[#allocation38_spill] sm:$0xff] }
 0x226   :  { %v6256_v18 = vpop.f32.mrb[13].mxu1 }
 0x227   :  { %v11521_v18 = vld [vmem:[#allocation40_spill] sm:$0xff] }
 0x228   :  { %7686 = vmatpush1.bf16.msra.mxu0 %v9623_v52  ;;  %7714 = vmatpush3.bf16.msra.mxu1 %v11471_v0  ;;  %v11522_v0 = vld [vmem:[#allocation42_spill] sm:$0xff]  ;;  %v11524_v52 = vld [vmem:[#allocation44_spill] sm:$0xff] }
 0x229   :  { %7688 = vmatprep.subr.bf16.mxu0 %v9628_v57  ;;  %7715 = vmatprep.subr.bf16.mxu1 %v11494_v47  ;;  %v11523_v57 = vld [vmem:[#allocation85_spill] sm:$0xff] }
 0x22c   :  { %7690 = vmatpush1.bf16.msra.mxu0 %v11516_v31  ;;  %7717 = vmatpush3.bf16.msra.mxu1 %v11517_v39  ;;  %v11525_v39 = vld [vmem:[#allocation46_spill] sm:$0xff]  ;;  %v1719_v31 = vld [vmem:[#allocation3 + $0x28] sm:$0xff] }
 0x22d   :  { %7692 = vmatprep.subr.bf16.mxu0 %v11518_v30  ;;  %7718 = vmatprep.subr.bf16.mxu1 %v11494_v47  ;;  %v11526_v30 = vld [vmem:[#allocation86_spill] sm:$0xff] }
 0x230   :  { %7694 = vmatpush1.bf16.msra.mxu0 %v11519_v44  ;;  %7720 = vmatpush3.bf16.msra.mxu1 %v11520_v33  ;;  %v11527_v44 = vld [vmem:[#allocation47_spill] sm:$0xff]  ;;  %v11539_v33 = vld [vmem:[#allocation56_spill] sm:$0xff] }
 0x231   :  { %7696 = vmatprep.subr.bf16.mxu0 %v11521_v18  ;;  %7721 = vmatprep.subr.bf16.mxu1 %v11494_v47  ;;  %v11528_v18 = vld [vmem:[#allocation48_spill] sm:$0xff] }
 0x234   :  { %7698 = vmatpush1.bf16.msra.mxu0 %v11522_v0  ;;  %7723 = vmatpush3.bf16.msra.mxu1 %v11523_v57  ;;  %v11529_v0 = vld [vmem:[#allocation87_spill] sm:$0xff]  ;;  %v11530_v57 = vld [vmem:[#allocation49_spill] sm:$0xff] }
 0x235   :  { %7700 = vmatprep.subr.bf16.mxu0 %v11524_v52  ;;  %7724 = vmatprep.subr.bf16.mxu1 %v11494_v47  ;;  %v11538_v52 = vld [vmem:[#allocation90_spill] sm:$0xff] }
 0x238   :  { %7702 = vmatpush1.bf16.msra.mxu0 %v11525_v39  ;;  %7726 = vmatpush3.bf16.msra.mxu1 %v11526_v30  ;;  %v11531_v30 = vld [vmem:[#allocation50_spill] sm:$0xff]  ;;  %v11533_v39 = vld [vmem:[#allocation51_spill] sm:$0xff] }
 0x239   :  { %7728 = vmatprep.subr.bf16.mxu0 %v11527_v44  ;;  %7759 = vmatprep.subr.bf16.mxu1 %v11494_v47  ;;  %v11532_v44 = vld [vmem:[#allocation88_spill] sm:$0xff] }
 0x23b   :  { %1785 = vmatmul.mubr.f32.vlgmr.msra.gmra.mrb[10].mxu0 %v1719_v31  ;;  %6395 = vmatmul.mubr.f32.vlgmr.msra.gmra.mrb[20].mxu1 %v1719_v31  ;;  %v11534_v31 = vld [vmem:[#allocation52_spill] sm:$0xff] }
 0x23c   :  { %7730 = vmatpush1.bf16.msra.mxu0 %v11528_v18  ;;  %7761 = vmatpush3.bf16.msra.mxu1 %v11529_v0  ;;  %v11535_v0 = vld [vmem:[#allocation89_spill] sm:$0xff]  ;;  %v11537_v18 = vld [vmem:[#allocation55_spill] sm:$0xff] }
 0x23d   :  { %7732 = vmatprep.subr.bf16.mxu0 %v11530_v57  ;;  %7762 = vmatprep.subr.bf16.mxu1 %v11494_v47  ;;  %v11536_v57 = vld [vmem:[#allocation53_spill] sm:$0xff] }
 0x23e   :  { %1925 = vmatprep.mubr.f32.mxu0 %v11443_v29  ;;  %6429 = vmatprep.mubr.msk.f32.mxu1 %vm9429_vm0, %v11443_v29 }
 0x240   :  { %7734 = vmatpush1.bf16.msra.mxu0 %v11531_v30  ;;  %7764 = vmatpush3.bf16.msra.mxu1 %v11532_v44  ;;  %v11540_v44 = vld [vmem:[#allocation58_spill] sm:$0xff]  ;;  %v11542_v30 = vld [vmem:[#allocation59_spill] sm:$0xff] }
 0x241   :  { %7736 = vmatprep.subr.bf16.mxu0 %v11533_v39  ;;  %7765 = vmatprep.subr.bf16.mxu1 %v11494_v47  ;;  %v11541_v39 = vld [vmem:[#allocation91_spill] sm:$0xff] }
 0x244   :  { %7738 = vmatpush1.bf16.msra.mxu0 %v11534_v31  ;;  %7767 = vmatpush3.bf16.msra.mxu1 %v11535_v0  ;;  %v11543_v0 = vld [vmem:[#allocation61_spill] sm:$0xff]  ;;  %v11545_v31 = vld [vmem:[#allocation62_spill] sm:$0xff] }
 0x245   :  { %7740 = vmatprep.subr.bf16.mxu0 %v11536_v57  ;;  %7768 = vmatprep.subr.bf16.mxu1 %v11494_v47  ;;  %v11544_v57 = vld [vmem:[#allocation92_spill] sm:$0xff] }
 0x248   :  { %7742 = vmatpush1.bf16.msra.mxu0 %v11537_v18  ;;  %7770 = vmatpush3.bf16.msra.mxu1 %v11538_v52  ;;  %v11546_v52 = vld [vmem:[#allocation64_spill] sm:$0xff]  ;;  %v11548_v18 = vld [vmem:[#allocation65_spill] sm:$0xff] }
 0x249   :  { %7744 = vmatprep.subr.bf16.mxu0 %v11539_v33  ;;  %7771 = vmatprep.subr.bf16.mxu1 %v11494_v47  ;;  %v11547_v33 = vld [vmem:[#allocation93_spill] sm:$0xff] }
 0x24c   :  { %7746 = vmatpush1.bf16.msra.mxu0 %v11540_v44  ;;  %7773 = vmatpush3.bf16.msra.mxu1 %v11541_v39  ;;  %v11549_v39 = vld [vmem:[#allocation67_spill] sm:$0xff]  ;;  %v11551_v44 = vld [vmem:[#allocation68_spill] sm:$0xff] }
 0x24d   :  { %7748 = vmatprep.subr.bf16.mxu0 %v11542_v30  ;;  %7774 = vmatprep.subr.bf16.mxu1 %v11494_v47  ;;  %v11550_v30 = vld [vmem:[#allocation94_spill] sm:$0xff] }
 0x250   :  { %7750 = vmatpush1.bf16.msra.mxu0 %v11543_v0  ;;  %7776 = vmatpush3.bf16.msra.mxu1 %v11544_v57  ;;  %v11552_v0 = vld [vmem:[#allocation98_spill] sm:$0xff] }
 0x251   :  { %7752 = vmatprep.subr.bf16.mxu0 %v11545_v31  ;;  %7777 = vmatprep.subr.bf16.mxu1 %v11494_v47 }
 0x254   :  { %7754 = vmatpush1.bf16.msra.mxu0 %v11546_v52  ;;  %7779 = vmatpush3.bf16.msra.mxu1 %v11547_v33  ;;  %v11553_v33 = vld [vmem:[#allocation99_spill] sm:$0xff] }
 0x255   :  { %7756 = vmatprep.subr.bf16.mxu0 %v11548_v18  ;;  %7780 = vmatprep.subr.bf16.mxu1 %v11494_v47 }
 0x258   :  { %7758 = vmatpush1.bf16.msra.mxu0 %v11549_v39  ;;  %7782 = vmatpush3.bf16.msra.mxu1 %v11550_v30 }
 0x259   :  { %7784 = vmatprep.subr.bf16.mxu0 %v11551_v44  ;;  %7815 = vmatprep.subr.bf16.mxu1 %v11494_v47  ;;  %v1107_v44 = vadd.f32 %v10134_v36, %v10054_v3 }
 0x2ae   :  { %v1319_v57 = vpop.f32.mrb[4].mxu0  ;;  %v1390_v31 = vpop.f32.mrb[14].mxu1 }
 0x2af   :  { %v9029_v26 = vadd.f32 %v1319_v57, %v11552_v0  ;;  %v1321_v56 = vpop.f32.mrb[5].mxu0  ;;  %v6291_v52 = vpop.f32.mrb[15].mxu1  ;;  %v1545_v30 = vadd.f32 %v10052_v48, %v1390_v31 }
 0x2b0   :  { %v9030_v20 = vadd.f32 %v1321_v56, %v11553_v33 }
 0x2b1   :  { %v1536_v13 = vmul.f32 0.5, %v9029_v26 }
 0x2b2   :  { %v1541_v18 = vmul.f32 0.5, %v9030_v20 }
 0x2b3   :  { %9115 = vtanh.f32 %v1536_v13 }
 0x2b4   :  { %9117 = vtanh.f32 %v1541_v18 }
 0x2bd   :  { %v9116_v23 = vpop.eup %9115 }
 0x2be   :  { %v1538_v39 = vmul.f32 0.5, %v9116_v23  ;;  %v9118_v43 = vpop.eup %9117 }
 0x2bf   :  { %v1543_v57 = vmul.f32 0.5, %v9118_v43 }
 0x2c0   :  { %v1539_v38 = vadd.f32 0.5, %v1538_v39 }
 0x2c1   :  { %v1544_v52 = vadd.f32 0.5, %v1543_v57 }
 0x2c2   :  { %v1546_v28 = vmul.f32 %v1545_v30, %v1539_v38  ;;  %v11555_v30 = vld [vmem:[#allocation95_spill] sm:$0xff] }
 0x2c3   :  { %v1549_v56 = vsub.f32 1.0, %v1544_v52  ;;  %v1551_v31 = vmul.f32 %v1544_v52, %v10069_v15  ;;  %v1250_v52 = vadd.f32 %v10171_v5, %v10089_v2  ;;  %v11572_v15 = vld [vmem:[#allocation69_spill] sm:$0xff] }
 0x2c4   :  { %v1547_v10 = vadd.f32 %v1546_v28, %v1107_v44 }
 0x2c6   :  { %9119 = vtanh.f32 %v1547_v10 }
 0x2ce   :  { %v1460_v26 = vpop.f32.mrb[6].mxu0  ;;  %v1531_v0 = vpop.f32.mrb[16].mxu1 }
 0x2cf   :  { %v9031_v13 = vadd.f32 %v1460_v26, %v10062_v7  ;;  %v1462_v20 = vpop.f32.mrb[7].mxu0  ;;  %v6326_v18 = vpop.f32.mrb[17].mxu1  ;;  %v1563_v57 = vadd.f32 %v10087_v59, %v1531_v0 }
 0x2d0   :  { %v9120_v23 = vpop.eup %9119  ;;  %v9032_v36 = vadd.f32 %v1462_v20, %v10066_v1 }
 0x2d1   :  { %v1550_v39 = vmul.f32 %v9120_v23, %v1549_v56  ;;  %v1554_v48 = vmul.f32 0.5, %v9031_v13 }
 0x2d2   :  { %v1559_v44 = vmul.f32 0.5, %v9032_v36 }
 0x2d3   :  { %9121 = vtanh.f32 %v1554_v48  ;;  %v10238_v38 = vadd.f32 %v1551_v31, %v1550_v39  ;;  %v11556_v48 = vld [vmem:[#allocation77_spill] sm:$0xff] }
 0x2d4   :  { %9123 = vtanh.f32 %v1559_v44 }
 0x2d5   :  { %11554 = vst [vmem:[#allocation71_spill] sm:$0xff] %v10238_v38  ;;  %1926 = vmatmul.mubr.f32.vlgmr.msra.gmra.mrb[8].mxu0 %v10238_v38  ;;  %6430 = vmatmul.mubr.f32.vlgmr.msra.gmra.mrb[22].mxu1 %v10238_v38 }
 0x2d6   :  { %7786 = vmatpush1.bf16.msra.mxu0 %v11492_v54  ;;  %7817 = vmatpush3.bf16.msra.mxu1 %v9902_v40 }
 0x2d7   :  { %7788 = vmatprep.subr.bf16.mxu0 %v11493_v19  ;;  %7818 = vmatprep.subr.bf16.mxu1 %v11494_v47 }
 0x2d8   :  { %2066 = vmatprep.mubr.f32.mxu0 %v11443_v29  ;;  %6464 = vmatprep.mubr.msk.f32.mxu1 %vm9429_vm0, %v11443_v29 }
 0x2da   :  { %7790 = vmatpush1.bf16.msra.mxu0 %v11495_v11  ;;  %7820 = vmatpush3.bf16.msra.mxu1 %v9909_v53 }
 0x2db   :  { %7792 = vmatprep.subr.bf16.mxu0 %v11496_v27  ;;  %7821 = vmatprep.subr.bf16.mxu1 %v11494_v47 }
 0x2dd   :  { %v9122_v10 = vpop.eup %9121 }
 0x2de   :  { %v1556_v43 = vmul.f32 0.5, %v9122_v10  ;;  %7794 = vmatpush1.bf16.msra.mxu0 %v11497_v49  ;;  %7823 = vmatpush3.bf16.msra.mxu1 %v11555_v30  ;;  %v9124_v56 = vpop.eup %9123  ;;  %v11558_v10 = vld [vmem:[#allocation27_spill] sm:$0xff] }
 0x2df   :  { %7796 = vmatprep.subr.bf16.mxu0 %v11556_v48  ;;  %7824 = vmatprep.subr.bf16.mxu1 %v11494_v47  ;;  %v1561_v0 = vmul.f32 0.5, %v9124_v56  ;;  %v11564_v56 = vld [vmem:[#allocation41_spill] sm:$0xff] }
 0x2e0   :  { %v1557_v28 = vadd.f32 0.5, %v1556_v43  ;;  %v11559_v43 = vld [vmem:[#allocation54_spill] sm:$0xff] }
 0x2e1   :  { %v1562_v5 = vadd.f32 0.5, %v1561_v0 }
 0x2e2   :  { %v1564_v26 = vmul.f32 %v1563_v57, %v1557_v28  ;;  %7798 = vmatpush1.bf16.msra.mxu0 %v11499_v42  ;;  %7826 = vmatpush3.bf16.msra.mxu1 %v9919_v8  ;;  %v11560_v28 = vld [vmem:[#allocation31_spill] sm:$0xff]  ;;  %v11561_v57 = vld [vmem:[#allocation57_spill] sm:$0xff] }
 0x2e3   :  { %7800 = vmatprep.subr.bf16.mxu0 %v11500_v32  ;;  %7827 = vmatprep.subr.bf16.mxu1 %v11494_v47  ;;  %v1567_v18 = vsub.f32 1.0, %v1562_v5  ;;  %v1569_v36 = vmul.f32 %v1562_v5, %v10115_v58  ;;  %v11566_v5 = vld [vmem:[#allocation43_spill] sm:$0xff]  ;;  %v11571_v58 = vld [vmem:[#allocation21_spill] sm:$0xff] }
 0x2e4   :  { %v1565_v13 = vadd.f32 %v1564_v26, %v1250_v52  ;;  %v11562_v52 = vld [vmem:[#allocation35_spill] sm:$0xff]  ;;  %v11563_v26 = vld [vmem:[#allocation37_spill] sm:$0xff] }
 0x2e6   :  { %9125 = vtanh.f32 %v1565_v13  ;;  %7802 = vmatpush1.bf16.msra.mxu0 %v11501_v46  ;;  %7829 = vmatpush3.bf16.msra.mxu1 %v9923_v34  ;;  %v11565_v13 = vld [vmem:[#allocation63_spill] sm:$0xff] }
 0x2e7   :  { %7804 = vmatprep.subr.bf16.mxu0 %v11502_v12  ;;  %7830 = vmatprep.subr.bf16.mxu1 %v11494_v47 }
 0x2ea   :  { %7806 = vmatpush1.bf16.msra.mxu0 %v9825_v21  ;;  %7832 = vmatpush3.bf16.msra.mxu1 %v9927_v16 }
 0x2eb   :  { %7808 = vmatprep.subr.bf16.mxu0 %v9828_v6  ;;  %7833 = vmatprep.subr.bf16.mxu1 %v11494_v47 }
 0x2ee   :  { %7810 = vmatpush1.bf16.msra.mxu0 %v9835_v41  ;;  %7835 = vmatpush3.bf16.msra.mxu1 %v9931_v63  ;;  %v10274_v20 = vpop.f32.mrb[18].mxu1 }
 0x2ef   :  { %7812 = vmatprep.subr.bf16.mxu0 %v9838_v60  ;;  %7836 = vmatprep.subr.bf16.mxu1 %v11494_v47  ;;  %v6361_v23 = vpop.f32.mrb[19].mxu1 }
 0x2f0   :  { %v9126_v39 = vpop.eup %9125  ;;  %v11567_v23 = vld [vmem:[#allocation45_spill] sm:$0xff] }
 0x2f1   :  { %v1568_v31 = vmul.f32 %v9126_v39, %v1567_v18  ;;  %v11568_v39 = vld [vmem:[#allocation66_spill] sm:$0xff] }
 0x2f2   :  { %7814 = vmatpush1.bf16.msra.mxu0 %v9845_v61  ;;  %7838 = vmatpush3.bf16.msra.mxu1 %v9935_v51 }
 0x2f3   :  { %v10281_v44 = vadd.f32 %v1569_v36, %v1568_v31  ;;  %7840 = vmatprep.subr.bf16.mxu0 %v9580_v4  ;;  %7871 = vmatprep.subr.bf16.mxu1 %v11494_v47  ;;  %v10322_v31 = vld [vmem:[#allocation3 + $0x18] sm:$0xff]  ;;  %v11570_v36 = vld [vmem:[#allocation20_spill] sm:$0xff] }
 0x2f4   :  { %11569 = vst [vmem:[#allocation74_spill] sm:$0xff] %v10322_v31 }
 0x2f5   :  { %11557 = vst [vmem:[#allocation73_spill] sm:$0xff] %v10281_v44  ;;  %2067 = vmatmul.mubr.f32.vlgmr.msra.gmra.mrb[10].mxu0 %v10281_v44  ;;  %6465 = vmatmul.mubr.f32.vlgmr.msra.gmra.mrb[24].mxu1 %v10281_v44 }
 0x2f6   :  { %7842 = vmatpush1.bf16.msra.mxu0 %v9584_v9  ;;  %7873 = vmatpush3.bf16.msra.mxu1 %v9679_v62 }
 0x2f7   :  { %7844 = vmatprep.subr.bf16.mxu0 %v9591_v17  ;;  %7874 = vmatprep.subr.bf16.mxu1 %v11494_v47 }
 0x2f8   :  { %2249 = vmatprep.mubr.f32.mxu0 %v11443_v29  ;;  %6499 = vmatprep.mubr.msk.f32.mxu1 %vm9429_vm0, %v11443_v29 }
 0x2fa   :  { %7846 = vmatpush1.bf16.msra.mxu0 %v9596_v22  ;;  %7876 = vmatpush3.bf16.msra.mxu1 %v9693_v24 }
 0x2fb   :  { %7848 = vmatprep.subr.bf16.mxu0 %v11504_v25  ;;  %7877 = vmatprep.subr.bf16.mxu1 %v11494_v47 }
 0x2fe   :  { %7850 = vmatpush1.bf16.msra.mxu0 %v9607_v35  ;;  %7879 = vmatpush3.bf16.msra.mxu1 %v9706_v45 }
 0x2ff   :  { %7852 = vmatprep.subr.bf16.mxu0 %v11558_v10  ;;  %7880 = vmatprep.subr.bf16.mxu1 %v11494_v47 }
 0x302   :  { %7854 = vmatpush1.bf16.msra.mxu0 %v11506_v55  ;;  %7882 = vmatpush3.bf16.msra.mxu1 %v11559_v43 }
 0x303   :  { %7856 = vmatprep.subr.bf16.mxu0 %v11560_v28  ;;  %7883 = vmatprep.subr.bf16.mxu1 %v11494_v47 }
 0x306   :  { %7858 = vmatpush1.bf16.msra.mxu0 %v11508_v37  ;;  %7885 = vmatpush3.bf16.msra.mxu1 %v11561_v57 }
 0x307   :  { %7860 = vmatprep.subr.bf16.mxu0 %v11562_v52  ;;  %7886 = vmatprep.subr.bf16.mxu1 %v11494_v47 }
 0x30a   :  { %7862 = vmatpush1.bf16.msra.mxu0 %v11563_v26  ;;  %7888 = vmatpush3.bf16.msra.mxu1 %v9736_v14 }
 0x30b   :  { %7864 = vmatprep.subr.bf16.mxu0 %v11511_v50  ;;  %7889 = vmatprep.subr.bf16.mxu1 %v11494_v47 }
 0x30e   :  { %7866 = vmatpush1.bf16.msra.mxu0 %v11564_v56  ;;  %7891 = vmatpush3.bf16.msra.mxu1 %v11565_v13  ;;  %v10316_v0 = vpop.f32.mrb[20].mxu1  ;;  %v11582_v13 = vld [vmem:[#allocation32_spill] sm:$0xff] }
 0x30f   :  { %7868 = vmatprep.subr.bf16.mxu0 %v11566_v5  ;;  %7892 = vmatprep.subr.bf16.mxu1 %v11494_v47  ;;  %v6396_v18 = vpop.f32.mrb[21].mxu1  ;;  %v11573_v5 = vld [vmem:[#allocation22_spill] sm:$0xff] }
 0x310   :  { %v11574_v18 = vld [vmem:[#allocation23_spill] sm:$0xff] }
 0x312   :  { %7870 = vmatpush1.bf16.msra.mxu0 %v11567_v23  ;;  %7894 = vmatpush3.bf16.msra.mxu1 %v11568_v39  ;;  %v11576_v39 = vld [vmem:[#allocation25_spill] sm:$0xff]  ;;  %v11581_v23 = vld [vmem:[#allocation78_spill] sm:$0xff] }
 0x313   :  { %7896 = vmatprep.subr.bf16.mxu0 %v11570_v36  ;;  %7927 = vmatprep.subr.bf16.mxu1 %v11494_v47  ;;  %v11575_v36 = vld [vmem:[#allocation72_spill] sm:$0xff] }
 0x315   :  { %2250 = vmatmul.mubr.f32.vlgmr.msra.gmra.mrb[12].mxu0 %v10322_v31  ;;  %6500 = vmatmul.mubr.f32.vlgmr.msra.gmra.mrb[26].mxu1 %v10322_v31  ;;  %v11577_v31 = vld [vmem:[#allocation26_spill] sm:$0xff] }
 0x316   :  { %7898 = vmatpush1.bf16.msra.mxu0 %v11571_v58  ;;  %7929 = vmatpush3.bf16.msra.mxu1 %v11572_v15  ;;  %v11578_v15 = vld [vmem:[#allocation75_spill] sm:$0xff]  ;;  %v11580_v58 = vld [vmem:[#allocation30_spill] sm:$0xff] }
 0x317   :  { %7900 = vmatprep.subr.bf16.mxu0 %v11573_v5  ;;  %7930 = vmatprep.subr.bf16.mxu1 %v11494_v47  ;;  %v11579_v5 = vld [vmem:[#allocation28_spill] sm:$0xff] }
 0x318   :  { %2392 = vmatprep.mubr.f32.mxu0 %v11443_v29  ;;  %6534 = vmatprep.mubr.msk.f32.mxu1 %vm9429_vm0, %v11443_v29 }
 0x31a   :  { %7902 = vmatpush1.bf16.msra.mxu0 %v11574_v18  ;;  %7932 = vmatpush3.bf16.msra.mxu1 %v11575_v36  ;;  %v11583_v36 = vld [vmem:[#allocation34_spill] sm:$0xff]  ;;  %v11585_v18 = vld [vmem:[#allocation36_spill] sm:$0xff] }
 0x31b   :  { %7904 = vmatprep.subr.bf16.mxu0 %v11576_v39  ;;  %7933 = vmatprep.subr.bf16.mxu1 %v11494_v47  ;;  %v11584_v39 = vld [vmem:[#allocation81_spill] sm:$0xff] }
 0x31e   :  { %7906 = vmatpush1.bf16.msra.mxu0 %v11577_v31  ;;  %7935 = vmatpush3.bf16.msra.mxu1 %v11578_v15  ;;  %v11586_v15 = vld [vmem:[#allocation38_spill] sm:$0xff]  ;;  %v11588_v31 = vld [vmem:[#allocation40_spill] sm:$0xff] }
 0x31f   :  { %7908 = vmatprep.subr.bf16.mxu0 %v11579_v5  ;;  %7936 = vmatprep.subr.bf16.mxu1 %v11494_v47  ;;  %v11587_v5 = vld [vmem:[#allocation84_spill] sm:$0xff] }
 0x322   :  { %7910 = vmatpush1.bf16.msra.mxu0 %v11580_v58  ;;  %7938 = vmatpush3.bf16.msra.mxu1 %v11581_v23  ;;  %v11589_v23 = vld [vmem:[#allocation42_spill] sm:$0xff]  ;;  %v11591_v58 = vld [vmem:[#allocation44_spill] sm:$0xff] }
 0x323   :  { %7912 = vmatprep.subr.bf16.mxu0 %v11582_v13  ;;  %7939 = vmatprep.subr.bf16.mxu1 %v11494_v47  ;;  %v11590_v13 = vld [vmem:[#allocation85_spill] sm:$0xff] }
 0x326   :  { %7914 = vmatpush1.bf16.msra.mxu0 %v11583_v36  ;;  %7941 = vmatpush3.bf16.msra.mxu1 %v11584_v39  ;;  %v11592_v39 = vld [vmem:[#allocation46_spill] sm:$0xff]  ;;  %v10361_v36 = vld [vmem:[#allocation3 + $0x20] sm:$0xff] }
 0x327   :  { %7916 = vmatprep.subr.bf16.mxu0 %v11585_v18  ;;  %7942 = vmatprep.subr.bf16.mxu1 %v11494_v47  ;;  %v11593_v18 = vld [vmem:[#allocation86_spill] sm:$0xff]  ;;  %11594 = vst [vmem:[#allocation76_spill] sm:$0xff] %v10361_v36 }
 0x32a   :  { %7918 = vmatpush1.bf16.msra.mxu0 %v11586_v15  ;;  %7944 = vmatpush3.bf16.msra.mxu1 %v11587_v5  ;;  %v11595_v15 = vld [vmem:[#allocation47_spill] sm:$0xff]  ;;  %v11606_v5 = vld [vmem:[#allocation90_spill] sm:$0xff] }
 0x32b   :  { %7920 = vmatprep.subr.bf16.mxu0 %v11588_v31  ;;  %7945 = vmatprep.subr.bf16.mxu1 %v11494_v47  ;;  %v11605_v31 = vld [vmem:[#allocation55_spill] sm:$0xff] }
 0x32e   :  { %7922 = vmatpush1.bf16.msra.mxu0 %v11589_v23  ;;  %7947 = vmatpush3.bf16.msra.mxu1 %v11590_v13  ;;  %v11596_v23 = vld [vmem:[#allocation48_spill] sm:$0xff]  ;;  %v11597_v13 = vld [vmem:[#allocation87_spill] sm:$0xff] }
 0x32f   :  { %7924 = vmatprep.subr.bf16.mxu0 %v11591_v58  ;;  %7948 = vmatprep.subr.bf16.mxu1 %v11494_v47  ;;  %v11598_v58 = vld [vmem:[#allocation49_spill] sm:$0xff] }
 0x332   :  { %7926 = vmatpush1.bf16.msra.mxu0 %v11592_v39  ;;  %7950 = vmatpush3.bf16.msra.mxu1 %v11593_v18  ;;  %v11600_v18 = vld [vmem:[#allocation88_spill] sm:$0xff]  ;;  %v11601_v39 = vld [vmem:[#allocation51_spill] sm:$0xff] }
 0x333   :  { %7952 = vmatprep.subr.bf16.mxu0 %v11595_v15  ;;  %7983 = vmatprep.subr.bf16.mxu1 %v11494_v47  ;;  %v11599_v15 = vld [vmem:[#allocation50_spill] sm:$0xff] }
 0x335   :  { %2393 = vmatmul.mubr.f32.vlgmr.msra.gmra.mrb[14].mxu0 %v10361_v36  ;;  %6535 = vmatmul.mubr.f32.vlgmr.msra.gmra.mrb[28].mxu1 %v10361_v36  ;;  %v11607_v36 = vld [vmem:[#allocation56_spill] sm:$0xff] }
 0x336   :  { %7954 = vmatpush1.bf16.msra.mxu0 %v11596_v23  ;;  %7985 = vmatpush3.bf16.msra.mxu1 %v11597_v13  ;;  %v11602_v23 = vld [vmem:[#allocation52_spill] sm:$0xff]  ;;  %v11603_v13 = vld [vmem:[#allocation89_spill] sm:$0xff] }
 0x337   :  { %7956 = vmatprep.subr.bf16.mxu0 %v11598_v58  ;;  %7986 = vmatprep.subr.bf16.mxu1 %v11494_v47  ;;  %v11604_v58 = vld [vmem:[#allocation53_spill] sm:$0xff] }
 0x338   :  { %2533 = vmatprep.mubr.f32.mxu0 %v11443_v29  ;;  %6569 = vmatprep.mubr.msk.f32.mxu1 %vm9429_vm0, %v11443_v29 }
 0x33a   :  { %7958 = vmatpush1.bf16.msra.mxu0 %v11599_v15  ;;  %7988 = vmatpush3.bf16.msra.mxu1 %v11600_v18  ;;  %v11608_v18 = vld [vmem:[#allocation58_spill] sm:$0xff]  ;;  %v11610_v15 = vld [vmem:[#allocation59_spill] sm:$0xff] }
 0x33b   :  { %7960 = vmatprep.subr.bf16.mxu0 %v11601_v39  ;;  %7989 = vmatprep.subr.bf16.mxu1 %v11494_v47  ;;  %v11609_v39 = vld [vmem:[#allocation91_spill] sm:$0xff] }
 0x33e   :  { %7962 = vmatpush1.bf16.msra.mxu0 %v11602_v23  ;;  %7991 = vmatpush3.bf16.msra.mxu1 %v11603_v13  ;;  %v11611_v13 = vld [vmem:[#allocation61_spill] sm:$0xff]  ;;  %v11613_v23 = vld [vmem:[#allocation62_spill] sm:$0xff] }
 0x33f   :  { %7964 = vmatprep.subr.bf16.mxu0 %v11604_v58  ;;  %7992 = vmatprep.subr.bf16.mxu1 %v11494_v47  ;;  %v11612_v58 = vld [vmem:[#allocation92_spill] sm:$0xff] }
 0x342   :  { %7966 = vmatpush1.bf16.msra.mxu0 %v11605_v31  ;;  %7994 = vmatpush3.bf16.msra.mxu1 %v11606_v5  ;;  %v11614_v5 = vld [vmem:[#allocation64_spill] sm:$0xff]  ;;  %v11616_v31 = vld [vmem:[#allocation65_spill] sm:$0xff] }
 0x343   :  { %7968 = vmatprep.subr.bf16.mxu0 %v11607_v36  ;;  %7995 = vmatprep.subr.bf16.mxu1 %v11494_v47  ;;  %v11615_v36 = vld [vmem:[#allocation93_spill] sm:$0xff] }
 0x346   :  { %7970 = vmatpush1.bf16.msra.mxu0 %v11608_v18  ;;  %7997 = vmatpush3.bf16.msra.mxu1 %v11609_v39  ;;  %v11617_v39 = vld [vmem:[#allocation67_spill] sm:$0xff]  ;;  %v11619_v18 = vld [vmem:[#allocation68_spill] sm:$0xff] }
 0x347   :  { %7972 = vmatprep.subr.bf16.mxu0 %v11610_v15  ;;  %7998 = vmatprep.subr.bf16.mxu1 %v11494_v47  ;;  %v11618_v15 = vld [vmem:[#allocation94_spill] sm:$0xff] }
 0x34a   :  { %7974 = vmatpush1.bf16.msra.mxu0 %v11611_v13  ;;  %8000 = vmatpush3.bf16.msra.mxu1 %v11612_v58  ;;  %v11620_v13 = vld [vmem:[#allocation98_spill] sm:$0xff] }
 0x34b   :  { %7976 = vmatprep.subr.bf16.mxu0 %v11613_v23  ;;  %8001 = vmatprep.subr.bf16.mxu1 %v11494_v47 }
 0x34e   :  { %7978 = vmatpush1.bf16.msra.mxu0 %v11614_v5  ;;  %8003 = vmatpush3.bf16.msra.mxu1 %v11615_v36 }
 0x34f   :  { %7980 = vmatprep.subr.bf16.mxu0 %v11616_v31  ;;  %8004 = vmatprep.subr.bf16.mxu1 %v11494_v47 }
 0x352   :  { %7982 = vmatpush1.bf16.msra.mxu0 %v11617_v39  ;;  %8006 = vmatpush3.bf16.msra.mxu1 %v11618_v15  ;;  %v11621_v15 = vld [vmem:[#allocation100_spill] sm:$0xff] }
 0x353   :  { %8008 = vmatprep.subr.bf16.mxu0 %v11619_v18  ;;  %8039 = vmatprep.subr.bf16.mxu1 %v11494_v47  ;;  %v1715_v18 = vadd.f32 %v10274_v20, %v10054_v3 }
 0x3a8   :  { %v1927_v58 = vpop.f32.mrb[8].mxu0  ;;  %v1998_v23 = vpop.f32.mrb[22].mxu1 }
 0x3a9   :  { %v9033_v56 = vadd.f32 %v1927_v58, %v11620_v13  ;;  %v1929_v50 = vpop.f32.mrb[9].mxu0  ;;  %v6431_v5 = vpop.f32.mrb[23].mxu1  ;;  %v2153_v57 = vadd.f32 %v11621_v15, %v1998_v23 }
 0x3aa   :  { %v9034_v36 = vadd.f32 %v1929_v50, %v11553_v33 }
 0x3ab   :  { %v2144_v14 = vmul.f32 0.5, %v9033_v56 }
 0x3ac   :  { %v2149_v31 = vmul.f32 0.5, %v9034_v36 }
 0x3ad   :  { %9127 = vtanh.f32 %v2144_v14 }
 0x3ae   :  { %9129 = vtanh.f32 %v2149_v31 }
 0x3b7   :  { %v9128_v26 = vpop.eup %9127 }
 0x3b8   :  { %v2146_v39 = vmul.f32 0.5, %v9128_v26  ;;  %v9130_v28 = vpop.eup %9129 }
 0x3b9   :  { %v2151_v58 = vmul.f32 0.5, %v9130_v28 }
 0x3ba   :  { %v2147_v52 = vadd.f32 0.5, %v2146_v39 }
 0x3bb   :  { %v2152_v5 = vadd.f32 0.5, %v2151_v58  ;;  %v1858_v58 = vadd.f32 %v10316_v0, %v10089_v2 }
 0x3bc   :  { %v2154_v37 = vmul.f32 %v2153_v57, %v2147_v52 }
 0x3bd   :  { %v2157_v50 = vsub.f32 1.0, %v2152_v5  ;;  %v2159_v15 = vmul.f32 %v2152_v5, %v10238_v38  ;;  %v11641_v38 = vld [vmem:[#allocation22_spill] sm:$0xff] }
 0x3be   :  { %v2155_v43 = vadd.f32 %v2154_v37, %v1715_v18 }
 0x3c0   :  { %9131 = vtanh.f32 %v2155_v43 }
 0x3c8   :  { %v2068_v56 = vpop.f32.mrb[10].mxu0  ;;  %v2139_v13 = vpop.f32.mrb[24].mxu1 }
 0x3c9   :  { %v9035_v14 = vadd.f32 %v2068_v56, %v10062_v7  ;;  %v2070_v31 = vpop.f32.mrb[11].mxu0  ;;  %v6466_v36 = vpop.f32.mrb[25].mxu1  ;;  %v2171_v18 = vadd.f32 %v10087_v59, %v2139_v13 }
 0x3ca   :  { %v9132_v26 = vpop.eup %9131  ;;  %v9036_v20 = vadd.f32 %v2070_v31, %v10066_v1 }
 0x3cb   :  { %v2158_v39 = vmul.f32 %v9132_v26, %v2157_v50  ;;  %v2162_v23 = vmul.f32 0.5, %v9035_v14 }
 0x3cc   :  { %v2167_v37 = vmul.f32 0.5, %v9036_v20  ;;  %v11625_v20 = vld [vmem:[#allocation31_spill] sm:$0xff] }
 0x3cd   :  { %9133 = vtanh.f32 %v2162_v23  ;;  %v10410_v57 = vadd.f32 %v2159_v15, %v2158_v39  ;;  %v11624_v23 = vld [vmem:[#allocation54_spill] sm:$0xff] }
 0x3ce   :  { %9135 = vtanh.f32 %v2167_v37  ;;  %v11626_v37 = vld [vmem:[#allocation33_spill] sm:$0xff] }
 0x3cf   :  { %11622 = vst [vmem:[#allocation79_spill] sm:$0xff] %v10410_v57  ;;  %2534 = vmatmul.mubr.f32.vlgmr.msra.gmra.mrb[12].mxu0 %v10410_v57  ;;  %6570 = vmatmul.mubr.f32.vlgmr.msra.gmra.mrb[30].mxu1 %v10410_v57 }
 0x3d0   :  { %8010 = vmatpush1.bf16.msra.mxu0 %v11492_v54  ;;  %8041 = vmatpush3.bf16.msra.mxu1 %v9902_v40 }
 0x3d1   :  { %8012 = vmatprep.subr.bf16.mxu0 %v11493_v19  ;;  %8042 = vmatprep.subr.bf16.mxu1 %v11494_v47 }
 0x3d2   :  { %2674 = vmatprep.mubr.f32.mxu0 %v11443_v29  ;;  %6604 = vmatprep.mubr.msk.f32.mxu1 %vm9429_vm0, %v11443_v29 }
 0x3d4   :  { %8014 = vmatpush1.bf16.msra.mxu0 %v11495_v11  ;;  %8044 = vmatpush3.bf16.msra.mxu1 %v9909_v53 }
 0x3d5   :  { %8016 = vmatprep.subr.bf16.mxu0 %v11496_v27  ;;  %8045 = vmatprep.subr.bf16.mxu1 %v11494_v47 }
 0x3d7   :  { %v9134_v43 = vpop.eup %9133 }
 0x3d8   :  { %v2164_v28 = vmul.f32 0.5, %v9134_v43  ;;  %8018 = vmatpush1.bf16.msra.mxu0 %v11497_v49  ;;  %8047 = vmatpush3.bf16.msra.mxu1 %v11555_v30  ;;  %v9136_v56 = vpop.eup %9135  ;;  %v11627_v43 = vld [vmem:[#allocation57_spill] sm:$0xff] }
 0x3d9   :  { %8020 = vmatprep.subr.bf16.mxu0 %v11556_v48  ;;  %8048 = vmatprep.subr.bf16.mxu1 %v11494_v47  ;;  %v2169_v59 = vmul.f32 0.5, %v9136_v56  ;;  %v11633_v56 = vld [vmem:[#allocation63_spill] sm:$0xff] }
 0x3da   :  { %v2165_v52 = vadd.f32 0.5, %v2164_v28  ;;  %v11628_v28 = vld [vmem:[#allocation35_spill] sm:$0xff] }
 0x3db   :  { %v2170_v13 = vadd.f32 0.5, %v2169_v59  ;;  %v11634_v59 = vld [vmem:[#allocation43_spill] sm:$0xff] }
 0x3dc   :  { %v2172_v5 = vmul.f32 %v2171_v18, %v2165_v52  ;;  %8022 = vmatpush1.bf16.msra.mxu0 %v11499_v42  ;;  %8050 = vmatpush3.bf16.msra.mxu1 %v9919_v8  ;;  %v11629_v52 = vld [vmem:[#allocation37_spill] sm:$0xff]  ;;  %v11630_v18 = vld [vmem:[#allocation60_spill] sm:$0xff] }
 0x3dd   :  { %8024 = vmatprep.subr.bf16.mxu0 %v11500_v32  ;;  %8051 = vmatprep.subr.bf16.mxu1 %v11494_v47  ;;  %v2175_v14 = vsub.f32 1.0, %v2170_v13  ;;  %v2177_v39 = vmul.f32 %v2170_v13, %v10281_v44  ;;  %v11640_v44 = vld [vmem:[#allocation69_spill] sm:$0xff] }
 0x3de   :  { %v2173_v50 = vadd.f32 %v2172_v5, %v1858_v58  ;;  %v11631_v58 = vld [vmem:[#allocation39_spill] sm:$0xff]  ;;  %v11632_v5 = vld [vmem:[#allocation41_spill] sm:$0xff] }
 0x3e0   :  { %9137 = vtanh.f32 %v2173_v50  ;;  %8026 = vmatpush1.bf16.msra.mxu0 %v11501_v46  ;;  %8053 = vmatpush3.bf16.msra.mxu1 %v9923_v34 }
 0x3e1   :  { %8028 = vmatprep.subr.bf16.mxu0 %v11502_v12  ;;  %8054 = vmatprep.subr.bf16.mxu1 %v11494_v47 }
 0x3e4   :  { %8030 = vmatpush1.bf16.msra.mxu0 %v9825_v21  ;;  %8056 = vmatpush3.bf16.msra.mxu1 %v9927_v16 }
 0x3e5   :  { %8032 = vmatprep.subr.bf16.mxu0 %v9828_v6  ;;  %8057 = vmatprep.subr.bf16.mxu1 %v11494_v47 }
 0x3e8   :  { %8034 = vmatpush1.bf16.msra.mxu0 %v9835_v41  ;;  %8059 = vmatpush3.bf16.msra.mxu1 %v9931_v63  ;;  %v10446_v0 = vpop.f32.mrb[26].mxu1 }
 0x3e9   :  { %8036 = vmatprep.subr.bf16.mxu0 %v9838_v60  ;;  %8060 = vmatprep.subr.bf16.mxu1 %v11494_v47  ;;  %v6501_v31 = vpop.f32.mrb[27].mxu1 }
 0x3ea   :  { %v9138_v36 = vpop.eup %9137  ;;  %v11636_v31 = vld [vmem:[#allocation66_spill] sm:$0xff] }
 0x3eb   :  { %v2176_v26 = vmul.f32 %v9138_v36, %v2175_v14  ;;  %v11635_v14 = vld [vmem:[#allocation45_spill] sm:$0xff]  ;;  %v11637_v36 = vld [vmem:[#allocation20_spill] sm:$0xff] }
 0x3ec   :  { %8038 = vmatpush1.bf16.msra.mxu0 %v9845_v61  ;;  %8062 = vmatpush3.bf16.msra.mxu1 %v9935_v51 }
 0x3ed   :  { %v10453_v15 = vadd.f32 %v2177_v39, %v2176_v26  ;;  %8064 = vmatprep.subr.bf16.mxu0 %v9580_v4  ;;  %8095 = vmatprep.subr.bf16.mxu1 %v11494_v47  ;;  %v11638_v26 = vld [vmem:[#allocation76_spill] sm:$0xff]  ;;  %v11639_v39 = vld [vmem:[#allocation21_spill] sm:$0xff] }
 0x3ef   :  { %11623 = vst [vmem:[#allocation80_spill] sm:$0xff] %v10453_v15  ;;  %2675 = vmatmul.mubr.f32.vlgmr.msra.gmra.mrb[14].mxu0 %v10453_v15  ;;  %6605 = vmatmul.mubr.f32.vlgmr.msra.gmra.mrb[32].mxu1 %v10453_v15 }
 0x3f0   :  { %8066 = vmatpush1.bf16.msra.mxu0 %v9584_v9  ;;  %8097 = vmatpush3.bf16.msra.mxu1 %v9679_v62 }
 0x3f1   :  { %8068 = vmatprep.subr.bf16.mxu0 %v9591_v17  ;;  %8098 = vmatprep.subr.bf16.mxu1 %v11494_v47 }
 0x3f2   :  { %2856 = vmatprep.mubr.f32.mxu0 %v11443_v29  ;;  %6639 = vmatprep.mubr.msk.f32.mxu1 %vm9429_vm0, %v11443_v29 }
 0x3f4   :  { %8070 = vmatpush1.bf16.msra.mxu0 %v9596_v22  ;;  %8100 = vmatpush3.bf16.msra.mxu1 %v9693_v24 }
 0x3f5   :  { %8072 = vmatprep.subr.bf16.mxu0 %v11504_v25  ;;  %8101 = vmatprep.subr.bf16.mxu1 %v11494_v47 }
 0x3f8   :  { %8074 = vmatpush1.bf16.msra.mxu0 %v9607_v35  ;;  %8103 = vmatpush3.bf16.msra.mxu1 %v9706_v45 }
 0x3f9   :  { %8076 = vmatprep.subr.bf16.mxu0 %v11558_v10  ;;  %8104 = vmatprep.subr.bf16.mxu1 %v11494_v47 }
 0x3fc   :  { %8078 = vmatpush1.bf16.msra.mxu0 %v11506_v55  ;;  %8106 = vmatpush3.bf16.msra.mxu1 %v11624_v23 }
 0x3fd   :  { %8080 = vmatprep.subr.bf16.mxu0 %v11625_v20  ;;  %8107 = vmatprep.subr.bf16.mxu1 %v11494_v47 }
 0x400   :  { %8082 = vmatpush1.bf16.msra.mxu0 %v11626_v37  ;;  %8109 = vmatpush3.bf16.msra.mxu1 %v11627_v43 }
 0x401   :  { %8084 = vmatprep.subr.bf16.mxu0 %v11628_v28  ;;  %8110 = vmatprep.subr.bf16.mxu1 %v11494_v47 }
 0x404   :  { %8086 = vmatpush1.bf16.msra.mxu0 %v11629_v52  ;;  %8112 = vmatpush3.bf16.msra.mxu1 %v11630_v18 }
 0x405   :  { %8088 = vmatprep.subr.bf16.mxu0 %v11631_v58  ;;  %8113 = vmatprep.subr.bf16.mxu1 %v11494_v47 }
 0x408   :  { %8090 = vmatpush1.bf16.msra.mxu0 %v11632_v5  ;;  %8115 = vmatpush3.bf16.msra.mxu1 %v11633_v56  ;;  %v10488_v50 = vpop.f32.mrb[28].mxu1 }
 0x409   :  { %8092 = vmatprep.subr.bf16.mxu0 %v11634_v59  ;;  %8116 = vmatprep.subr.bf16.mxu1 %v11494_v47  ;;  %v6536_v13 = vpop.f32.mrb[29].mxu1  ;;  %v11650_v59 = vld [vmem:[#allocation32_spill] sm:$0xff] }
 0x40a   :  { %v11642_v13 = vld [vmem:[#allocation23_spill] sm:$0xff] }
 0x40c   :  { %8094 = vmatpush1.bf16.msra.mxu0 %v11635_v14  ;;  %8118 = vmatpush3.bf16.msra.mxu1 %v11636_v31  ;;  %v11644_v31 = vld [vmem:[#allocation25_spill] sm:$0xff]  ;;  %v11649_v14 = vld [vmem:[#allocation78_spill] sm:$0xff] }
 0x40d   :  { %8120 = vmatprep.subr.bf16.mxu0 %v11637_v36  ;;  %8151 = vmatprep.subr.bf16.mxu1 %v11494_v47  ;;  %v11643_v36 = vld [vmem:[#allocation72_spill] sm:$0xff] }
 0x40f   :  { %2857 = vmatmul.mubr.f32.vlgmr.msra.gmra.mrb[16].mxu0 %v11638_v26  ;;  %6640 = vmatmul.mubr.f32.vlgmr.msra.gmra.mrb[34].mxu1 %v11638_v26  ;;  %v11645_v26 = vld [vmem:[#allocation26_spill] sm:$0xff] }
 0x410   :  { %8122 = vmatpush1.bf16.msra.mxu0 %v11639_v39  ;;  %8153 = vmatpush3.bf16.msra.mxu1 %v11640_v44  ;;  %v11646_v44 = vld [vmem:[#allocation75_spill] sm:$0xff]  ;;  %v11648_v39 = vld [vmem:[#allocation30_spill] sm:$0xff] }
 0x411   :  { %8124 = vmatprep.subr.bf16.mxu0 %v11641_v38  ;;  %8154 = vmatprep.subr.bf16.mxu1 %v11494_v47  ;;  %v11647_v38 = vld [vmem:[#allocation28_spill] sm:$0xff] }
 0x412   :  { %2998 = vmatprep.mubr.f32.mxu0 %v11443_v29  ;;  %6674 = vmatprep.mubr.msk.f32.mxu1 %vm9429_vm0, %v11443_v29 }
 0x414   :  { %8126 = vmatpush1.bf16.msra.mxu0 %v11642_v13  ;;  %8156 = vmatpush3.bf16.msra.mxu1 %v11643_v36  ;;  %v11651_v36 = vld [vmem:[#allocation34_spill] sm:$0xff]  ;;  %v11653_v13 = vld [vmem:[#allocation36_spill] sm:$0xff] }
 0x415   :  { %8128 = vmatprep.subr.bf16.mxu0 %v11644_v31  ;;  %8157 = vmatprep.subr.bf16.mxu1 %v11494_v47  ;;  %v11652_v31 = vld [vmem:[#allocation81_spill] sm:$0xff] }
 0x418   :  { %8130 = vmatpush1.bf16.msra.mxu0 %v11645_v26  ;;  %8159 = vmatpush3.bf16.msra.mxu1 %v11646_v44  ;;  %v11654_v44 = vld [vmem:[#allocation38_spill] sm:$0xff]  ;;  %v11656_v26 = vld [vmem:[#allocation40_spill] sm:$0xff] }
 0x419   :  { %8132 = vmatprep.subr.bf16.mxu0 %v11647_v38  ;;  %8160 = vmatprep.subr.bf16.mxu1 %v11494_v47  ;;  %v11655_v38 = vld [vmem:[#allocation84_spill] sm:$0xff] }
 0x41c   :  { %8134 = vmatpush1.bf16.msra.mxu0 %v11648_v39  ;;  %8162 = vmatpush3.bf16.msra.mxu1 %v11649_v14  ;;  %v11657_v14 = vld [vmem:[#allocation42_spill] sm:$0xff]  ;;  %v11659_v39 = vld [vmem:[#allocation44_spill] sm:$0xff] }
 0x41d   :  { %8136 = vmatprep.subr.bf16.mxu0 %v11650_v59  ;;  %8163 = vmatprep.subr.bf16.mxu1 %v11494_v47  ;;  %v11658_v59 = vld [vmem:[#allocation85_spill] sm:$0xff] }
 0x420   :  { %8138 = vmatpush1.bf16.msra.mxu0 %v11651_v36  ;;  %8165 = vmatpush3.bf16.msra.mxu1 %v11652_v31  ;;  %v11660_v31 = vld [vmem:[#allocation46_spill] sm:$0xff]  ;;  %v11662_v36 = vld [vmem:[#allocation47_spill] sm:$0xff] }
 0x421   :  { %8140 = vmatprep.subr.bf16.mxu0 %v11653_v13  ;;  %8166 = vmatprep.subr.bf16.mxu1 %v11494_v47  ;;  %v11661_v13 = vld [vmem:[#allocation86_spill] sm:$0xff] }
 0x424   :  { %8142 = vmatpush1.bf16.msra.mxu0 %v11654_v44  ;;  %8168 = vmatpush3.bf16.msra.mxu1 %v11655_v38  ;;  %v11663_v38 = vld [vmem:[#allocation74_spill] sm:$0xff]  ;;  %v11675_v44 = vld [vmem:[#allocation56_spill] sm:$0xff] }
 0x425   :  { %8144 = vmatprep.subr.bf16.mxu0 %v11656_v26  ;;  %8169 = vmatprep.subr.bf16.mxu1 %v11494_v47  ;;  %v11664_v26 = vld [vmem:[#allocation48_spill] sm:$0xff] }
 0x428   :  { %8146 = vmatpush1.bf16.msra.mxu0 %v11657_v14  ;;  %8171 = vmatpush3.bf16.msra.mxu1 %v11658_v59  ;;  %v11665_v14 = vld [vmem:[#allocation87_spill] sm:$0xff]  ;;  %v11666_v59 = vld [vmem:[#allocation49_spill] sm:$0xff] }
 0x429   :  { %8148 = vmatprep.subr.bf16.mxu0 %v11659_v39  ;;  %8172 = vmatprep.subr.bf16.mxu1 %v11494_v47  ;;  %v11674_v39 = vld [vmem:[#allocation90_spill] sm:$0xff] }
 0x42c   :  { %8150 = vmatpush1.bf16.msra.mxu0 %v11660_v31  ;;  %8174 = vmatpush3.bf16.msra.mxu1 %v11661_v13  ;;  %v11668_v13 = vld [vmem:[#allocation88_spill] sm:$0xff]  ;;  %v11669_v31 = vld [vmem:[#allocation51_spill] sm:$0xff] }
 0x42d   :  { %8176 = vmatprep.subr.bf16.mxu0 %v11662_v36  ;;  %8207 = vmatprep.subr.bf16.mxu1 %v11494_v47  ;;  %v11667_v36 = vld [vmem:[#allocation50_spill] sm:$0xff] }
 0x42f   :  { %2999 = vmatmul.mubr.f32.vlgmr.msra.gmra.mrb[18].mxu0 %v11663_v38  ;;  %6675 = vmatmul.mubr.f32.vlgmr.msra.gmra.mrb[36].mxu1 %v11663_v38  ;;  %v11670_v38 = vld [vmem:[#allocation52_spill] sm:$0xff] }
 0x430   :  { %8178 = vmatpush1.bf16.msra.mxu0 %v11664_v26  ;;  %8209 = vmatpush3.bf16.msra.mxu1 %v11665_v14  ;;  %v11671_v14 = vld [vmem:[#allocation89_spill] sm:$0xff]  ;;  %v11673_v26 = vld [vmem:[#allocation55_spill] sm:$0xff] }
 0x431   :  { %8180 = vmatprep.subr.bf16.mxu0 %v11666_v59  ;;  %8210 = vmatprep.subr.bf16.mxu1 %v11494_v47  ;;  %v11672_v59 = vld [vmem:[#allocation53_spill] sm:$0xff] }
 0x432   :  { %3139 = vmatprep.mubr.f32.mxu0 %v11443_v29  ;;  %6709 = vmatprep.mubr.msk.f32.mxu1 %vm9429_vm0, %v11443_v29 }
 0x434   :  { %8182 = vmatpush1.bf16.msra.mxu0 %v11667_v36  ;;  %8212 = vmatpush3.bf16.msra.mxu1 %v11668_v13  ;;  %v11676_v13 = vld [vmem:[#allocation58_spill] sm:$0xff]  ;;  %v11678_v36 = vld [vmem:[#allocation59_spill] sm:$0xff] }
 0x435   :  { %8184 = vmatprep.subr.bf16.mxu0 %v11669_v31  ;;  %8213 = vmatprep.subr.bf16.mxu1 %v11494_v47  ;;  %v11677_v31 = vld [vmem:[#allocation91_spill] sm:$0xff] }
 0x438   :  { %8186 = vmatpush1.bf16.msra.mxu0 %v11670_v38  ;;  %8215 = vmatpush3.bf16.msra.mxu1 %v11671_v14  ;;  %v11679_v14 = vld [vmem:[#allocation61_spill] sm:$0xff]  ;;  %v11681_v38 = vld [vmem:[#allocation62_spill] sm:$0xff] }
 0x439   :  { %8188 = vmatprep.subr.bf16.mxu0 %v11672_v59  ;;  %8216 = vmatprep.subr.bf16.mxu1 %v11494_v47  ;;  %v11680_v59 = vld [vmem:[#allocation92_spill] sm:$0xff] }
 0x43c   :  { %8190 = vmatpush1.bf16.msra.mxu0 %v11673_v26  ;;  %8218 = vmatpush3.bf16.msra.mxu1 %v11674_v39  ;;  %v11682_v39 = vld [vmem:[#allocation64_spill] sm:$0xff]  ;;  %v11684_v26 = vld [vmem:[#allocation65_spill] sm:$0xff] }
 0x43d   :  { %8192 = vmatprep.subr.bf16.mxu0 %v11675_v44  ;;  %8219 = vmatprep.subr.bf16.mxu1 %v11494_v47  ;;  %v11683_v44 = vld [vmem:[#allocation93_spill] sm:$0xff] }
 0x440   :  { %8194 = vmatpush1.bf16.msra.mxu0 %v11676_v13  ;;  %8221 = vmatpush3.bf16.msra.mxu1 %v11677_v31  ;;  %v11685_v31 = vld [vmem:[#allocation67_spill] sm:$0xff]  ;;  %v11687_v13 = vld [vmem:[#allocation68_spill] sm:$0xff] }
 0x441   :  { %8196 = vmatprep.subr.bf16.mxu0 %v11678_v36  ;;  %8222 = vmatprep.subr.bf16.mxu1 %v11494_v47  ;;  %v11686_v36 = vld [vmem:[#allocation94_spill] sm:$0xff] }
 0x444   :  { %8198 = vmatpush1.bf16.msra.mxu0 %v11679_v14  ;;  %8224 = vmatpush3.bf16.msra.mxu1 %v11680_v59  ;;  %v11688_v14 = vld [vmem:[#allocation98_spill] sm:$0xff] }
 0x445   :  { %8200 = vmatprep.subr.bf16.mxu0 %v11681_v38  ;;  %8225 = vmatprep.subr.bf16.mxu1 %v11494_v47 }
 0x448   :  { %8202 = vmatpush1.bf16.msra.mxu0 %v11682_v39  ;;  %8227 = vmatpush3.bf16.msra.mxu1 %v11683_v44 }
 0x449   :  { %8204 = vmatprep.subr.bf16.mxu0 %v11684_v26  ;;  %8228 = vmatprep.subr.bf16.mxu1 %v11494_v47 }
 0x44c   :  { %8206 = vmatpush1.bf16.msra.mxu0 %v11685_v31  ;;  %8230 = vmatpush3.bf16.msra.mxu1 %v11686_v36 }
 0x44d   :  { %8232 = vmatprep.subr.bf16.mxu0 %v11687_v13  ;;  %8263 = vmatprep.subr.bf16.mxu1 %v11494_v47  ;;  %v10575_v13 = vld [vmem:[%s11199_s4] ss:$0 sm:$0xff] }
 0x44e   :  { %11689 = vst [vmem:[#allocation82_spill] sm:$0xff] %v10575_v13 }
 0x4a2   :  { %v2535_v59 = vpop.f32.mrb[12].mxu0  ;;  %v2606_v38 = vpop.f32.mrb[30].mxu1 }
 0x4a3   :  { %v9037_v56 = vadd.f32 %v2535_v59, %v11688_v14  ;;  %v2537_v5 = vpop.f32.mrb[13].mxu0  ;;  %v6571_v39 = vpop.f32.mrb[31].mxu1  ;;  %v2761_v36 = vadd.f32 %v10575_v13, %v2606_v38  ;;  %v2323_v59 = vadd.f32 %v10446_v0, %v10054_v3 }
 0x4a4   :  { %v9038_v44 = vadd.f32 %v2537_v5, %v11553_v33 }
 0x4a5   :  { %v2752_v58 = vmul.f32 0.5, %v9037_v56 }
 0x4a6   :  { %v2757_v26 = vmul.f32 0.5, %v9038_v44 }
 0x4a7   :  { %9139 = vtanh.f32 %v2752_v58 }
 0x4a8   :  { %9141 = vtanh.f32 %v2757_v26 }
 0x4b1   :  { %v9140_v18 = vpop.eup %9139 }
 0x4b2   :  { %v2754_v31 = vmul.f32 0.5, %v9140_v18  ;;  %v9142_v56 = vpop.eup %9141 }
 0x4b3   :  { %v2759_v58 = vmul.f32 0.5, %v9142_v56 }
 0x4b4   :  { %v2755_v52 = vadd.f32 0.5, %v2754_v31 }
 0x4b5   :  { %v2760_v44 = vadd.f32 0.5, %v2759_v58 }
 0x4b6   :  { %v2762_v39 = vmul.f32 %v2761_v36, %v2755_v52 }
 0x4b7   :  { %v2765_v18 = vsub.f32 1.0, %v2760_v44  ;;  %v2767_v38 = vmul.f32 %v2760_v44, %v10410_v57  ;;  %v11706_v57 = vld [vmem:[#allocation22_spill] sm:$0xff] }
 0x4b8   :  { %v2763_v14 = vadd.f32 %v2762_v39, %v2323_v59 }
 0x4ba   :  { %9143 = vtanh.f32 %v2763_v14 }
 0x4c2   :  { %v2676_v5 = vpop.f32.mrb[14].mxu0  ;;  %v2747_v26 = vpop.f32.mrb[32].mxu1 }
 0x4c3   :  { %v9039_v31 = vadd.f32 %v2676_v5, %v10062_v7  ;;  %v2678_v33 = vpop.f32.mrb[15].mxu0  ;;  %v6606_v28 = vpop.f32.mrb[33].mxu1 }
 0x4c4   :  { %v9144_v43 = vpop.eup %9143  ;;  %v9040_v0 = vadd.f32 %v2678_v33, %v10066_v1  ;;  %v10605_v28 = vld [vmem:[%s11203_s8] ss:$0 sm:$0xff] }
 0x4c5   :  { %v2766_v37 = vmul.f32 %v9144_v43, %v2765_v18  ;;  %v2770_v13 = vmul.f32 0.5, %v9039_v31  ;;  %v2779_v36 = vadd.f32 %v10605_v28, %v2747_v26 }
 0x4c6   :  { %v2775_v14 = vmul.f32 0.5, %v9040_v0 }
 0x4c7   :  { %9145 = vtanh.f32 %v2770_v13  ;;  %v10583_v52 = vadd.f32 %v2767_v38, %v2766_v37  ;;  %v2466_v13 = vadd.f32 %v10488_v50, %v10089_v2 }
 0x4c8   :  { %9147 = vtanh.f32 %v2775_v14  ;;  %v11692_v14 = vld [vmem:[#allocation33_spill] sm:$0xff] }
 0x4c9   :  { %11690 = vst [vmem:[#allocation83_spill] sm:$0xff] %v10583_v52  ;;  %3140 = vmatmul.mubr.f32.vlgmr.msra.gmra.mrb[16].mxu0 %v10583_v52  ;;  %6710 = vmatmul.mubr.f32.vlgmr.msra.gmra.mrb[38].mxu1 %v10583_v52 }
 0x4ca   :  { %8234 = vmatpush1.bf16.msra.mxu0 %v11492_v54  ;;  %8265 = vmatpush3.bf16.msra.mxu1 %v9902_v40 }
 0x4cb   :  { %8236 = vmatprep.subr.bf16.mxu0 %v11493_v19  ;;  %8266 = vmatprep.subr.bf16.mxu1 %v11494_v47 }
 0x4cc   :  { %3280 = vmatprep.mubr.f32.mxu0 %v11443_v29  ;;  %6744 = vmatprep.mubr.msk.f32.mxu1 %vm9429_vm0, %v11443_v29 }
 0x4ce   :  { %8238 = vmatpush1.bf16.msra.mxu0 %v11495_v11  ;;  %8268 = vmatpush3.bf16.msra.mxu1 %v9909_v53 }
 0x4cf   :  { %8240 = vmatprep.subr.bf16.mxu0 %v11496_v27  ;;  %8269 = vmatprep.subr.bf16.mxu1 %v11494_v47 }
 0x4d1   :  { %v9146_v33 = vpop.eup %9145 }
 0x4d2   :  { %v2772_v37 = vmul.f32 0.5, %v9146_v33  ;;  %8242 = vmatpush1.bf16.msra.mxu0 %v11497_v49  ;;  %8271 = vmatpush3.bf16.msra.mxu1 %v11555_v30  ;;  %v9148_v39 = vpop.eup %9147  ;;  %v11693_v33 = vld [vmem:[#allocation57_spill] sm:$0xff] }
 0x4d3   :  { %8244 = vmatprep.subr.bf16.mxu0 %v11556_v48  ;;  %8272 = vmatprep.subr.bf16.mxu1 %v11494_v47  ;;  %v2777_v58 = vmul.f32 0.5, %v9148_v39  ;;  %v11699_v39 = vld [vmem:[#allocation63_spill] sm:$0xff] }
 0x4d4   :  { %v2773_v43 = vadd.f32 0.5, %v2772_v37  ;;  %v11694_v37 = vld [vmem:[#allocation35_spill] sm:$0xff] }
 0x4d5   :  { %v2778_v50 = vadd.f32 0.5, %v2777_v58  ;;  %v11700_v58 = vld [vmem:[#allocation43_spill] sm:$0xff] }
 0x4d6   :  { %v2780_v59 = vmul.f32 %v2779_v36, %v2773_v43  ;;  %8246 = vmatpush1.bf16.msra.mxu0 %v11499_v42  ;;  %8274 = vmatpush3.bf16.msra.mxu1 %v9919_v8  ;;  %v11695_v43 = vld [vmem:[#allocation37_spill] sm:$0xff]  ;;  %v11696_v36 = vld [vmem:[#allocation60_spill] sm:$0xff] }
 0x4d7   :  { %8248 = vmatprep.subr.bf16.mxu0 %v11500_v32  ;;  %8275 = vmatprep.subr.bf16.mxu1 %v11494_v47  ;;  %v2783_v5 = vsub.f32 1.0, %v2778_v50  ;;  %v2785_v38 = vmul.f32 %v2778_v50, %v10453_v15  ;;  %v11705_v15 = vld [vmem:[#allocation69_spill] sm:$0xff] }
 0x4d8   :  { %v2781_v56 = vadd.f32 %v2780_v59, %v2466_v13  ;;  %v11697_v13 = vld [vmem:[#allocation39_spill] sm:$0xff]  ;;  %v11698_v59 = vld [vmem:[#allocation41_spill] sm:$0xff] }
 0x4da   :  { %9149 = vtanh.f32 %v2781_v56  ;;  %8250 = vmatpush1.bf16.msra.mxu0 %v11501_v46  ;;  %8277 = vmatpush3.bf16.msra.mxu1 %v9923_v34 }
 0x4db   :  { %8252 = vmatprep.subr.bf16.mxu0 %v11502_v12  ;;  %8278 = vmatprep.subr.bf16.mxu1 %v11494_v47 }
 0x4de   :  { %8254 = vmatpush1.bf16.msra.mxu0 %v9825_v21  ;;  %8280 = vmatpush3.bf16.msra.mxu1 %v9927_v16 }
 0x4df   :  { %8256 = vmatprep.subr.bf16.mxu0 %v9828_v6  ;;  %8281 = vmatprep.subr.bf16.mxu1 %v11494_v47 }
 0x4e2   :  { %8258 = vmatpush1.bf16.msra.mxu0 %v9835_v41  ;;  %8283 = vmatpush3.bf16.msra.mxu1 %v9931_v63  ;;  %v10624_v44 = vpop.f32.mrb[34].mxu1 }
 0x4e3   :  { %8260 = vmatprep.subr.bf16.mxu0 %v9838_v60  ;;  %8284 = vmatprep.subr.bf16.mxu1 %v11494_v47  ;;  %v6641_v26 = vpop.f32.mrb[35].mxu1 }
 0x4e4   :  { %v9150_v18 = vpop.eup %9149  ;;  %v11702_v26 = vld [vmem:[#allocation66_spill] sm:$0xff] }
 0x4e5   :  { %v2784_v31 = vmul.f32 %v9150_v18, %v2783_v5  ;;  %v11701_v5 = vld [vmem:[#allocation45_spill] sm:$0xff] }
 0x4e6   :  { %8262 = vmatpush1.bf16.msra.mxu0 %v9845_v61  ;;  %8286 = vmatpush3.bf16.msra.mxu1 %v9935_v51  ;;  %v3395_v18 = vld [vmem:[#allocation3 + $0x28] sm:$0xff] }
 0x4e7   :  { %v10631_v0 = vadd.f32 %v2785_v38, %v2784_v31  ;;  %8288 = vmatprep.subr.bf16.mxu0 %v9580_v4  ;;  %8319 = vmatprep.subr.bf16.mxu1 %v11494_v47  ;;  %v11703_v31 = vld [vmem:[#allocation20_spill] sm:$0xff]  ;;  %v11704_v38 = vld [vmem:[#allocation21_spill] sm:$0xff] }
 0x4e9   :  { %11691 = vst [vmem:[#allocation24_spill] sm:$0xff] %v10631_v0  ;;  %3281 = vmatmul.mubr.f32.vlgmr.msra.gmra.mrb[18].mxu0 %v10631_v0  ;;  %6745 = vmatmul.mubr.f32.vlgmr.msra.gmra.mrb[40].mxu1 %v10631_v0 }
 0x4ea   :  { %8290 = vmatpush1.bf16.msra.mxu0 %v9584_v9  ;;  %8321 = vmatpush3.bf16.msra.mxu1 %v9679_v62 }
 0x4eb   :  { %8292 = vmatprep.subr.bf16.mxu0 %v9591_v17  ;;  %8322 = vmatprep.subr.bf16.mxu1 %v11494_v47 }
 0x4ec   :  { %3460 = vmatprep.mubr.f32.mxu0 %v11443_v29  ;;  %6779 = vmatprep.mubr.msk.f32.mxu1 %vm9429_vm0, %v11443_v29 }
 0x4ee   :  { %8294 = vmatpush1.bf16.msra.mxu0 %v9596_v22  ;;  %8324 = vmatpush3.bf16.msra.mxu1 %v9693_v24 }
 0x4ef   :  { %8296 = vmatprep.subr.bf16.mxu0 %v11504_v25  ;;  %8325 = vmatprep.subr.bf16.mxu1 %v11494_v47 }
 0x4f2   :  { %8298 = vmatpush1.bf16.msra.mxu0 %v9607_v35  ;;  %8327 = vmatpush3.bf16.msra.mxu1 %v9706_v45 }
 0x4f3   :  { %8300 = vmatprep.subr.bf16.mxu0 %v11558_v10  ;;  %8328 = vmatprep.subr.bf16.mxu1 %v11494_v47 }
 0x4f6   :  { %8302 = vmatpush1.bf16.msra.mxu0 %v11506_v55  ;;  %8330 = vmatpush3.bf16.msra.mxu1 %v11624_v23 }
 0x4f7   :  { %8304 = vmatprep.subr.bf16.mxu0 %v11625_v20  ;;  %8331 = vmatprep.subr.bf16.mxu1 %v11494_v47 }
 0x4fa   :  { %8306 = vmatpush1.bf16.msra.mxu0 %v11692_v14  ;;  %8333 = vmatpush3.bf16.msra.mxu1 %v11693_v33 }
 0x4fb   :  { %8308 = vmatprep.subr.bf16.mxu0 %v11694_v37  ;;  %8334 = vmatprep.subr.bf16.mxu1 %v11494_v47 }
 0x4fe   :  { %8310 = vmatpush1.bf16.msra.mxu0 %v11695_v43  ;;  %8336 = vmatpush3.bf16.msra.mxu1 %v11696_v36 }
 0x4ff   :  { %8312 = vmatprep.subr.bf16.mxu0 %v11697_v13  ;;  %8337 = vmatprep.subr.bf16.mxu1 %v11494_v47 }
 0x502   :  { %8314 = vmatpush1.bf16.msra.mxu0 %v11698_v59  ;;  %8339 = vmatpush3.bf16.msra.mxu1 %v11699_v39  ;;  %v10666_v56 = vpop.f32.mrb[36].mxu1 }
 0x503   :  { %8316 = vmatprep.subr.bf16.mxu0 %v11700_v58  ;;  %8340 = vmatprep.subr.bf16.mxu1 %v11494_v47  ;;  %v6676_v50 = vpop.f32.mrb[37].mxu1  ;;  %v11715_v58 = vld [vmem:[#allocation32_spill] sm:$0xff] }
 0x504   :  { %v11707_v50 = vld [vmem:[#allocation23_spill] sm:$0xff] }
 0x506   :  { %8318 = vmatpush1.bf16.msra.mxu0 %v11701_v5  ;;  %8342 = vmatpush3.bf16.msra.mxu1 %v11702_v26  ;;  %v11709_v26 = vld [vmem:[#allocation25_spill] sm:$0xff]  ;;  %v11714_v5 = vld [vmem:[#allocation78_spill] sm:$0xff] }
 0x507   :  { %8344 = vmatprep.subr.bf16.mxu0 %v11703_v31  ;;  %8375 = vmatprep.subr.bf16.mxu1 %v11494_v47  ;;  %v11708_v31 = vld [vmem:[#allocation72_spill] sm:$0xff] }
 0x509   :  { %3461 = vmatmul.mubr.f32.vlgmr.msra.gmra.mrb[20].mxu0 %v3395_v18  ;;  %6780 = vmatmul.mubr.f32.vlgmr.msra.gmra.mrb[42].mxu1 %v3395_v18  ;;  %v11710_v18 = vld [vmem:[#allocation26_spill] sm:$0xff] }
 0x50a   :  { %8346 = vmatpush1.bf16.msra.mxu0 %v11704_v38  ;;  %8377 = vmatpush3.bf16.msra.mxu1 %v11705_v15  ;;  %v11711_v15 = vld [vmem:[#allocation75_spill] sm:$0xff]  ;;  %v11713_v38 = vld [vmem:[#allocation30_spill] sm:$0xff] }
 0x50b   :  { %8348 = vmatprep.subr.bf16.mxu0 %v11706_v57  ;;  %8378 = vmatprep.subr.bf16.mxu1 %v11494_v47  ;;  %v11712_v57 = vld [vmem:[#allocation28_spill] sm:$0xff] }
 0x50c   :  { %3602 = vmatprep.mubr.f32.mxu0 %v11443_v29  ;;  %6814 = vmatprep.mubr.msk.f32.mxu1 %vm9429_vm0, %v11443_v29 }
 0x50e   :  { %8350 = vmatpush1.bf16.msra.mxu0 %v11707_v50  ;;  %8380 = vmatpush3.bf16.msra.mxu1 %v11708_v31  ;;  %v11716_v31 = vld [vmem:[#allocation34_spill] sm:$0xff]  ;;  %v11718_v50 = vld [vmem:[#allocation36_spill] sm:$0xff] }
 0x50f   :  { %8352 = vmatprep.subr.bf16.mxu0 %v11709_v26  ;;  %8381 = vmatprep.subr.bf16.mxu1 %v11494_v47  ;;  %v11717_v26 = vld [vmem:[#allocation81_spill] sm:$0xff] }
 0x512   :  { %8354 = vmatpush1.bf16.msra.mxu0 %v11710_v18  ;;  %8383 = vmatpush3.bf16.msra.mxu1 %v11711_v15  ;;  %v11719_v15 = vld [vmem:[#allocation38_spill] sm:$0xff]  ;;  %v11721_v18 = vld [vmem:[#allocation40_spill] sm:$0xff] }
 0x513   :  { %8356 = vmatprep.subr.bf16.mxu0 %v11712_v57  ;;  %8384 = vmatprep.subr.bf16.mxu1 %v11494_v47  ;;  %v11720_v57 = vld [vmem:[#allocation84_spill] sm:$0xff] }
 0x516   :  { %8358 = vmatpush1.bf16.msra.mxu0 %v11713_v38  ;;  %8386 = vmatpush3.bf16.msra.mxu1 %v11714_v5  ;;  %v11722_v5 = vld [vmem:[#allocation42_spill] sm:$0xff]  ;;  %v11724_v38 = vld [vmem:[#allocation44_spill] sm:$0xff] }
 0x517   :  { %8360 = vmatprep.subr.bf16.mxu0 %v11715_v58  ;;  %8387 = vmatprep.subr.bf16.mxu1 %v11494_v47  ;;  %v11723_v58 = vld [vmem:[#allocation85_spill] sm:$0xff] }
 0x51a   :  { %8362 = vmatpush1.bf16.msra.mxu0 %v11716_v31  ;;  %8389 = vmatpush3.bf16.msra.mxu1 %v11717_v26  ;;  %v11725_v26 = vld [vmem:[#allocation46_spill] sm:$0xff] }
 0x51b   :  { %8364 = vmatprep.subr.bf16.mxu0 %v11718_v50  ;;  %8390 = vmatprep.subr.bf16.mxu1 %v11494_v47  ;;  %v11726_v50 = vld [vmem:[#allocation86_spill] sm:$0xff] }
 0x51c   :  { %v3537_v31 = vld [vmem:[#allocation3 + $0x10] sm:$0xff] }
 0x51e   :  { %8366 = vmatpush1.bf16.msra.mxu0 %v11719_v15  ;;  %8392 = vmatpush3.bf16.msra.mxu1 %v11720_v57  ;;  %v11727_v15 = vld [vmem:[#allocation47_spill] sm:$0xff]  ;;  %v11739_v57 = vld [vmem:[#allocation56_spill] sm:$0xff] }
 0x51f   :  { %8368 = vmatprep.subr.bf16.mxu0 %v11721_v18  ;;  %8393 = vmatprep.subr.bf16.mxu1 %v11494_v47  ;;  %v11728_v18 = vld [vmem:[#allocation48_spill] sm:$0xff] }
 0x522   :  { %8370 = vmatpush1.bf16.msra.mxu0 %v11722_v5  ;;  %8395 = vmatpush3.bf16.msra.mxu1 %v11723_v58  ;;  %v11729_v5 = vld [vmem:[#allocation87_spill] sm:$0xff]  ;;  %v11730_v58 = vld [vmem:[#allocation49_spill] sm:$0xff] }
 0x523   :  { %8372 = vmatprep.subr.bf16.mxu0 %v11724_v38  ;;  %8396 = vmatprep.subr.bf16.mxu1 %v11494_v47  ;;  %v11738_v38 = vld [vmem:[#allocation90_spill] sm:$0xff] }
 0x526   :  { %8374 = vmatpush1.bf16.msra.mxu0 %v11725_v26  ;;  %8398 = vmatpush3.bf16.msra.mxu1 %v11726_v50  ;;  %v11731_v50 = vld [vmem:[#allocation50_spill] sm:$0xff]  ;;  %v11733_v26 = vld [vmem:[#allocation51_spill] sm:$0xff] }
 0x527   :  { %8400 = vmatprep.subr.bf16.mxu0 %v11727_v15  ;;  %8431 = vmatprep.subr.bf16.mxu1 %v11494_v47  ;;  %v11732_v15 = vld [vmem:[#allocation88_spill] sm:$0xff] }
 0x529   :  { %3603 = vmatmul.mubr.f32.vlgmr.msra.gmra.mrb[22].mxu0 %v3537_v31  ;;  %6815 = vmatmul.mubr.f32.vlgmr.msra.gmra.mrb[44].mxu1 %v3537_v31  ;;  %v11734_v31 = vld [vmem:[#allocation52_spill] sm:$0xff] }
 0x52a   :  { %8402 = vmatpush1.bf16.msra.mxu0 %v11728_v18  ;;  %8433 = vmatpush3.bf16.msra.mxu1 %v11729_v5  ;;  %v11735_v5 = vld [vmem:[#allocation89_spill] sm:$0xff]  ;;  %v11737_v18 = vld [vmem:[#allocation55_spill] sm:$0xff] }
 0x52b   :  { %8404 = vmatprep.subr.bf16.mxu0 %v11730_v58  ;;  %8434 = vmatprep.subr.bf16.mxu1 %v11494_v47  ;;  %v11736_v58 = vld [vmem:[#allocation53_spill] sm:$0xff] }
 0x52c   :  { %3743 = vmatprep.mubr.f32.mxu0 %v11443_v29  ;;  %6849 = vmatprep.mubr.msk.f32.mxu1 %vm9429_vm0, %v11443_v29 }
 0x52e   :  { %8406 = vmatpush1.bf16.msra.mxu0 %v11731_v50  ;;  %8436 = vmatpush3.bf16.msra.mxu1 %v11732_v15  ;;  %v11740_v15 = vld [vmem:[#allocation58_spill] sm:$0xff]  ;;  %v11742_v50 = vld [vmem:[#allocation59_spill] sm:$0xff] }
 0x52f   :  { %8408 = vmatprep.subr.bf16.mxu0 %v11733_v26  ;;  %8437 = vmatprep.subr.bf16.mxu1 %v11494_v47  ;;  %v11741_v26 = vld [vmem:[#allocation91_spill] sm:$0xff] }
 0x532   :  { %8410 = vmatpush1.bf16.msra.mxu0 %v11734_v31  ;;  %8439 = vmatpush3.bf16.msra.mxu1 %v11735_v5  ;;  %v11743_v5 = vld [vmem:[#allocation61_spill] sm:$0xff]  ;;  %v11745_v31 = vld [vmem:[#allocation62_spill] sm:$0xff] }
 0x533   :  { %8412 = vmatprep.subr.bf16.mxu0 %v11736_v58  ;;  %8440 = vmatprep.subr.bf16.mxu1 %v11494_v47  ;;  %v11744_v58 = vld [vmem:[#allocation92_spill] sm:$0xff] }
 0x536   :  { %8414 = vmatpush1.bf16.msra.mxu0 %v11737_v18  ;;  %8442 = vmatpush3.bf16.msra.mxu1 %v11738_v38  ;;  %v11746_v38 = vld [vmem:[#allocation64_spill] sm:$0xff]  ;;  %v11748_v18 = vld [vmem:[#allocation65_spill] sm:$0xff] }
 0x537   :  { %8416 = vmatprep.subr.bf16.mxu0 %v11739_v57  ;;  %8443 = vmatprep.subr.bf16.mxu1 %v11494_v47  ;;  %v11747_v57 = vld [vmem:[#allocation93_spill] sm:$0xff] }
 0x53a   :  { %8418 = vmatpush1.bf16.msra.mxu0 %v11740_v15  ;;  %8445 = vmatpush3.bf16.msra.mxu1 %v11741_v26  ;;  %v11749_v26 = vld [vmem:[#allocation67_spill] sm:$0xff]  ;;  %v11751_v15 = vld [vmem:[#allocation68_spill] sm:$0xff] }
 0x53b   :  { %8420 = vmatprep.subr.bf16.mxu0 %v11742_v50  ;;  %8446 = vmatprep.subr.bf16.mxu1 %v11494_v47  ;;  %v11750_v50 = vld [vmem:[#allocation94_spill] sm:$0xff] }
 0x53e   :  { %8422 = vmatpush1.bf16.msra.mxu0 %v11743_v5  ;;  %8448 = vmatpush3.bf16.msra.mxu1 %v11744_v58  ;;  %v11752_v5 = vld [vmem:[#allocation98_spill] sm:$0xff] }
 0x53f   :  { %8424 = vmatprep.subr.bf16.mxu0 %v11745_v31  ;;  %8449 = vmatprep.subr.bf16.mxu1 %v11494_v47 }
 0x542   :  { %8426 = vmatpush1.bf16.msra.mxu0 %v11746_v38  ;;  %8451 = vmatpush3.bf16.msra.mxu1 %v11747_v57  ;;  %v11753_v57 = vld [vmem:[#allocation99_spill] sm:$0xff] }
 0x543   :  { %8428 = vmatprep.subr.bf16.mxu0 %v11748_v18  ;;  %8452 = vmatprep.subr.bf16.mxu1 %v11494_v47 }
 0x546   :  { %8430 = vmatpush1.bf16.msra.mxu0 %v11749_v26  ;;  %8454 = vmatpush3.bf16.msra.mxu1 %v11750_v50  ;;  %v11754_v50 = vld [vmem:[#allocation82_spill] sm:$0xff] }
 0x547   :  { %8456 = vmatprep.subr.bf16.mxu0 %v11751_v15  ;;  %8487 = vmatprep.subr.bf16.mxu1 %v11494_v47  ;;  %v2930_v15 = vadd.f32 %v10624_v44, %v10054_v3 }
 0x59c   :  { %v3141_v58 = vpop.f32.mrb[16].mxu0  ;;  %v3212_v31 = vpop.f32.mrb[38].mxu1 }
 0x59d   :  { %v9041_v39 = vadd.f32 %v3141_v58, %v11752_v5  ;;  %v3143_v59 = vpop.f32.mrb[17].mxu0  ;;  %v6711_v38 = vpop.f32.mrb[39].mxu1  ;;  %v3367_v33 = vadd.f32 %v11754_v50, %v3212_v31 }
 0x59e   :  { %v9042_v36 = vadd.f32 %v3143_v59, %v11753_v57 }
 0x59f   :  { %v3358_v13 = vmul.f32 0.5, %v9041_v39 }
 0x5a0   :  { %v3363_v18 = vmul.f32 0.5, %v9042_v36 }
 0x5a1   :  { %9151 = vtanh.f32 %v3358_v13 }
 0x5a2   :  { %9153 = vtanh.f32 %v3363_v18 }
 0x5ab   :  { %v9152_v43 = vpop.eup %9151 }
 0x5ac   :  { %v3360_v26 = vmul.f32 0.5, %v9152_v43  ;;  %v9154_v20 = vpop.eup %9153 }
 0x5ad   :  { %v3365_v58 = vmul.f32 0.5, %v9154_v20 }
 0x5ae   :  { %v3361_v37 = vadd.f32 0.5, %v3360_v26 }
 0x5af   :  { %v3366_v38 = vadd.f32 0.5, %v3365_v58 }
 0x5b0   :  { %v3368_v14 = vmul.f32 %v3367_v33, %v3361_v37 }
 0x5b1   :  { %v3371_v59 = vsub.f32 1.0, %v3366_v38  ;;  %v3373_v31 = vmul.f32 %v3366_v38, %v10583_v52  ;;  %v11770_v52 = vld [vmem:[#allocation69_spill] sm:$0xff] }
 0x5b2   :  { %v3369_v23 = vadd.f32 %v3368_v14, %v2930_v15 }
 0x5b4   :  { %9155 = vtanh.f32 %v3369_v23 }
 0x5bc   :  { %v3282_v39 = vpop.f32.mrb[18].mxu0  ;;  %v3353_v5 = vpop.f32.mrb[40].mxu1 }
 0x5bd   :  { %v9043_v36 = vadd.f32 %v3282_v39, %v10062_v7  ;;  %v3284_v13 = vpop.f32.mrb[19].mxu0  ;;  %v6746_v18 = vpop.f32.mrb[41].mxu1  ;;  %v3385_v37 = vadd.f32 %v10605_v28, %v3353_v5 }
 0x5be   :  { %v9156_v43 = vpop.eup %9155  ;;  %v9044_v44 = vadd.f32 %v3284_v13, %v10066_v1 }
 0x5bf   :  { %v3372_v26 = vmul.f32 %v9156_v43, %v3371_v59  ;;  %v3376_v50 = vmul.f32 0.5, %v9043_v36 }
 0x5c0   :  { %v3381_v15 = vmul.f32 0.5, %v9044_v44  ;;  %v11755_v44 = vld [vmem:[#allocation54_spill] sm:$0xff] }
 0x5c1   :  { %9157 = vtanh.f32 %v3376_v50  ;;  %v10752_v33 = vadd.f32 %v3373_v31, %v3372_v26  ;;  %v3072_v50 = vadd.f32 %v10666_v56, %v10089_v2 }
 0x5c2   :  { %9159 = vtanh.f32 %v3381_v15  ;;  %v11756_v15 = vld [vmem:[#allocation31_spill] sm:$0xff] }
 0x5c3   :  { %3744 = vmatmul.mubr.f32.vlgmr.msra.gmra.mrb[20].mxu0 %v10752_v33  ;;  %6850 = vmatmul.mubr.f32.vlgmr.msra.gmra.mrb[46].mxu1 %v10752_v33 }
 0x5c4   :  { %8458 = vmatpush1.bf16.msra.mxu0 %v11492_v54  ;;  %8489 = vmatpush3.bf16.msra.mxu1 %v9902_v40 }
 0x5c5   :  { %8460 = vmatprep.subr.bf16.mxu0 %v11493_v19  ;;  %8490 = vmatprep.subr.bf16.mxu1 %v11494_v47 }
 0x5c6   :  { %3884 = vmatprep.mubr.f32.mxu0 %v11443_v29  ;;  %6884 = vmatprep.mubr.msk.f32.mxu1 %vm9429_vm0, %v11443_v29 }
 0x5c8   :  { %8462 = vmatpush1.bf16.msra.mxu0 %v11495_v11  ;;  %8492 = vmatpush3.bf16.msra.mxu1 %v9909_v53 }
 0x5c9   :  { %8464 = vmatprep.subr.bf16.mxu0 %v11496_v27  ;;  %8493 = vmatprep.subr.bf16.mxu1 %v11494_v47 }
 0x5cb   :  { %v9158_v23 = vpop.eup %9157 }
 0x5cc   :  { %v3378_v20 = vmul.f32 0.5, %v9158_v23  ;;  %8466 = vmatpush1.bf16.msra.mxu0 %v11497_v49  ;;  %8495 = vmatpush3.bf16.msra.mxu1 %v11555_v30  ;;  %v9160_v38 = vpop.eup %9159  ;;  %v11757_v23 = vld [vmem:[#allocation33_spill] sm:$0xff] }
 0x5cd   :  { %8468 = vmatprep.subr.bf16.mxu0 %v11556_v48  ;;  %8496 = vmatprep.subr.bf16.mxu1 %v11494_v47  ;;  %v3383_v5 = vmul.f32 0.5, %v9160_v38  ;;  %v11763_v38 = vld [vmem:[#allocation41_spill] sm:$0xff] }
 0x5ce   :  { %v3379_v14 = vadd.f32 0.5, %v3378_v20  ;;  %v11758_v20 = vld [vmem:[#allocation57_spill] sm:$0xff] }
 0x5cf   :  { %v3384_v56 = vadd.f32 0.5, %v3383_v5 }
 0x5d0   :  { %v3386_v58 = vmul.f32 %v3385_v37, %v3379_v14  ;;  %8470 = vmatpush1.bf16.msra.mxu0 %v11499_v42  ;;  %8498 = vmatpush3.bf16.msra.mxu1 %v9919_v8  ;;  %v11759_v14 = vld [vmem:[#allocation35_spill] sm:$0xff]  ;;  %v11760_v37 = vld [vmem:[#allocation37_spill] sm:$0xff] }
 0x5d1   :  { %8472 = vmatprep.subr.bf16.mxu0 %v11500_v32  ;;  %8499 = vmatprep.subr.bf16.mxu1 %v11494_v47  ;;  %v3389_v36 = vsub.f32 1.0, %v3384_v56  ;;  %v3391_v26 = vmul.f32 %v3384_v56, %v10631_v0  ;;  %v11765_v56 = vld [vmem:[#allocation43_spill] sm:$0xff]  ;;  %v11769_v0 = vld [vmem:[#allocation21_spill] sm:$0xff] }
 0x5d2   :  { %v3387_v39 = vadd.f32 %v3386_v58, %v3072_v50  ;;  %v11761_v50 = vld [vmem:[#allocation60_spill] sm:$0xff]  ;;  %v11762_v58 = vld [vmem:[#allocation39_spill] sm:$0xff] }
 0x5d4   :  { %9161 = vtanh.f32 %v3387_v39  ;;  %8474 = vmatpush1.bf16.msra.mxu0 %v11501_v46  ;;  %8501 = vmatpush3.bf16.msra.mxu1 %v9923_v34  ;;  %v11764_v39 = vld [vmem:[#allocation63_spill] sm:$0xff] }
 0x5d5   :  { %8476 = vmatprep.subr.bf16.mxu0 %v11502_v12  ;;  %8502 = vmatprep.subr.bf16.mxu1 %v11494_v47 }
 0x5d8   :  { %8478 = vmatpush1.bf16.msra.mxu0 %v9825_v21  ;;  %8504 = vmatpush3.bf16.msra.mxu1 %v9927_v16 }
 0x5d9   :  { %8480 = vmatprep.subr.bf16.mxu0 %v9828_v6  ;;  %8505 = vmatprep.subr.bf16.mxu1 %v11494_v47 }
 0x5dc   :  { %8482 = vmatpush1.bf16.msra.mxu0 %v9835_v41  ;;  %8507 = vmatpush3.bf16.msra.mxu1 %v9931_v63  ;;  %v10788_v59 = vpop.f32.mrb[42].mxu1 }
 0x5dd   :  { %8484 = vmatprep.subr.bf16.mxu0 %v9838_v60  ;;  %8508 = vmatprep.subr.bf16.mxu1 %v11494_v47  ;;  %v6781_v13 = vpop.f32.mrb[43].mxu1 }
 0x5de   :  { %v9162_v18 = vpop.eup %9161  ;;  %v11766_v13 = vld [vmem:[#allocation45_spill] sm:$0xff] }
 0x5df   :  { %v3390_v43 = vmul.f32 %v9162_v18, %v3389_v36  ;;  %v11767_v18 = vld [vmem:[#allocation66_spill] sm:$0xff] }
 0x5e0   :  { %8486 = vmatpush1.bf16.msra.mxu0 %v9845_v61  ;;  %8510 = vmatpush3.bf16.msra.mxu1 %v9935_v51 }
 0x5e1   :  { %v10795_v31 = vadd.f32 %v3391_v26, %v3390_v43  ;;  %8512 = vmatprep.subr.bf16.mxu0 %v9580_v4  ;;  %8543 = vmatprep.subr.bf16.mxu1 %v11494_v47  ;;  %v3999_v43 = vld [vmem:[#allocation3 + $0x30] sm:$0xff]  ;;  %v11768_v26 = vld [vmem:[#allocation20_spill] sm:$0xff] }
 0x5e3   :  { %3885 = vmatmul.mubr.f32.vlgmr.msra.gmra.mrb[22].mxu0 %v10795_v31  ;;  %6885 = vmatmul.mubr.f32.vlgmr.msra.gmra.mrb[48].mxu1 %v10795_v31 }
 0x5e4   :  { %8514 = vmatpush1.bf16.msra.mxu0 %v9584_v9  ;;  %8545 = vmatpush3.bf16.msra.mxu1 %v9679_v62 }
 0x5e5   :  { %8516 = vmatprep.subr.bf16.mxu0 %v9591_v17  ;;  %8546 = vmatprep.subr.bf16.mxu1 %v11494_v47 }
 0x5e6   :  { %4064 = vmatprep.mubr.f32.mxu0 %v11443_v29  ;;  %6919 = vmatprep.mubr.msk.f32.mxu1 %vm9429_vm0, %v11443_v29 }
 0x5e8   :  { %8518 = vmatpush1.bf16.msra.mxu0 %v9596_v22  ;;  %8548 = vmatpush3.bf16.msra.mxu1 %v9693_v24 }
 0x5e9   :  { %8520 = vmatprep.subr.bf16.mxu0 %v11504_v25  ;;  %8549 = vmatprep.subr.bf16.mxu1 %v11494_v47 }
 0x5ec   :  { %8522 = vmatpush1.bf16.msra.mxu0 %v9607_v35  ;;  %8551 = vmatpush3.bf16.msra.mxu1 %v9706_v45 }
 0x5ed   :  { %8524 = vmatprep.subr.bf16.mxu0 %v11558_v10  ;;  %8552 = vmatprep.subr.bf16.mxu1 %v11494_v47 }
 0x5f0   :  { %8526 = vmatpush1.bf16.msra.mxu0 %v11506_v55  ;;  %8554 = vmatpush3.bf16.msra.mxu1 %v11755_v44 }
 0x5f1   :  { %8528 = vmatprep.subr.bf16.mxu0 %v11756_v15  ;;  %8555 = vmatprep.subr.bf16.mxu1 %v11494_v47 }
 0x5f4   :  { %8530 = vmatpush1.bf16.msra.mxu0 %v11757_v23  ;;  %8557 = vmatpush3.bf16.msra.mxu1 %v11758_v20 }
 0x5f5   :  { %8532 = vmatprep.subr.bf16.mxu0 %v11759_v14  ;;  %8558 = vmatprep.subr.bf16.mxu1 %v11494_v47 }
 0x5f8   :  { %8534 = vmatpush1.bf16.msra.mxu0 %v11760_v37  ;;  %8560 = vmatpush3.bf16.msra.mxu1 %v11761_v50 }
 0x5f9   :  { %8536 = vmatprep.subr.bf16.mxu0 %v11762_v58  ;;  %8561 = vmatprep.subr.bf16.mxu1 %v11494_v47 }
 0x5fc   :  { %8538 = vmatpush1.bf16.msra.mxu0 %v11763_v38  ;;  %8563 = vmatpush3.bf16.msra.mxu1 %v11764_v39  ;;  %v10830_v5 = vpop.f32.mrb[44].mxu1  ;;  %v11771_v39 = vld [vmem:[#allocation22_spill] sm:$0xff] }
 0x5fd   :  { %8540 = vmatprep.subr.bf16.mxu0 %v11765_v56  ;;  %8564 = vmatprep.subr.bf16.mxu1 %v11494_v47  ;;  %v6816_v36 = vpop.f32.mrb[45].mxu1  ;;  %v11780_v56 = vld [vmem:[#allocation32_spill] sm:$0xff] }
 0x5fe   :  { %v11772_v36 = vld [vmem:[#allocation23_spill] sm:$0xff] }
 0x600   :  { %8542 = vmatpush1.bf16.msra.mxu0 %v11766_v13  ;;  %8566 = vmatpush3.bf16.msra.mxu1 %v11767_v18  ;;  %v11774_v18 = vld [vmem:[#allocation25_spill] sm:$0xff]  ;;  %v11779_v13 = vld [vmem:[#allocation78_spill] sm:$0xff] }
 0x601   :  { %8568 = vmatprep.subr.bf16.mxu0 %v11768_v26  ;;  %8599 = vmatprep.subr.bf16.mxu1 %v11494_v47  ;;  %v11773_v26 = vld [vmem:[#allocation72_spill] sm:$0xff] }
 0x603   :  { %4065 = vmatmul.mubr.f32.vlgmr.msra.gmra.mrb[24].mxu0 %v3999_v43  ;;  %6920 = vmatmul.mubr.f32.vlgmr.msra.gmra.mrb[50].mxu1 %v3999_v43  ;;  %v11775_v43 = vld [vmem:[#allocation26_spill] sm:$0xff] }
 0x604   :  { %8570 = vmatpush1.bf16.msra.mxu0 %v11769_v0  ;;  %8601 = vmatpush3.bf16.msra.mxu1 %v11770_v52  ;;  %v11776_v52 = vld [vmem:[#allocation75_spill] sm:$0xff]  ;;  %v11778_v0 = vld [vmem:[#allocation30_spill] sm:$0xff] }
 0x605   :  { %8572 = vmatprep.subr.bf16.mxu0 %v11771_v39  ;;  %8602 = vmatprep.subr.bf16.mxu1 %v11494_v47  ;;  %v11777_v39 = vld [vmem:[#allocation28_spill] sm:$0xff] }
 0x606   :  { %4206 = vmatprep.mubr.f32.mxu0 %v11443_v29  ;;  %6954 = vmatprep.mubr.msk.f32.mxu1 %vm9429_vm0, %v11443_v29 }
 0x608   :  { %8574 = vmatpush1.bf16.msra.mxu0 %v11772_v36  ;;  %8604 = vmatpush3.bf16.msra.mxu1 %v11773_v26  ;;  %v11781_v26 = vld [vmem:[#allocation34_spill] sm:$0xff]  ;;  %v11783_v36 = vld [vmem:[#allocation36_spill] sm:$0xff] }
 0x609   :  { %8576 = vmatprep.subr.bf16.mxu0 %v11774_v18  ;;  %8605 = vmatprep.subr.bf16.mxu1 %v11494_v47  ;;  %v11782_v18 = vld [vmem:[#allocation81_spill] sm:$0xff] }
 0x60c   :  { %8578 = vmatpush1.bf16.msra.mxu0 %v11775_v43  ;;  %8607 = vmatpush3.bf16.msra.mxu1 %v11776_v52  ;;  %v11784_v52 = vld [vmem:[#allocation38_spill] sm:$0xff]  ;;  %v11786_v43 = vld [vmem:[#allocation40_spill] sm:$0xff] }
 0x60d   :  { %8580 = vmatprep.subr.bf16.mxu0 %v11777_v39  ;;  %8608 = vmatprep.subr.bf16.mxu1 %v11494_v47  ;;  %v11785_v39 = vld [vmem:[#allocation84_spill] sm:$0xff] }
 0x610   :  { %8582 = vmatpush1.bf16.msra.mxu0 %v11778_v0  ;;  %8610 = vmatpush3.bf16.msra.mxu1 %v11779_v13  ;;  %v11787_v13 = vld [vmem:[#allocation42_spill] sm:$0xff]  ;;  %v11789_v0 = vld [vmem:[#allocation44_spill] sm:$0xff] }
 0x611   :  { %8584 = vmatprep.subr.bf16.mxu0 %v11780_v56  ;;  %8611 = vmatprep.subr.bf16.mxu1 %v11494_v47  ;;  %v11788_v56 = vld [vmem:[#allocation85_spill] sm:$0xff] }
 0x614   :  { %8586 = vmatpush1.bf16.msra.mxu0 %v11781_v26  ;;  %8613 = vmatpush3.bf16.msra.mxu1 %v11782_v18  ;;  %v11790_v18 = vld [vmem:[#allocation46_spill] sm:$0xff]  ;;  %v4141_v26 = vld [vmem:[#allocation3 + $0x8] sm:$0xff] }
 0x615   :  { %8588 = vmatprep.subr.bf16.mxu0 %v11783_v36  ;;  %8614 = vmatprep.subr.bf16.mxu1 %v11494_v47  ;;  %v11791_v36 = vld [vmem:[#allocation86_spill] sm:$0xff] }
 0x618   :  { %8590 = vmatpush1.bf16.msra.mxu0 %v11784_v52  ;;  %8616 = vmatpush3.bf16.msra.mxu1 %v11785_v39  ;;  %v11792_v52 = vld [vmem:[#allocation47_spill] sm:$0xff]  ;;  %v11804_v39 = vld [vmem:[#allocation56_spill] sm:$0xff] }
 0x619   :  { %8592 = vmatprep.subr.bf16.mxu0 %v11786_v43  ;;  %8617 = vmatprep.subr.bf16.mxu1 %v11494_v47  ;;  %v11793_v43 = vld [vmem:[#allocation48_spill] sm:$0xff] }
 0x61c   :  { %8594 = vmatpush1.bf16.msra.mxu0 %v11787_v13  ;;  %8619 = vmatpush3.bf16.msra.mxu1 %v11788_v56  ;;  %v11794_v13 = vld [vmem:[#allocation87_spill] sm:$0xff]  ;;  %v11795_v56 = vld [vmem:[#allocation49_spill] sm:$0xff] }
 0x61d   :  { %8596 = vmatprep.subr.bf16.mxu0 %v11789_v0  ;;  %8620 = vmatprep.subr.bf16.mxu1 %v11494_v47  ;;  %v11803_v0 = vld [vmem:[#allocation90_spill] sm:$0xff] }
 0x620   :  { %8598 = vmatpush1.bf16.msra.mxu0 %v11790_v18  ;;  %8622 = vmatpush3.bf16.msra.mxu1 %v11791_v36  ;;  %v11796_v36 = vld [vmem:[#allocation50_spill] sm:$0xff]  ;;  %v11798_v18 = vld [vmem:[#allocation51_spill] sm:$0xff] }
 0x621   :  { %8624 = vmatprep.subr.bf16.mxu0 %v11792_v52  ;;  %8655 = vmatprep.subr.bf16.mxu1 %v11494_v47  ;;  %v11797_v52 = vld [vmem:[#allocation88_spill] sm:$0xff] }
 0x623   :  { %4207 = vmatmul.mubr.f32.vlgmr.msra.gmra.mrb[26].mxu0 %v4141_v26  ;;  %6955 = vmatmul.mubr.f32.vlgmr.msra.gmra.mrb[52].mxu1 %v4141_v26  ;;  %v11799_v26 = vld [vmem:[#allocation52_spill] sm:$0xff] }
 0x624   :  { %8626 = vmatpush1.bf16.msra.mxu0 %v11793_v43  ;;  %8657 = vmatpush3.bf16.msra.mxu1 %v11794_v13  ;;  %v11800_v13 = vld [vmem:[#allocation89_spill] sm:$0xff]  ;;  %v11802_v43 = vld [vmem:[#allocation55_spill] sm:$0xff] }
 0x625   :  { %8628 = vmatprep.subr.bf16.mxu0 %v11795_v56  ;;  %8658 = vmatprep.subr.bf16.mxu1 %v11494_v47  ;;  %v11801_v56 = vld [vmem:[#allocation53_spill] sm:$0xff] }
 0x626   :  { %4347 = vmatprep.mubr.f32.mxu0 %v11443_v29  ;;  %6989 = vmatprep.mubr.msk.f32.mxu1 %vm9429_vm0, %v11443_v29 }
 0x628   :  { %8630 = vmatpush1.bf16.msra.mxu0 %v11796_v36  ;;  %8660 = vmatpush3.bf16.msra.mxu1 %v11797_v52  ;;  %v11805_v52 = vld [vmem:[#allocation58_spill] sm:$0xff]  ;;  %v11807_v36 = vld [vmem:[#allocation59_spill] sm:$0xff] }
 0x629   :  { %8632 = vmatprep.subr.bf16.mxu0 %v11798_v18  ;;  %8661 = vmatprep.subr.bf16.mxu1 %v11494_v47  ;;  %v11806_v18 = vld [vmem:[#allocation91_spill] sm:$0xff] }
 0x62c   :  { %8634 = vmatpush1.bf16.msra.mxu0 %v11799_v26  ;;  %8663 = vmatpush3.bf16.msra.mxu1 %v11800_v13  ;;  %v11808_v13 = vld [vmem:[#allocation61_spill] sm:$0xff]  ;;  %v11810_v26 = vld [vmem:[#allocation62_spill] sm:$0xff] }
 0x62d   :  { %8636 = vmatprep.subr.bf16.mxu0 %v11801_v56  ;;  %8664 = vmatprep.subr.bf16.mxu1 %v11494_v47  ;;  %v11809_v56 = vld [vmem:[#allocation92_spill] sm:$0xff] }
 0x630   :  { %8638 = vmatpush1.bf16.msra.mxu0 %v11802_v43  ;;  %8666 = vmatpush3.bf16.msra.mxu1 %v11803_v0  ;;  %v11811_v0 = vld [vmem:[#allocation64_spill] sm:$0xff]  ;;  %v11813_v43 = vld [vmem:[#allocation65_spill] sm:$0xff] }
 0x631   :  { %8640 = vmatprep.subr.bf16.mxu0 %v11804_v39  ;;  %8667 = vmatprep.subr.bf16.mxu1 %v11494_v47  ;;  %v11812_v39 = vld [vmem:[#allocation93_spill] sm:$0xff] }
 0x634   :  { %8642 = vmatpush1.bf16.msra.mxu0 %v11805_v52  ;;  %8669 = vmatpush3.bf16.msra.mxu1 %v11806_v18  ;;  %v11814_v18 = vld [vmem:[#allocation67_spill] sm:$0xff]  ;;  %v11816_v52 = vld [vmem:[#allocation68_spill] sm:$0xff] }
 0x635   :  { %8644 = vmatprep.subr.bf16.mxu0 %v11807_v36  ;;  %8670 = vmatprep.subr.bf16.mxu1 %v11494_v47  ;;  %v11815_v36 = vld [vmem:[#allocation94_spill] sm:$0xff] }
 0x638   :  { %8646 = vmatpush1.bf16.msra.mxu0 %v11808_v13  ;;  %8672 = vmatpush3.bf16.msra.mxu1 %v11809_v56  ;;  %v11817_v13 = vld [vmem:[#allocation98_spill] sm:$0xff] }
 0x639   :  { %8648 = vmatprep.subr.bf16.mxu0 %v11810_v26  ;;  %8673 = vmatprep.subr.bf16.mxu1 %v11494_v47 }
 0x63c   :  { %8650 = vmatpush1.bf16.msra.mxu0 %v11811_v0  ;;  %8675 = vmatpush3.bf16.msra.mxu1 %v11812_v39 }
 0x63d   :  { %8652 = vmatprep.subr.bf16.mxu0 %v11813_v43  ;;  %8676 = vmatprep.subr.bf16.mxu1 %v11494_v47 }
 0x640   :  { %8654 = vmatpush1.bf16.msra.mxu0 %v11814_v18  ;;  %8678 = vmatpush3.bf16.msra.mxu1 %v11815_v36  ;;  %v11818_v36 = vld [vmem:[#allocation82_spill] sm:$0xff] }
 0x641   :  { %8680 = vmatprep.subr.bf16.mxu0 %v11816_v52  ;;  %8711 = vmatprep.subr.bf16.mxu1 %v11494_v47  ;;  %v3534_v52 = vadd.f32 %v10788_v59, %v10054_v3 }
 0x696   :  { %v3745_v56 = vpop.f32.mrb[20].mxu0  ;;  %v3816_v26 = vpop.f32.mrb[46].mxu1 }
 0x697   :  { %v9045_v38 = vadd.f32 %v3745_v56, %v11817_v13  ;;  %v3747_v58 = vpop.f32.mrb[21].mxu0  ;;  %v6851_v0 = vpop.f32.mrb[47].mxu1  ;;  %v3971_v20 = vadd.f32 %v11818_v36, %v3816_v26 }
 0x698   :  { %v9046_v39 = vadd.f32 %v3747_v58, %v11753_v57 }
 0x699   :  { %v3962_v50 = vmul.f32 0.5, %v9045_v38 }
 0x69a   :  { %v3967_v43 = vmul.f32 0.5, %v9046_v39 }
 0x69b   :  { %9163 = vtanh.f32 %v3962_v50 }
 0x69c   :  { %9165 = vtanh.f32 %v3967_v43 }
 0x6a5   :  { %v9164_v37 = vpop.eup %9163 }
 0x6a6   :  { %v3964_v18 = vmul.f32 0.5, %v9164_v37  ;;  %v9166_v15 = vpop.eup %9165 }
 0x6a7   :  { %v3969_v56 = vmul.f32 0.5, %v9166_v15 }
 0x6a8   :  { %v3965_v14 = vadd.f32 0.5, %v3964_v18 }
 0x6a9   :  { %v3970_v0 = vadd.f32 0.5, %v3969_v56  ;;  %v3676_v56 = vadd.f32 %v10830_v5, %v10089_v2 }
 0x6aa   :  { %v3972_v23 = vmul.f32 %v3971_v20, %v3965_v14 }
 0x6ab   :  { %v3975_v58 = vsub.f32 1.0, %v3970_v0  ;;  %v3977_v36 = vmul.f32 %v3970_v0, %v10752_v33 }
 0x6ac   :  { %v3973_v44 = vadd.f32 %v3972_v23, %v3534_v52 }
 0x6ae   :  { %9167 = vtanh.f32 %v3973_v44 }
 0x6b6   :  { %v3886_v38 = vpop.f32.mrb[22].mxu0  ;;  %v3957_v13 = vpop.f32.mrb[48].mxu1 }
 0x6b7   :  { %v9047_v50 = vadd.f32 %v3886_v38, %v10062_v7  ;;  %v3888_v39 = vpop.f32.mrb[23].mxu0  ;;  %v6886_v43 = vpop.f32.mrb[49].mxu1  ;;  %v3989_v14 = vadd.f32 %v10605_v28, %v3957_v13 }
 0x6b8   :  { %v9168_v37 = vpop.eup %9167  ;;  %v9048_v59 = vadd.f32 %v3888_v39, %v10066_v1 }
 0x6b9   :  { %v3976_v18 = vmul.f32 %v9168_v37, %v3975_v58  ;;  %v3980_v26 = vmul.f32 0.5, %v9047_v50 }
 0x6ba   :  { %v3985_v52 = vmul.f32 0.5, %v9048_v59 }
 0x6bb   :  { %9169 = vtanh.f32 %v3980_v26  ;;  %v10916_v20 = vadd.f32 %v3977_v36, %v3976_v18  ;;  %v11829_v26 = vld [vmem:[#allocation43_spill] sm:$0xff] }
 0x6bc   :  { %9171 = vtanh.f32 %v3985_v52  ;;  %v11830_v52 = vld [vmem:[#allocation45_spill] sm:$0xff] }
 0x6bd   :  { %4348 = vmatmul.mubr.f32.vlgmr.msra.gmra.mrb[24].mxu0 %v10916_v20  ;;  %6990 = vmatmul.mubr.f32.vlgmr.msra.gmra.mrb[54].mxu1 %v10916_v20 }
 0x6be   :  { %8682 = vmatpush1.bf16.msra.mxu0 %v11492_v54  ;;  %8713 = vmatpush3.bf16.msra.mxu1 %v9902_v40 }
 0x6bf   :  { %8684 = vmatprep.subr.bf16.mxu0 %v11493_v19  ;;  %8714 = vmatprep.subr.bf16.mxu1 %v11494_v47 }
 0x6c0   :  { %4488 = vmatprep.mubr.f32.mxu0 %v11443_v29  ;;  %7024 = vmatprep.mubr.msk.f32.mxu1 %vm9429_vm0, %v11443_v29 }
 0x6c2   :  { %8686 = vmatpush1.bf16.msra.mxu0 %v11495_v11  ;;  %8716 = vmatpush3.bf16.msra.mxu1 %v9909_v53 }
 0x6c3   :  { %8688 = vmatprep.subr.bf16.mxu0 %v11496_v27  ;;  %8717 = vmatprep.subr.bf16.mxu1 %v11494_v47 }
 0x6c5   :  { %v9170_v44 = vpop.eup %9169 }
 0x6c6   :  { %v3982_v15 = vmul.f32 0.5, %v9170_v44  ;;  %8690 = vmatpush1.bf16.msra.mxu0 %v11497_v49  ;;  %8719 = vmatpush3.bf16.msra.mxu1 %v11555_v30  ;;  %v9172_v38 = vpop.eup %9171  ;;  %v11831_v44 = vld [vmem:[#allocation66_spill] sm:$0xff] }
 0x6c7   :  { %8692 = vmatprep.subr.bf16.mxu0 %v11556_v48  ;;  %8720 = vmatprep.subr.bf16.mxu1 %v11494_v47  ;;  %v3987_v28 = vmul.f32 0.5, %v9172_v38  ;;  %v11836_v38 = vld [vmem:[#allocation23_spill] sm:$0xff] }
 0x6c8   :  { %v3983_v23 = vadd.f32 0.5, %v3982_v15  ;;  %v4603_v15 = vld [vmem:[#allocation3 + $0x38] sm:$0xff] }
 0x6c9   :  { %v3988_v5 = vadd.f32 0.5, %v3987_v28  ;;  %v11838_v28 = vld [vmem:[#allocation25_spill] sm:$0xff] }
 0x6ca   :  { %v3990_v0 = vmul.f32 %v3989_v14, %v3983_v23  ;;  %8694 = vmatpush1.bf16.msra.mxu0 %v11499_v42  ;;  %8722 = vmatpush3.bf16.msra.mxu1 %v9919_v8  ;;  %v11832_v23 = vld [vmem:[#allocation20_spill] sm:$0xff]  ;;  %v11833_v14 = vld [vmem:[#allocation21_spill] sm:$0xff] }
 0x6cb   :  { %8696 = vmatprep.subr.bf16.mxu0 %v11500_v32  ;;  %8723 = vmatprep.subr.bf16.mxu1 %v11494_v47  ;;  %v3993_v50 = vsub.f32 1.0, %v3988_v5  ;;  %v3995_v18 = vmul.f32 %v3988_v5, %v10795_v31  ;;  %v11839_v5 = vld [vmem:[#allocation26_spill] sm:$0xff] }
 0x6cc   :  { %v3991_v58 = vadd.f32 %v3990_v0, %v3676_v56  ;;  %v11834_v56 = vld [vmem:[#allocation69_spill] sm:$0xff]  ;;  %v11835_v0 = vld [vmem:[#allocation22_spill] sm:$0xff] }
 0x6ce   :  { %9173 = vtanh.f32 %v3991_v58  ;;  %8698 = vmatpush1.bf16.msra.mxu0 %v11501_v46  ;;  %8725 = vmatpush3.bf16.msra.mxu1 %v9923_v34  ;;  %v11837_v58 = vld [vmem:[#allocation72_spill] sm:$0xff] }
 0x6cf   :  { %8700 = vmatprep.subr.bf16.mxu0 %v11502_v12  ;;  %8726 = vmatprep.subr.bf16.mxu1 %v11494_v47 }
 0x6d2   :  { %8702 = vmatpush1.bf16.msra.mxu0 %v9825_v21  ;;  %8728 = vmatpush3.bf16.msra.mxu1 %v9927_v16 }
 0x6d3   :  { %8704 = vmatprep.subr.bf16.mxu0 %v9828_v6  ;;  %8729 = vmatprep.subr.bf16.mxu1 %v11494_v47 }
 0x6d6   :  { %8706 = vmatpush1.bf16.msra.mxu0 %v9835_v41  ;;  %8731 = vmatpush3.bf16.msra.mxu1 %v9931_v63  ;;  %v10952_v13 = vpop.f32.mrb[50].mxu1 }
 0x6d7   :  { %8708 = vmatprep.subr.bf16.mxu0 %v9838_v60  ;;  %8732 = vmatprep.subr.bf16.mxu1 %v11494_v47  ;;  %v6921_v39 = vpop.f32.mrb[51].mxu1 }
 0x6d8   :  { %v9174_v43 = vpop.eup %9173  ;;  %v11841_v39 = vld [vmem:[#allocation28_spill] sm:$0xff] }
 0x6d9   :  { %v3994_v37 = vmul.f32 %v9174_v43, %v3993_v50  ;;  %v11840_v50 = vld [vmem:[#allocation75_spill] sm:$0xff]  ;;  %v11842_v43 = vld [vmem:[#allocation30_spill] sm:$0xff] }
 0x6da   :  { %8710 = vmatpush1.bf16.msra.mxu0 %v9845_v61  ;;  %8734 = vmatpush3.bf16.msra.mxu1 %v9935_v51 }
 0x6db   :  { %v10959_v36 = vadd.f32 %v3995_v18, %v3994_v37  ;;  %8736 = vmatprep.subr.bf16.mxu0 %v9580_v4  ;;  %8767 = vmatprep.subr.bf16.mxu1 %v11494_v47  ;;  %v11819_v4 = vld [vmem:[#allocation54_spill] sm:$0xff]  ;;  %v11844_v18 = vld [vmem:[#allocation32_spill] sm:$0xff] }
 0x6dc   :  { %v11843_v37 = vld [vmem:[#allocation78_spill] sm:$0xff] }
 0x6dd   :  { %4489 = vmatmul.mubr.f32.vlgmr.msra.gmra.mrb[26].mxu0 %v10959_v36  ;;  %7025 = vmatmul.mubr.f32.vlgmr.msra.gmra.mrb[56].mxu1 %v10959_v36 }
 0x6de   :  { %8738 = vmatpush1.bf16.msra.mxu0 %v9584_v9  ;;  %8769 = vmatpush3.bf16.msra.mxu1 %v9679_v62  ;;  %v11820_v9 = vld [vmem:[#allocation31_spill] sm:$0xff] }
 0x6df   :  { %8740 = vmatprep.subr.bf16.mxu0 %v9591_v17  ;;  %8770 = vmatprep.subr.bf16.mxu1 %v11494_v47  ;;  %v11821_v17 = vld [vmem:[#allocation33_spill] sm:$0xff]  ;;  %v11823_v62 = vld [vmem:[#allocation35_spill] sm:$0xff] }
 0x6e0   :  { %4668 = vmatprep.mubr.f32.mxu0 %v11443_v29  ;;  %7059 = vmatprep.mubr.msk.f32.mxu1 %vm9429_vm0, %v11443_v29 }
 0x6e2   :  { %8742 = vmatpush1.bf16.msra.mxu0 %v9596_v22  ;;  %8772 = vmatpush3.bf16.msra.mxu1 %v9693_v24  ;;  %v11822_v22 = vld [vmem:[#allocation57_spill] sm:$0xff]  ;;  %v11825_v24 = vld [vmem:[#allocation60_spill] sm:$0xff] }
 0x6e3   :  { %8744 = vmatprep.subr.bf16.mxu0 %v11504_v25  ;;  %8773 = vmatprep.subr.bf16.mxu1 %v11494_v47  ;;  %v11827_v25 = vld [vmem:[#allocation41_spill] sm:$0xff] }
 0x6e6   :  { %8746 = vmatpush1.bf16.msra.mxu0 %v9607_v35  ;;  %8775 = vmatpush3.bf16.msra.mxu1 %v9706_v45  ;;  %v11824_v35 = vld [vmem:[#allocation37_spill] sm:$0xff]  ;;  %v11826_v45 = vld [vmem:[#allocation39_spill] sm:$0xff] }
 0x6e7   :  { %8748 = vmatprep.subr.bf16.mxu0 %v11558_v10  ;;  %8776 = vmatprep.subr.bf16.mxu1 %v11494_v47 }
 0x6ea   :  { %8750 = vmatpush1.bf16.msra.mxu0 %v11506_v55  ;;  %8778 = vmatpush3.bf16.msra.mxu1 %v11819_v4  ;;  %v11828_v55 = vld [vmem:[#allocation63_spill] sm:$0xff]  ;;  %v11845_v4 = vld [vmem:[#allocation34_spill] sm:$0xff] }
 0x6eb   :  { %8752 = vmatprep.subr.bf16.mxu0 %v11820_v9  ;;  %8779 = vmatprep.subr.bf16.mxu1 %v11494_v47  ;;  %v11846_v9 = vld [vmem:[#allocation81_spill] sm:$0xff] }
 0x6ee   :  { %8754 = vmatpush1.bf16.msra.mxu0 %v11821_v17  ;;  %8781 = vmatpush3.bf16.msra.mxu1 %v11822_v22  ;;  %v11847_v17 = vld [vmem:[#allocation36_spill] sm:$0xff]  ;;  %v11848_v22 = vld [vmem:[#allocation38_spill] sm:$0xff] }
 0x6ef   :  { %8756 = vmatprep.subr.bf16.mxu0 %v11823_v62  ;;  %8782 = vmatprep.subr.bf16.mxu1 %v11494_v47  ;;  %v11849_v62 = vld [vmem:[#allocation84_spill] sm:$0xff] }
 0x6f2   :  { %8758 = vmatpush1.bf16.msra.mxu0 %v11824_v35  ;;  %8784 = vmatpush3.bf16.msra.mxu1 %v11825_v24  ;;  %v11850_v35 = vld [vmem:[#allocation40_spill] sm:$0xff]  ;;  %v11851_v24 = vld [vmem:[#allocation42_spill] sm:$0xff] }
 0x6f3   :  { %8760 = vmatprep.subr.bf16.mxu0 %v11826_v45  ;;  %8785 = vmatprep.subr.bf16.mxu1 %v11494_v47  ;;  %v11852_v45 = vld [vmem:[#allocation85_spill] sm:$0xff] }
 0x6f6   :  { %8762 = vmatpush1.bf16.msra.mxu0 %v11827_v25  ;;  %8787 = vmatpush3.bf16.msra.mxu1 %v11828_v55  ;;  %v10994_v10 = vpop.f32.mrb[52].mxu1  ;;  %v11853_v25 = vld [vmem:[#allocation44_spill] sm:$0xff]  ;;  %v11854_v55 = vld [vmem:[#allocation46_spill] sm:$0xff] }
 0x6f7   :  { %8764 = vmatprep.subr.bf16.mxu0 %v11829_v26  ;;  %8788 = vmatprep.subr.bf16.mxu1 %v11494_v47  ;;  %v6956_v59 = vpop.f32.mrb[53].mxu1  ;;  %v11855_v26 = vld [vmem:[#allocation86_spill] sm:$0xff] }
 0x6f8   :  { %v4745_v59 = vld [vmem:[#allocation3] sm:$0xff] }
 0x6fa   :  { %8766 = vmatpush1.bf16.msra.mxu0 %v11830_v52  ;;  %8790 = vmatpush3.bf16.msra.mxu1 %v11831_v44  ;;  %v11856_v52 = vld [vmem:[#allocation47_spill] sm:$0xff]  ;;  %v11857_v44 = vld [vmem:[#allocation48_spill] sm:$0xff] }
 0x6fb   :  { %8792 = vmatprep.subr.bf16.mxu0 %v11832_v23  ;;  %8823 = vmatprep.subr.bf16.mxu1 %v11494_v47  ;;  %v11859_v23 = vld [vmem:[#allocation49_spill] sm:$0xff] }
 0x6fd   :  { %4669 = vmatmul.mubr.f32.vlgmr.msra.gmra.mrb[28].mxu0 %v4603_v15  ;;  %7060 = vmatmul.mubr.f32.vlgmr.msra.gmra.mrb[58].mxu1 %v4603_v15  ;;  %v11858_v15 = vld [vmem:[#allocation87_spill] sm:$0xff] }
 0x6fe   :  { %8794 = vmatpush1.bf16.msra.mxu0 %v11833_v14  ;;  %8825 = vmatpush3.bf16.msra.mxu1 %v11834_v56  ;;  %v11860_v14 = vld [vmem:[#allocation50_spill] sm:$0xff]  ;;  %v11861_v56 = vld [vmem:[#allocation88_spill] sm:$0xff] }
 0x6ff   :  { %8796 = vmatprep.subr.bf16.mxu0 %v11835_v0  ;;  %8826 = vmatprep.subr.bf16.mxu1 %v11494_v47  ;;  %v11862_v0 = vld [vmem:[#allocation51_spill] sm:$0xff] }
 0x700   :  { %4810 = vmatprep.mubr.f32.mxu0 %v11443_v29  ;;  %7094 = vmatprep.mubr.msk.f32.mxu1 %vm9429_vm0, %v11443_v29 }
 0x702   :  { %8798 = vmatpush1.bf16.msra.mxu0 %v11836_v38  ;;  %8828 = vmatpush3.bf16.msra.mxu1 %v11837_v58  ;;  %v11863_v38 = vld [vmem:[#allocation52_spill] sm:$0xff]  ;;  %v11864_v58 = vld [vmem:[#allocation89_spill] sm:$0xff] }
 0x703   :  { %8800 = vmatprep.subr.bf16.mxu0 %v11838_v28  ;;  %8829 = vmatprep.subr.bf16.mxu1 %v11494_v47  ;;  %v11865_v28 = vld [vmem:[#allocation53_spill] sm:$0xff] }
 0x706   :  { %8802 = vmatpush1.bf16.msra.mxu0 %v11839_v5  ;;  %8831 = vmatpush3.bf16.msra.mxu1 %v11840_v50  ;;  %v11866_v5 = vld [vmem:[#allocation55_spill] sm:$0xff]  ;;  %v11867_v50 = vld [vmem:[#allocation90_spill] sm:$0xff] }
 0x707   :  { %8804 = vmatprep.subr.bf16.mxu0 %v11841_v39  ;;  %8832 = vmatprep.subr.bf16.mxu1 %v11494_v47  ;;  %v11868_v39 = vld [vmem:[#allocation56_spill] sm:$0xff] }
 0x70a   :  { %8806 = vmatpush1.bf16.msra.mxu0 %v11842_v43  ;;  %8834 = vmatpush3.bf16.msra.mxu1 %v11843_v37  ;;  %v11869_v43 = vld [vmem:[#allocation58_spill] sm:$0xff]  ;;  %v11870_v37 = vld [vmem:[#allocation91_spill] sm:$0xff] }
 0x70b   :  { %8808 = vmatprep.subr.bf16.mxu0 %v11844_v18  ;;  %8835 = vmatprep.subr.bf16.mxu1 %v11494_v47  ;;  %v11871_v18 = vld [vmem:[#allocation59_spill] sm:$0xff] }
 0x70e   :  { %8810 = vmatpush1.bf16.msra.mxu0 %v11845_v4  ;;  %8837 = vmatpush3.bf16.msra.mxu1 %v11846_v9  ;;  %v11872_v4 = vld [vmem:[#allocation61_spill] sm:$0xff]  ;;  %v11873_v9 = vld [vmem:[#allocation92_spill] sm:$0xff] }
 0x70f   :  { %8812 = vmatprep.subr.bf16.mxu0 %v11847_v17  ;;  %8838 = vmatprep.subr.bf16.mxu1 %v11494_v47  ;;  %v11874_v17 = vld [vmem:[#allocation62_spill] sm:$0xff] }
 0x712   :  { %8814 = vmatpush1.bf16.msra.mxu0 %v11848_v22  ;;  %8840 = vmatpush3.bf16.msra.mxu1 %v11849_v62  ;;  %v11875_v22 = vld [vmem:[#allocation64_spill] sm:$0xff]  ;;  %v11876_v62 = vld [vmem:[#allocation93_spill] sm:$0xff] }
 0x713   :  { %8816 = vmatprep.subr.bf16.mxu0 %v11850_v35  ;;  %8841 = vmatprep.subr.bf16.mxu1 %v11494_v47  ;;  %v11877_v35 = vld [vmem:[#allocation65_spill] sm:$0xff] }
 0x716   :  { %8818 = vmatpush1.bf16.msra.mxu0 %v11851_v24  ;;  %8843 = vmatpush3.bf16.msra.mxu1 %v11852_v45  ;;  %v11878_v24 = vld [vmem:[#allocation67_spill] sm:$0xff]  ;;  %v11879_v45 = vld [vmem:[#allocation94_spill] sm:$0xff] }
 0x717   :  { %8820 = vmatprep.subr.bf16.mxu0 %v11853_v25  ;;  %8844 = vmatprep.subr.bf16.mxu1 %v11494_v47  ;;  %v11880_v25 = vld [vmem:[#allocation68_spill] sm:$0xff] }
 0x71a   :  { %8822 = vmatpush1.bf16.msra.mxu0 %v11854_v55  ;;  %8846 = vmatpush3.bf16.msra.mxu1 %v11855_v26 }
 0x71b   :  { %8848 = vmatprep.subr.bf16.mxu0 %v11856_v52  ;;  %8879 = vmatprep.subr.bf16.mxu1 %v11494_v47 }
 0x71d   :  { %4811 = vmatmul.mubr.f32.vlgmr.msra.gmra.mrb[30].mxu0 %v4745_v59  ;;  %7095 = vmatmul.mubr.f32.vlgmr.msra.gmra.mrb[60].mxu1 %v4745_v59  ;;  %v11881_v59 = vld [vmem:[#allocation98_spill] sm:$0xff] }
 0x71e   :  { %8850 = vmatpush1.bf16.msra.mxu0 %v11857_v44  ;;  %8881 = vmatpush3.bf16.msra.mxu1 %v11858_v15 }
 0x71f   :  { %8852 = vmatprep.subr.bf16.mxu0 %v11859_v23  ;;  %8882 = vmatprep.subr.bf16.mxu1 %v11494_v47 }
 0x720   :  { %4951 = vmatprep.mubr.f32.mxu0 %v11443_v29  ;;  %7129 = vmatprep.mubr.msk.f32.mxu1 %vm9429_vm0, %v11443_v29 }
 0x722   :  { %8854 = vmatpush1.bf16.msra.mxu0 %v11860_v14  ;;  %8884 = vmatpush3.bf16.msra.mxu1 %v11861_v56 }
 0x723   :  { %8856 = vmatprep.subr.bf16.mxu0 %v11862_v0  ;;  %8885 = vmatprep.subr.bf16.mxu1 %v11494_v47 }
 0x726   :  { %8858 = vmatpush1.bf16.msra.mxu0 %v11863_v38  ;;  %8887 = vmatpush3.bf16.msra.mxu1 %v11864_v58 }
 0x727   :  { %8860 = vmatprep.subr.bf16.mxu0 %v11865_v28  ;;  %8888 = vmatprep.subr.bf16.mxu1 %v11494_v47  ;;  %v11077_v28 = vld [vmem:[%s11199_s4] ss:$0 sm:$0xff] }
 0x72a   :  { %8862 = vmatpush1.bf16.msra.mxu0 %v11866_v5  ;;  %8890 = vmatpush3.bf16.msra.mxu1 %v11867_v50  ;;  %v4138_v50 = vadd.f32 %v10952_v13, %v10054_v3 }
 0x72b   :  { %8864 = vmatprep.subr.bf16.mxu0 %v11868_v39  ;;  %8891 = vmatprep.subr.bf16.mxu1 %v11494_v47 }
 0x72e   :  { %8866 = vmatpush1.bf16.msra.mxu0 %v11869_v43  ;;  %8893 = vmatpush3.bf16.msra.mxu1 %v11870_v37 }
 0x72f   :  { %8868 = vmatprep.subr.bf16.mxu0 %v11871_v18  ;;  %8894 = vmatprep.subr.bf16.mxu1 %v11494_v47 }
 0x732   :  { %8870 = vmatpush1.bf16.msra.mxu0 %v11872_v4  ;;  %8896 = vmatpush3.bf16.msra.mxu1 %v11873_v9 }
 0x733   :  { %8872 = vmatprep.subr.bf16.mxu0 %v11874_v17  ;;  %8897 = vmatprep.subr.bf16.mxu1 %v11494_v47 }
 0x736   :  { %8874 = vmatpush1.bf16.msra.mxu0 %v11875_v22  ;;  %8899 = vmatpush3.bf16.msra.mxu1 %v11876_v62 }
 0x737   :  { %8876 = vmatprep.subr.bf16.mxu0 %v11877_v35  ;;  %8900 = vmatprep.subr.bf16.mxu1 %v11494_v47 }
 0x73a   :  { %8878 = vmatpush1.bf16.msra.mxu0 %v11878_v24  ;;  %8902 = vmatpush3.bf16.msra.mxu1 %v11879_v45 }
 0x73b   :  { %8904 = vmatprep.subr.bf16.mxu0 %v11880_v25  ;;  %8935 = vmatprep.subr.bf16.mxu1 %v11494_v47 }
 0x790   :  { %v4349_v55 = vpop.f32.mrb[24].mxu0  ;;  %v4420_v26 = vpop.f32.mrb[54].mxu1 }
 0x791   :  { %v9049_v52 = vadd.f32 %v4349_v55, %v11881_v59  ;;  %v4351_v44 = vpop.f32.mrb[25].mxu0  ;;  %v6991_v15 = vpop.f32.mrb[55].mxu1  ;;  %v4575_v5 = vadd.f32 %v11077_v28, %v4420_v26 }
 0x792   :  { %v9050_v14 = vadd.f32 %v4351_v44, %v11753_v57  ;;  %v5209_v15 = vld [vmem:[#allocation12 + $0x10] sm:$0xff] }
 0x793   :  { %v4566_v23 = vmul.f32 0.5, %v9049_v52 }
 0x794   :  { %v4571_v56 = vmul.f32 0.5, %v9050_v14  ;;  %v5214_v14 = vld [vmem:[#allocation12 + $0x38] sm:$0xff] }
 0x795   :  { %9175 = vtanh.f32 %v4566_v23 }
 0x796   :  { %9177 = vtanh.f32 %v4571_v56  ;;  %v5211_v56 = vld [vmem:[#allocation12 + $0x20] sm:$0xff] }
 0x79f   :  { %v9176_v0 = vpop.eup %9175 }
 0x7a0   :  { %v4568_v38 = vmul.f32 0.5, %v9176_v0  ;;  %v9178_v43 = vpop.eup %9177  ;;  %v5213_v0 = vld [vmem:[#allocation12 + $0x30] sm:$0xff] }
 0x7a1   :  { %v4573_v18 = vmul.f32 0.5, %v9178_v43  ;;  %v5217_v43 = vld [vmem:[#allocation12 + $0x50] sm:$0xff] }
 0x7a2   :  { %v4569_v58 = vadd.f32 0.5, %v4568_v38  ;;  %v8965_v38 = vpack.c.bf16 %v5213_v0, %v5211_v56  ;;  %v5243_v56 = vld [vmem:[#allocation12 + $0x120] sm:$0xff]  ;;  %v5245_v0 = vld [vmem:[#allocation12 + $0x130] sm:$0xff] }
 0x7a3   :  { %v4574_v4 = vadd.f32 0.5, %v4573_v18  ;;  %v5220_v18 = vld [vmem:[#allocation12 + $0x68] sm:$0xff] }
 0x7a4   :  { %v4576_v39 = vmul.f32 %v4575_v5, %v4569_v58  ;;  %v5216_v58 = vld [vmem:[#allocation12 + $0x48] sm:$0xff]  ;;  %v5218_v5 = vld [vmem:[#allocation12 + $0x58] sm:$0xff] }
 0x7a5   :  { %v4579_v22 = vsub.f32 1.0, %v4574_v4  ;;  %v4581_v55 = vmul.f32 %v4574_v4, %v10916_v20  ;;  %v5222_v4 = vld [vmem:[#allocation12 + $0x78] sm:$0xff] }
 0x7a6   :  { %v4577_v37 = vadd.f32 %v4576_v39, %v4138_v50  ;;  %v8967_v50 = vpack.c.bf16 %v5218_v5, %v5216_v58  ;;  %v5215_v39 = vld [vmem:[#allocation12 + $0x40] sm:$0xff]  ;;  %v5248_v58 = vld [vmem:[#allocation12 + $0x148] sm:$0xff]  ;;  %v5250_v5 = vld [vmem:[#allocation12 + $0x158] sm:$0xff] }
 0x7a8   :  { %9179 = vtanh.f32 %v4577_v37  ;;  %v8969_v37 = vpack.c.bf16 %v5217_v43, %v5215_v39  ;;  %v5247_v39 = vld [vmem:[#allocation12 + $0x140] sm:$0xff]  ;;  %v5249_v43 = vld [vmem:[#allocation12 + $0x150] sm:$0xff] }
 0x7b0   :  { %v4490_v9 = vpop.f32.mrb[26].mxu0  ;;  %v4561_v17 = vpop.f32.mrb[56].mxu1 }
 0x7b1   :  { %v9051_v62 = vadd.f32 %v4490_v9, %v10062_v7  ;;  %v4492_v35 = vpop.f32.mrb[27].mxu0  ;;  %v7026_v24 = vpop.f32.mrb[57].mxu1  ;;  %v8971_v9 = vpack.c.bf16 %v5222_v4, %v5220_v18  ;;  %v5252_v18 = vld [vmem:[#allocation12 + $0x168] sm:$0xff]  ;;  %v5254_v4 = vld [vmem:[#allocation12 + $0x178] sm:$0xff] }
 0x7b2   :  { %v9180_v45 = vpop.eup %9179  ;;  %v9052_v13 = vadd.f32 %v4492_v35, %v10066_v1  ;;  %v5224_v35 = vld [vmem:[#allocation12 + $0x88] sm:$0xff]  ;;  %v5226_v24 = vld [vmem:[#allocation12 + $0x98] sm:$0xff] }
 0x7b3   :  { %v4580_v25 = vmul.f32 %v9180_v45, %v4579_v22  ;;  %v4584_v26 = vmul.f32 0.5, %v9051_v62  ;;  %v5221_v22 = vld [vmem:[#allocation12 + $0x70] sm:$0xff]  ;;  %v8975_v45 = vpack.c.bf16 %v5226_v24, %v5224_v35  ;;  %v5256_v35 = vld [vmem:[#allocation12 + $0x188] sm:$0xff]  ;;  %v5258_v24 = vld [vmem:[#allocation12 + $0x198] sm:$0xff] }
 0x7b4   :  { %v4589_v44 = vmul.f32 0.5, %v9052_v13  ;;  %v5228_v13 = vld [vmem:[#allocation12 + $0xa8] sm:$0xff] }
 0x7b5   :  { %9181 = vtanh.f32 %v4584_v26  ;;  %v11085_v52 = vadd.f32 %v4581_v55, %v4580_v25  ;;  %v5223_v25 = vld [vmem:[#allocation12 + $0x80] sm:$0xff]  ;;  %v5225_v55 = vld [vmem:[#allocation12 + $0x90] sm:$0xff] }
 0x7b6   :  { %9183 = vtanh.f32 %v4589_v44  ;;  %v8977_v26 = vpack.c.bf16 %v5225_v55, %v5223_v25  ;;  %v5230_v44 = vld [vmem:[#allocation12 + $0xb8] sm:$0xff]  ;;  %v5255_v25 = vld [vmem:[#allocation12 + $0x180] sm:$0xff]  ;;  %v5257_v55 = vld [vmem:[#allocation12 + $0x190] sm:$0xff] }
 0x7b7   :  { %4952 = vmatmul.mubr.f32.vlgmr.msra.gmra.mrb[28].mxu0 %v11085_v52  ;;  %7130 = vmatmul.mubr.f32.vlgmr.msra.gmra.mrb[62].mxu1 %v11085_v52 }
 0x7b8   :  { %8906 = vmatpush1.bf16.msra.mxu0 %v11492_v54  ;;  %8937 = vmatpush3.bf16.msra.mxu1 %v9902_v40 }
 0x7b9   :  { %8908 = vmatprep.subr.bf16.mxu0 %v11493_v19  ;;  %8938 = vmatprep.subr.bf16.mxu1 %v11494_v47  ;;  %v11107_v19 = vld [vmem:[%s11203_s8] ss:$0 sm:$0xff] }
 0x7ba   :  { %5092 = vmatprep.mubr.f32.mxu0 %v11443_v29  ;;  %7164 = vmatprep.mubr.msk.f32.mxu1 %vm9429_vm0, %v11443_v29 }
 0x7bc   :  { %8910 = vmatpush1.bf16.msra.mxu0 %v11495_v11  ;;  %8940 = vmatpush3.bf16.msra.mxu1 %v9909_v53  ;;  %v4593_v53 = vadd.f32 %v11107_v19, %v4561_v17  ;;  %v4280_v11 = vadd.f32 %v10994_v10, %v10089_v2  ;;  %v5207_v10 = vld [vmem:[#allocation12] sm:$0xff] }
 0x7bd   :  { %8912 = vmatprep.subr.bf16.mxu0 %v11496_v27  ;;  %8941 = vmatprep.subr.bf16.mxu1 %v11494_v47  ;;  %v8961_v23 = vpack.c.bf16 %v5209_v15, %v5207_v10  ;;  %v5219_v17 = vld [vmem:[#allocation12 + $0x60] sm:$0xff]  ;;  %v5241_v15 = vld [vmem:[#allocation12 + $0x110] sm:$0xff] }
 0x7be   :  { %v8973_v62 = vpack.c.bf16 %v5221_v22, %v5219_v17  ;;  %v5239_v10 = vld [vmem:[#allocation12 + $0x100] sm:$0xff]  ;;  %v5253_v22 = vld [vmem:[#allocation12 + $0x170] sm:$0xff] }
 0x7bf   :  { %v9182_v54 = vpop.eup %9181  ;;  %v5251_v17 = vld [vmem:[#allocation12 + $0x160] sm:$0xff] }
 0x7c0   :  { %v4586_v40 = vmul.f32 0.5, %v9182_v54  ;;  %8914 = vmatpush1.bf16.msra.mxu0 %v11497_v49  ;;  %8943 = vmatpush3.bf16.msra.mxu1 %v11555_v30  ;;  %v9184_v49 = vpop.eup %9183  ;;  %v5227_v54 = vld [vmem:[#allocation12 + $0xa0] sm:$0xff] }
 0x7c1   :  { %8916 = vmatprep.subr.bf16.mxu0 %v11556_v48  ;;  %8944 = vmatprep.subr.bf16.mxu1 %v11494_v47  ;;  %v4591_v48 = vmul.f32 0.5, %v9184_v49 }
 0x7c2   :  { %v4587_v29 = vadd.f32 0.5, %v4586_v40  ;;  %v8979_v40 = vpack.c.bf16 %v5230_v44, %v5228_v13  ;;  %v5260_v13 = vld [vmem:[#allocation12 + $0x1a8] sm:$0xff]  ;;  %v5262_v44 = vld [vmem:[#allocation12 + $0x1b8] sm:$0xff] }
 0x7c4   :  { %v4594_v27 = vmul.f32 %v4593_v53, %v4587_v29  ;;  %8918 = vmatpush1.bf16.msra.mxu0 %v11499_v42  ;;  %8946 = vmatpush3.bf16.msra.mxu1 %v9919_v8  ;;  %v4592_v8 = vadd.f32 0.5, %v4591_v48  ;;  %v5229_v29 = vld [vmem:[#allocation12 + $0xb0] sm:$0xff] }
 0x7c5   :  { %8920 = vmatprep.subr.bf16.mxu0 %v11500_v32  ;;  %8947 = vmatprep.subr.bf16.mxu1 %v11494_v47  ;;  %v8981_v53 = vpack.c.bf16 %v5229_v29, %v5227_v54  ;;  %v5233_v48 = vld [vmem:[#allocation12 + $0xd0] sm:$0xff]  ;;  %v5259_v54 = vld [vmem:[#allocation12 + $0x1a0] sm:$0xff] }
 0x7c6   :  { %v4595_v30 = vadd.f32 %v4594_v27, %v4280_v11  ;;  %v5232_v11 = vld [vmem:[#allocation12 + $0xc8] sm:$0xff]  ;;  %v5234_v27 = vld [vmem:[#allocation12 + $0xd8] sm:$0xff]  ;;  %v5261_v29 = vld [vmem:[#allocation12 + $0x1b0] sm:$0xff] }
 0x7c7   :  { %v8983_v49 = vpack.c.bf16 %v5234_v27, %v5232_v11  ;;  %v5266_v11 = vld [vmem:[#allocation12 + $0x1d8] sm:$0xff]  ;;  %v9013_v27 = vpack.c.bf16 %v5261_v29, %v5259_v54 }
 0x7c8   :  { %9185 = vtanh.f32 %v4595_v30  ;;  %8922 = vmatpush1.bf16.msra.mxu0 %v11501_v46  ;;  %8949 = vmatpush3.bf16.msra.mxu1 %v9923_v34  ;;  %v4597_v34 = vsub.f32 1.0, %v4592_v8  ;;  %v5231_v30 = vld [vmem:[#allocation12 + $0xc0] sm:$0xff] }
 0x7c9   :  { %8924 = vmatprep.subr.bf16.mxu0 %v11502_v12  ;;  %8950 = vmatprep.subr.bf16.mxu1 %v11494_v47 }
 0x7cc   :  { %8926 = vmatpush1.bf16.msra.mxu0 %v9825_v21  ;;  %8952 = vmatpush3.bf16.msra.mxu1 %v9927_v16  ;;  %v4599_v16 = vmul.f32 %v4592_v8, %v10959_v36  ;;  %v8985_v8 = vpack.c.bf16 %v5233_v48, %v5231_v30  ;;  %v5263_v30 = vld [vmem:[#allocation12 + $0x1c0] sm:$0xff]  ;;  %v5265_v48 = vld [vmem:[#allocation12 + $0x1d0] sm:$0xff] }
 0x7cd   :  { %8928 = vmatprep.subr.bf16.mxu0 %v9828_v6  ;;  %8953 = vmatprep.subr.bf16.mxu1 %v11494_v47 }
 0x7d0   :  { %8930 = vmatpush1.bf16.msra.mxu0 %v9835_v41  ;;  %8955 = vmatpush3.bf16.msra.mxu1 %v9931_v63  ;;  %v11126_v42 = vpop.f32.mrb[58].mxu1 }
 0x7d1   :  { %8932 = vmatprep.subr.bf16.mxu0 %v9838_v60  ;;  %8956 = vmatprep.subr.bf16.mxu1 %v11494_v47  ;;  %v7061_v46 = vpop.f32.mrb[59].mxu1  ;;  %v5208_v60 = vld [vmem:[#allocation12 + $0x8] sm:$0xff]  ;;  %v5210_v47 = vld [vmem:[#allocation12 + $0x18] sm:$0xff] }
 0x7d2   :  { %v9186_v21 = vpop.eup %9185  ;;  %v8959_v12 = vpack.c.bf16 %v5210_v47, %v5208_v60  ;;  %v5238_v46 = vld [vmem:[#allocation12 + $0xf8] sm:$0xff]  ;;  %v5240_v60 = vld [vmem:[#allocation12 + $0x108] sm:$0xff] }
 0x7d3   :  { %v4598_v32 = vmul.f32 %v9186_v21, %v4597_v34  ;;  %v5236_v34 = vld [vmem:[#allocation12 + $0xe8] sm:$0xff]  ;;  %v5242_v47 = vld [vmem:[#allocation12 + $0x118] sm:$0xff] }
 0x7d4   :  { %8934 = vmatpush1.bf16.msra.mxu0 %v9845_v61  ;;  %8958 = vmatpush3.bf16.msra.mxu1 %v9935_v51  ;;  %v5212_v61 = vld [vmem:[#allocation12 + $0x28] sm:$0xff]  ;;  %v8987_v21 = vpack.c.bf16 %v5238_v46, %v5236_v34  ;;  %v5270_v34 = vld [vmem:[#allocation12 + $0x1f8] sm:$0xff]  ;;  %v9017_v46 = vpack.c.bf16 %v5265_v48, %v5263_v30  ;;  %v11886_v48 = vld [vmem:[#allocation24_spill] sm:$0xff] }
 0x7d5   :  { %v11133_v6 = vadd.f32 %v4599_v16, %v4598_v32  ;;  %8960 = vmatprep.subr.bf16.mxu0 %v8959_v12  ;;  %v8963_v51 = vpack.c.bf16 %v5214_v14, %v5212_v61  ;;  %v5235_v32 = vld [vmem:[#allocation12 + $0xe0] sm:$0xff]  ;;  %v5237_v16 = vld [vmem:[#allocation12 + $0xf0] sm:$0xff]  ;;  %v8991_v12 = vpack.c.bf16 %v5242_v47, %v5240_v60  ;;  %v5244_v61 = vld [vmem:[#allocation12 + $0x128] sm:$0xff] }
 0x7d6   :  { %v5246_v14 = vld [vmem:[#allocation12 + $0x138] sm:$0xff]  ;;  %v11882_v30 = vld [vmem:[#allocation101_spill] sm:$0xff] }
 0x7d7   :  { %5093 = vmatmul.mubr.f32.vlgmr.msra.gmra.mrb[30].mxu0 %v11133_v6  ;;  %7165 = vmatmul.mubr.f32.vlgmr.msra.gmra.mrb[64].mxu1 %v11133_v6 }
 0x7d8   :  { %8962 = vmatpush1.bf16.msra.mxu0 %v8961_v23  ;;  %v8993_v23 = vpack.c.bf16 %v5241_v15, %v5239_v10 }
 0x7d9   :  { %8964 = vmatprep.subr.bf16.mxu0 %v8963_v51  ;;  %v8995_v51 = vpack.c.bf16 %v5246_v14, %v5244_v61 }
 0x7dc   :  { %8966 = vmatpush1.bf16.msra.mxu0 %v8965_v38  ;;  %v8997_v38 = vpack.c.bf16 %v5245_v0, %v5243_v56 }
 0x7dd   :  { %8968 = vmatprep.subr.bf16.mxu0 %v8967_v50  ;;  %v8999_v50 = vpack.c.bf16 %v5250_v5, %v5248_v58  ;;  %v4742_v58 = vadd.f32 %v11126_v42, %v10054_v3 }
 0x7e0   :  { %8970 = vmatpush1.bf16.msra.mxu0 %v8969_v37  ;;  %v9001_v37 = vpack.c.bf16 %v5249_v43, %v5247_v39 }
 0x7e1   :  { %8972 = vmatprep.subr.bf16.mxu0 %v8971_v9  ;;  %v9003_v9 = vpack.c.bf16 %v5254_v4, %v5252_v18 }
 0x7e4   :  { %8974 = vmatpush1.bf16.msra.mxu0 %v8973_v62  ;;  %v9005_v62 = vpack.c.bf16 %v5253_v22, %v5251_v17 }
 0x7e5   :  { %8976 = vmatprep.subr.bf16.mxu0 %v8975_v45  ;;  %v9007_v45 = vpack.c.bf16 %v5258_v24, %v5256_v35 }
 0x7e8   :  { %8978 = vmatpush1.bf16.msra.mxu0 %v8977_v26  ;;  %v9009_v26 = vpack.c.bf16 %v5257_v55, %v5255_v25 }
 0x7e9   :  { %8980 = vmatprep.subr.bf16.mxu0 %v8979_v40  ;;  %v9011_v40 = vpack.c.bf16 %v5262_v44, %v5260_v13 }
 0x7ec   :  { %8982 = vmatpush1.bf16.msra.mxu0 %v8981_v53  ;;  %v5264_v53 = vld [vmem:[#allocation12 + $0x1c8] sm:$0xff] }
 0x7ed   :  { %8984 = vmatprep.subr.bf16.mxu0 %v8983_v49  ;;  %v9015_v49 = vpack.c.bf16 %v5266_v11, %v5264_v53 }
 0x7f0   :  { %v11137_v63 = vpop.f32.mrb[60].mxu1  ;;  %8986 = vmatpush1.bf16.msra.mxu0 %v8985_v8  ;;  %v5268_v8 = vld [vmem:[#allocation12 + $0x1e8] sm:$0xff] }
 0x7f1   :  { %v7096_v41 = vpop.f32.mrb[61].mxu1  ;;  %8988 = vmatprep.subr.bf16.mxu0 %v8987_v21  ;;  %v9019_v21 = vpack.c.bf16 %v5270_v34, %v5268_v8  ;;  %v11887_v8 = vld [vmem:[#allocation80_spill] sm:$0xff]  ;;  %v11888_v34 = vld [vmem:[#allocation73_spill] sm:$0xff] }
 0x7f2   :  { %v8989_v41 = vpack.c.bf16 %v5237_v16, %v5235_v32  ;;  %v5267_v32 = vld [vmem:[#allocation12 + $0x1e0] sm:$0xff]  ;;  %v5269_v16 = vld [vmem:[#allocation12 + $0x1f0] sm:$0xff] }
 0x7f4   :  { %8990 = vmatpush1.bf16.msra.mxu0 %v8989_v41  ;;  %v9021_v41 = vpack.c.bf16 %v5269_v16, %v5267_v32 }
 0x7f5   :  { %8992 = vmatprep.subr.bf16.mxu0 %v8991_v12 }
 0x7f8   :  { %8994 = vmatpush1.bf16.msra.mxu0 %v8993_v23 }
 0x7f9   :  { %8996 = vmatprep.subr.bf16.mxu0 %v8995_v51 }
 0x7fc   :  { %8998 = vmatpush1.bf16.msra.mxu0 %v8997_v38 }
 0x7fd   :  { %9000 = vmatprep.subr.bf16.mxu0 %v8999_v50 }
 0x800   :  { %9002 = vmatpush1.bf16.msra.mxu0 %v9001_v37 }
 0x801   :  { %9004 = vmatprep.subr.bf16.mxu0 %v9003_v9 }
 0x804   :  { %9006 = vmatpush1.bf16.msra.mxu0 %v9005_v62 }
 0x805   :  { %9008 = vmatprep.subr.bf16.mxu0 %v9007_v45 }
 0x808   :  { %9010 = vmatpush1.bf16.msra.mxu0 %v9009_v26 }
 0x809   :  { %9012 = vmatprep.subr.bf16.mxu0 %v9011_v40 }
 0x80c   :  { %9014 = vmatpush1.bf16.msra.mxu0 %v9013_v27 }
 0x80d   :  { %9016 = vmatprep.subr.bf16.mxu0 %v9015_v49 }
 0x810   :  { %9018 = vmatpush1.bf16.msra.mxu0 %v9017_v46 }
 0x811   :  { %9020 = vmatprep.subr.bf16.mxu0 %v9019_v21 }
 0x814   :  { %9022 = vmatpush1.bf16.msra.mxu0 %v9021_v41 }
 0x88a   :  { %v4953_v60 = vpop.f32.mrb[28].mxu0  ;;  %v5024_v47 = vpop.f32.mrb[62].mxu1 }
 0x88b   :  { %v9053_v12 = vadd.f32 %v4953_v60, %v11881_v59  ;;  %v4955_v10 = vpop.f32.mrb[29].mxu0  ;;  %v7131_v15 = vpop.f32.mrb[63].mxu1  ;;  %v5179_v38 = vadd.f32 %v11077_v28, %v5024_v47 }
 0x88c   :  { %v9054_v61 = vadd.f32 %v4955_v10, %v11753_v57 }
 0x88d   :  { %v5170_v23 = vmul.f32 0.5, %v9053_v12  ;;  %v11891_v12 = vld [vmem:[#allocation96_spill] sm:$0xff] }
 0x88e   :  { %v5175_v14 = vmul.f32 0.5, %v9054_v61 }
 0x88f   :  { %9187 = vtanh.f32 %v5170_v23 }
 0x890   :  { %9189 = vtanh.f32 %v5175_v14 }
 0x899   :  { %v9188_v51 = vpop.eup %9187 }
 0x89a   :  { %v5172_v56 = vmul.f32 0.5, %v9188_v51  ;;  %v9190_v50 = vpop.eup %9189 }
 0x89b   :  { %v5177_v59 = vmul.f32 0.5, %v9190_v50 }
 0x89c   :  { %v5173_v0 = vadd.f32 0.5, %v5172_v56 }
 0x89d   :  { %v5178_v43 = vadd.f32 0.5, %v5177_v59 }
 0x89e   :  { %v5180_v5 = vmul.f32 %v5179_v38, %v5173_v0 }
 0x89f   :  { %v5183_v57 = vsub.f32 1.0, %v5178_v43  ;;  %v5185_v28 = vmul.f32 %v5178_v43, %v11085_v52 }
 0x8a0   :  { %v5181_v39 = vadd.f32 %v5180_v5, %v4742_v58 }
 0x8a2   :  { %9191 = vtanh.f32 %v5181_v39 }
 0x8aa   :  { %v5094_v37 = vpop.f32.mrb[30].mxu0  ;;  %v5165_v18 = vpop.f32.mrb[64].mxu1 }
 0x8ab   :  { %v9055_v4 = vadd.f32 %v5094_v37, %v10062_v7  ;;  %v5096_v9 = vpop.f32.mrb[31].mxu0  ;;  %v7166_v17 = vpop.f32.mrb[65].mxu1  ;;  %v5197_v26 = vadd.f32 %v11107_v19, %v5165_v18  ;;  %v4884_v7 = vadd.f32 %v11137_v63, %v10089_v2  ;;  %v11883_v19 = vld [vmem:[#allocation71_spill] sm:$0xff] }
 0x8ac   :  { %v9192_v22 = vpop.eup %9191  ;;  %v9056_v3 = vadd.f32 %v5096_v9, %v10066_v1  ;;  %v11884_v2 = vld [vmem:[#allocation79_spill] sm:$0xff] }
 0x8ad   :  { %v5188_v62 = vmul.f32 0.5, %v9055_v4  ;;  %v5184_v35 = vmul.f32 %v9192_v22, %v5183_v57  ;;  %v11885_v63 = vld [vmem:[#allocation83_spill] sm:$0xff] }
 0x8ae   :  { %v5193_v24 = vmul.f32 0.5, %v9056_v3 }
 0x8af   :  { %9193 = vtanh.f32 %v5188_v62  ;;  %v5186_v42 = vadd.f32 %v5185_v28, %v5184_v35 }
 0x8b0   :  { %9195 = vtanh.f32 %v5193_v24 }
 0x8b9   :  { %v9194_v45 = vpop.eup %9193 }
 0x8ba   :  { %v5190_v25 = vmul.f32 0.5, %v9194_v45  ;;  %v9196_v44 = vpop.eup %9195 }
 0x8bb   :  { %v5195_v40 = vmul.f32 0.5, %v9196_v44 }
 0x8bc   :  { %v5191_v55 = vadd.f32 0.5, %v5190_v25 }
 0x8bd   :  { %v5196_v29 = vadd.f32 0.5, %v5195_v40 }
 0x8be   :  { %v5198_v13 = vmul.f32 %v5197_v26, %v5191_v55 }
 0x8bf   :  { %v5201_v53 = vsub.f32 1.0, %v5196_v29  ;;  %v5203_v27 = vmul.f32 %v5196_v29, %v11133_v6 }
 0x8c0   :  { %v5199_v54 = vadd.f32 %v5198_v13, %v4884_v7 }
 0x8c2   :  { %9197 = vtanh.f32 %v5199_v54 }
 0x8cc   :  { %v9198_v1 = vpop.eup %9197 }
 0x8cd   :  { %v5202_v11 = vmul.f32 %v9198_v1, %v5201_v53 }
 0x8cf   :  { %v5204_v49 = vadd.f32 %v5203_v27, %v5202_v11 }
 0x8d1   :  { %5366 = vmatprep.mubr.f32.mxu0 %v5204_v49 }
 0x8d2   :  { %5367 = vmatmul.mubr.f32.vlgmr.msra.gmra.mrb[32].mxu0 %v11882_v30 }
 0x8d3   :  { %5372 = vmatprep.mubr.f32.mxu0 %v11133_v6  ;;  %v11889_v6 = vld [vmem:[#allocation70_spill] sm:$0xff] }
 0x8d6   :  { %5373 = vmatmul.mubr.f32.gmra.mrb[34].mxu0 %v11883_v19 }
 0x8d7   :  { %5378 = vmatprep.mubr.f32.mxu0 %v10959_v36  ;;  %v11890_v36 = vld [vmem:[#allocation97_spill] sm:$0xff] }
 0x8da   :  { %5379 = vmatmul.mubr.f32.gmra.mrb[36].mxu0 %v11884_v2 }
 0x8db   :  { %5384 = vmatprep.mubr.f32.mxu0 %v10795_v31  ;;  %v5271_v31 = vld [vmem:[%s11205_s10] sm:$0x3]  ;;  %s9430_s10 = smov [#allocation14]  }
 0x8dc   :  { %v5299_v46 = vrot.slane %v5271_v31, %v11890_v36  ;;  %v11170_v10 = vrot.slane %v5271_v31, %v11891_v12  ;;  %s5486_s0 = sshll.u32 %s9430_s10, 4  ;;  %s5487_s0 = int_to_ptr.vmem [resolvable:$true] %s5486_s0 }
 0x8dd   :  { %s9383_s15 = scalar_lea.vmem %s5487_s0, 1024  ;;  %p9388_p7 = scmp.lt.s32.totalorder %s5487_s0, %s5487_s0 }
 0x8de   :  { %5385 = vmatmul.mubr.f32.gmra.mrb[38].mxu0 %v11885_v63  ;;  %p9384_p6 = scmp.ne.s32.totalorder %s5487_s0, %s9383_s15  ;;  %p9389_p8 = scmp.lt.s32.totalorder %s9383_s15, %s9383_s15 }
 0x8df   :  { %5390 = vmatprep.mubr.f32.mxu0 %v11886_v48 }
 0x8e0   :  { %p9390_p9 = por %p9389_p8, %p9388_p7 }
 0x8e2   :  { %5391 = vmatmul.mubr.f32.gmra.mrb[40].mxu0 %v10752_v33  ;;  %p9391_p10 = pnand %p9390_p9, %p9384_p6 }
 0x8e3   :  { %5396 = vmatprep.mubr.f32.mxu0 %v11887_v8 }
 0x8e6   :  { %5397 = vmatmul.mubr.f32.gmra.mrb[42].mxu0 %v10916_v20 }
 0x8e7   :  { %5402 = vmatprep.mubr.f32.mxu0 %v11888_v34 }
 0x8ea   :  { %5403 = vmatmul.mubr.f32.gmra.mrb[44].mxu0 %v11085_v52 }
 0x8eb   :  { %5408 = vmatprep.mubr.f32.mxu0 %v11889_v6 }
 0x8ee   :  { %5409 = vmatmul.mubr.f32.gmra.mrb[46].mxu0 %v5186_v42 }
 0x9a5   :  { %v5368_v21 = vpop.f32.mrb[32].mxu0 }
 0x9a6   :  { %v5370_v32 = vpop.f32.mrb[33].mxu0  ;;  %v5369_v51 = vadd.f32 %v5368_v21, %v11170_v10 }
 0x9a7   :  { %v5371_v33 = vadd.f32 %v5370_v32, %v5299_v46 }
 0x9a9   :  { %9199 = vtanh.f32 %v5371_v33  ;;  %v5374_v16 = vpop.f32.mrb[34].mxu0 }
 0x9aa   :  { %v5376_v41 = vpop.f32.mrb[35].mxu0  ;;  %v5375_v50 = vadd.f32 %v5374_v16, %v11170_v10 }
 0x9ab   :  { %v5377_v20 = vadd.f32 %v5376_v41, %v5299_v46 }
 0x9ad   :  { %9201 = vtanh.f32 %v5377_v20  ;;  %v5380_v60 = vpop.f32.mrb[36].mxu0 }
 0x9ae   :  { %v5382_v47 = vpop.f32.mrb[37].mxu0  ;;  %v5381_v57 = vadd.f32 %v5380_v60, %v11170_v10 }
 0x9af   :  { %v5383_v52 = vadd.f32 %v5382_v47, %v5299_v46 }
 0x9b1   :  { %9203 = vtanh.f32 %v5383_v52  ;;  %v5386_v15 = vpop.f32.mrb[38].mxu0 }
 0x9b2   :  { %v5388_v23 = vpop.f32.mrb[39].mxu0  ;;  %v5387_v28 = vadd.f32 %v5386_v15, %v11170_v10 }
 0x9b3   :  { %v9200_v61 = vpop.eup %9199  ;;  %v5389_v14 = vadd.f32 %v5388_v23, %v5299_v46 }
 0x9b4   :  { %v5431_v56 = vmul.f32 0.5, %v9200_v61 }
 0x9b5   :  { %9205 = vtanh.f32 %v5389_v14  ;;  %v5392_v0 = vpop.f32.mrb[40].mxu0 }
 0x9b6   :  { %9207 = vtanh.f32 %v5431_v56  ;;  %v5394_v38 = vpop.f32.mrb[41].mxu0  ;;  %v5393_v29 = vadd.f32 %v5392_v0, %v11170_v10 }
 0x9b7   :  { %v9202_v58 = vpop.eup %9201  ;;  %v5395_v5 = vadd.f32 %v5394_v38, %v5299_v46  ;;  %9209 = vtanh.f32 %v5369_v51 }
 0x9b8   :  { %v5432_v39 = vmul.f32 0.5, %v9202_v58 }
 0x9b9   :  { %9211 = vtanh.f32 %v5395_v5  ;;  %v5398_v59 = vpop.f32.mrb[42].mxu0 }
 0x9ba   :  { %9213 = vtanh.f32 %v5432_v39  ;;  %v5400_v43 = vpop.f32.mrb[43].mxu0  ;;  %v5399_v2 = vadd.f32 %v5398_v59, %v11170_v10 }
 0x9bb   :  { %v9204_v37 = vpop.eup %9203  ;;  %v5401_v18 = vadd.f32 %v5400_v43, %v5299_v46  ;;  %9215 = vtanh.f32 %v5375_v50 }
 0x9bc   :  { %v5433_v4 = vmul.f32 0.5, %v9204_v37 }
 0x9bd   :  { %9217 = vtanh.f32 %v5401_v18  ;;  %v5404_v9 = vpop.f32.mrb[44].mxu0 }
 0x9be   :  { %9219 = vtanh.f32 %v5433_v4  ;;  %v5406_v17 = vpop.f32.mrb[45].mxu0 }
 0x9bf   :  { %v9206_v22 = vpop.eup %9205  ;;  %v5407_v62 = vadd.f32 %v5406_v17, %v5299_v46  ;;  %9221 = vtanh.f32 %v5381_v57 }
 0x9c0   :  { %v9208_v35 = vpop.eup %9207  ;;  %v5434_v3 = vmul.f32 0.5, %v9206_v22 }
 0x9c1   :  { %v5447_v42 = vmul.f32 0.5, %v9208_v35  ;;  %9223 = vtanh.f32 %v5407_v62  ;;  %v5410_v24 = vpop.f32.mrb[46].mxu0  ;;  %v9210_v45 = vpop.eup %9209 }
 0x9c2   :  { %9225 = vtanh.f32 %v5434_v3  ;;  %v5412_v25 = vpop.f32.mrb[47].mxu0  ;;  %v5411_v47 = vadd.f32 %v5410_v24, %v11170_v10 }
 0x9c3   :  { %v9212_v55 = vpop.eup %9211  ;;  %v5455_v26 = vadd.f32 0.5, %v5447_v42  ;;  %v5413_v7 = vadd.f32 %v5412_v25, %v5299_v46  ;;  %9227 = vtanh.f32 %v5387_v28  ;;  %v5405_v46 = vadd.f32 %v5404_v9, %v11170_v10 }
 0x9c4   :  { %v9214_v13 = vpop.eup %9213  ;;  %v5435_v44 = vmul.f32 0.5, %v9212_v55 }
 0x9c5   :  { %v5463_v54 = vmul.f32 %v9210_v45, %v5455_v26  ;;  %v5448_v40 = vmul.f32 0.5, %v9214_v13  ;;  %9229 = vtanh.f32 %v5413_v7  ;;  %v9216_v53 = vpop.eup %9215 }
 0x9c6   :  { %9231 = vtanh.f32 %v5435_v44 }
 0x9c7   :  { %v9218_v1 = vpop.eup %9217  ;;  %5473 = vst [vmem:[#allocation14] sm:$0xff] %v5463_v54  ;;  %v5456_v11 = vadd.f32 0.5, %v5448_v40  ;;  %9233 = vtanh.f32 %v5393_v29 }
 0x9c8   :  { %v9220_v27 = vpop.eup %9219  ;;  %v5436_v49 = vmul.f32 0.5, %v9218_v1 }
 0x9c9   :  { %v5464_v30 = vmul.f32 %v9216_v53, %v5456_v11  ;;  %v5449_v19 = vmul.f32 0.5, %v9220_v27  ;;  %v9222_v63 = vpop.eup %9221 }
 0x9ca   :  { %9235 = vtanh.f32 %v5436_v49 }
 0x9cb   :  { %v9224_v48 = vpop.eup %9223  ;;  %5474 = vst [vmem:[#allocation14 + $0x8] sm:$0xff] %v5464_v30  ;;  %v5457_v8 = vadd.f32 0.5, %v5449_v19  ;;  %9237 = vtanh.f32 %v5399_v2 }
 0x9cc   :  { %v9226_v34 = vpop.eup %9225  ;;  %v5437_v6 = vmul.f32 0.5, %v9224_v48 }
 0x9cd   :  { %v5465_v31 = vmul.f32 %v9222_v63, %v5457_v8  ;;  %v5450_v36 = vmul.f32 0.5, %v9226_v34  ;;  %v9228_v21 = vpop.eup %9227 }
 0x9ce   :  { %9239 = vtanh.f32 %v5437_v6 }
 0x9cf   :  { %v9230_v32 = vpop.eup %9229  ;;  %5475 = vst [vmem:[#allocation14 + $0x10] sm:$0xff] %v5465_v31  ;;  %v5458_v33 = vadd.f32 0.5, %v5450_v36  ;;  %9241 = vtanh.f32 %v5405_v46 }
 0x9d0   :  { %v9232_v16 = vpop.eup %9231  ;;  %v5438_v41 = vmul.f32 0.5, %v9230_v32 }
 0x9d1   :  { %v5466_v20 = vmul.f32 %v9228_v21, %v5458_v33  ;;  %v5451_v60 = vmul.f32 0.5, %v9232_v16  ;;  %v9234_v52 = vpop.eup %9233 }
 0x9d2   :  { %9243 = vtanh.f32 %v5438_v41 }
 0x9d3   :  { %5476 = vst [vmem:[#allocation14 + $0x18] sm:$0xff] %v5466_v20  ;;  %v5459_v12 = vadd.f32 0.5, %v5451_v60  ;;  %9245 = vtanh.f32 %v5411_v47 }
 0x9d4   :  { %v9236_v15 = vpop.eup %9235 }
 0x9d5   :  { %v5467_v23 = vmul.f32 %v9234_v52, %v5459_v12  ;;  %v5452_v61 = vmul.f32 0.5, %v9236_v15  ;;  %v9238_v14 = vpop.eup %9237 }
 0x9d7   :  { %5477 = vst [vmem:[#allocation14 + $0x20] sm:$0xff] %v5467_v23  ;;  %v5460_v51 = vadd.f32 0.5, %v5452_v61 }
 0x9d8   :  { %v9240_v56 = vpop.eup %9239 }
 0x9d9   :  { %v5468_v0 = vmul.f32 %v9238_v14, %v5460_v51  ;;  %v5453_v38 = vmul.f32 0.5, %v9240_v56  ;;  %v9242_v58 = vpop.eup %9241 }
 0x9db   :  { %5478 = vst [vmem:[#allocation14 + $0x28] sm:$0xff] %v5468_v0  ;;  %v5461_v5 = vadd.f32 0.5, %v5453_v38 }
 0x9dc   :  { %v9244_v50 = vpop.eup %9243 }
 0x9dd   :  { %v5469_v39 = vmul.f32 %v9242_v58, %v5461_v5  ;;  %v5454_v10 = vmul.f32 0.5, %v9244_v50  ;;  %v9246_v43 = vpop.eup %9245 }
 0x9df   :  { %5479 = vst [vmem:[#allocation14 + $0x30] sm:$0xff] %v5469_v39  ;;  %v5462_v59 = vadd.f32 0.5, %v5454_v10 }
 0x9e1   :  { %v5470_v37 = vmul.f32 %v9246_v43, %v5462_v59 }
 0x9e3   :  { %5480 = vst [vmem:[#allocation14 + $0x38] sm:$0xff] %v5470_v37 }
 0x9e4   :  { %9394 = shalt.err (!%p9391_p10)
}
 0x9e5   :  { %s9395_s17 = scalar_lea.hbm %s11206_s11, 1024 }
 0x9e6   :  { %p9396_p11 = scmp.ne.s32.totalorder %s11206_s11, %s9395_s17  ;;  %p9399_p12 = scmp.lt.u32.totalorder %s9395_s17, %s11206_s11 }
 0x9e8   :  { %p9401_p13 = pnand %p9399_p12, %p9396_p11 }
 0x9ea   :  { %9404 = shalt.err (!%p9401_p13)
}
 0x9eb   :  { %5492 = dma.vmem_to_hbm [thread:$0]  %s5487_s0, 1024, %s11206_s11, [#allocation5], %s9420_s5, %s9420_s5, %s9421_s13  }
 0x9ec   :  { %9413 = dma.done.wait [#allocation5], 1024  }
 0x9ed   :  { %9414 = vsyncadd [#allocation5], 4294966272 }
 0x9ee   :  { %5496 = vsyncpa [#allocation4], 1 }
 0x9ef   :  { %5497 = vsyncpa [#allocation7], 1 }
 0x9f0   :  { %5498 = vsyncpa [#allocation10], 1 }
 0x9f1   :  { %5499 = vsyncpa [#allocation13], 1 }
 0x9f2   :  { %5500 = vsyncpa [#allocation5], 1 }

</bundles_post_ra>
